<compile_context>
chip_gen: v7x
topology: tpu7x:2x2x1
jax: 0.10.0
libtpu: 0.0.40
codegen_flags: <defaults>
</compile_context>

<pallas_src>
import jax
import jax.numpy as jnp
from jax.experimental import pallas as pl
from jax.experimental.pallas import tpu as pltpu

NEG_SLOPE = 0.01                 # F.leaky_relu default negative slope
_TARGET_LB = 256                 # accumulator rows per conv block (reg-resident)
_VMEM_LIMIT = 32 * 1024 * 1024   # safe on v5e/v6e/v7x; blocks are far smaller


def _leaky(y):
    return jnp.where(y >= 0.0, y, NEG_SLOPE * y)


def _pick_rb(Ho, Wo):
    """Smallest RB dividing Ho with RB*Wo >= _TARGET_LB and RB*Wo % 8 == 0
    (8-sublane rule when the row axis is tiled); fallback: full extent."""
    for rb in range(1, Ho + 1):
        if Ho % rb:
            continue
        lb = rb * Wo
        if lb % 8 and rb != Ho:
            continue
        if lb >= _TARGET_LB:
            return rb
    return Ho


# ----------------------------------------------------------------------------
# Fused Conv2d(kernel=5, stride=2, padding=2) + bias + leaky_relu
# ----------------------------------------------------------------------------
def conv2d_leaky(x_nhwc, w_kkio, b_row):
    """x_nhwc:(N,H,W,Cin) float (H,W even); w_kkio:(5,5,Cin,Cout) bf16;
    b_row:(1,Cout) f32.  Returns (N, H//2, W//2, Cout) bf16."""
    N, H, W, Cin = x_nhwc.shape
    KH, KW, Cin_w, Cout = w_kkio.shape
    assert (KH, KW) == (5, 5) and Cin_w == Cin
    assert H % 2 == 0 and W % 2 == 0, (H, W)
    Ho, Wo = H // 2, W // 2

    RB = _pick_rb(Ho, Wo)
    nrb = Ho // RB
    LB = RB * Wo                              # output rows per grid step

    x = x_nhwc.astype(jnp.bfloat16)
    xp = jnp.pad(x, ((0, 0), (2, 2), (2, 2), (0, 0)))          # zero-pad, bf16

    if Cin == 1:
        # conv1: pack all 25 taps into the lane dim -> one (LB,25)x(25,Cout) matmul.
        K = KH * KW
        ph = jnp.stack([xp[:, ki:ki + 2 * Ho:2, kj:kj + 2 * Wo:2, 0]
                        for ki in range(KH) for kj in range(KW)], axis=-1)
        ph = ph.reshape(N, 1, nrb, LB, K)                       # no halo needed
        w_tap = w_kkio.reshape(1, K, Cout)
        plan = [(0, 0, 0)]                                      # (phase, row_off, w_idx)
    else:
        # conv2/conv3: partial im2col along W (5 shifted columns lane-packed).
        K = KW * Cin
        Hph = Ho + 2                                            # padded rows / parity
        win = jnp.stack([xp[:, :, kj:kj + 2 * Wo:2, :] for kj in range(KW)], axis=3)
        win = win.reshape(N, 2 * Hph, Wo, K)
        win = win.reshape(N, Hph, 2, Wo, K).transpose(0, 2, 1, 3, 4)  # (N,2,Hph,Wo,K)
        # 2-row halo duplicated per row block -> bounded, non-overlapping tiles.
        ph = jnp.stack([win[:, :, rb * RB: rb * RB + RB + 2] for rb in range(nrb)],
                       axis=2)
        ph = ph.reshape(N, 2, nrb, (RB + 2) * Wo, K)
        w_tap = w_kkio.reshape(KH, K, Cout)
        plan = [(ki % 2, (ki // 2) * Wo, ki) for ki in range(KH)]

    P, halo_rows = ph.shape[1], ph.shape[3]

    def kernel(ph_ref, w_ref, b_ref, o_ref):
        # The whole 25-tap contraction happens inside one grid step: accumulate in
        # f32 registers and touch the output VMEM once (single bf16 store).
        acc = None
        for pi, off, wi in plan:                    # <=5 static taps after fusion
            lhs = ph_ref[0, pi, 0, pl.ds(off, LB), :]            # (LB, K) bf16
            part = jnp.dot(lhs, w_ref[wi], preferred_element_type=jnp.float32)
            acc = part if acc is None else acc + part
        o_ref[0] = _leaky(acc + b_ref[...]).astype(o_ref.dtype)  # f32 epilogue

    flops = 2 * N * Ho * Wo * Cout * KH * KW * Cin
    bytes_accessed = (ph.size * 2 + w_tap.size * 2 + b_row.size * 4
                      + N * Ho * Wo * Cout * 2)

    out = pl.pallas_call(
        kernel,
        out_shape=jax.ShapeDtypeStruct((N, Ho * Wo, Cout), jnp.bfloat16),
        grid=(N, nrb),
        in_specs=[
            pl.BlockSpec((1, P, 1, halo_rows, K), lambda n, r: (n, 0, r, 0, 0)),
            pl.BlockSpec(w_tap.shape, lambda n, r: (0, 0, 0)),
            pl.BlockSpec((1, Cout), lambda n, r: (0, 0)),
        ],
        out_specs=pl.BlockSpec((1, LB, Cout), lambda n, r: (n, r, 0)),
        compiler_params=pltpu.CompilerParams(
            dimension_semantics=("parallel", "parallel"),
            vmem_limit_bytes=_VMEM_LIMIT,
        ),
        cost_estimate=pl.CostEstimate(
            flops=flops, transcendentals=0, bytes_accessed=bytes_accessed),
    )(ph, w_tap, b_row)
    return out.reshape(N, Ho, Wo, Cout)


# ----------------------------------------------------------------------------
# Fused MLP head: leaky(fc3(leaky(fc2(leaky(fc1(x)))))) — fc1 K-tiled over Fp
# ----------------------------------------------------------------------------
def fc_head_leaky(xf, w1, b1, w2, b2, w3, b3):
    """xf:(M,Fp) bf16 flattened conv3 features; w1 bf16, fc2/fc3 params f32."""
    M, Fp = xf.shape
    F1, F2, F3 = w1.shape[1], w2.shape[1], w3.shape[1]
    assert w1.shape[0] == Fp and w2.shape[0] == F1 and w3.shape[0] == F2

    TM = min(M, 256)
    if M % TM:
        TM = M   # TODO(synk): masked tail for large non-divisible batch sizes
    TK = Fp
    for cand in (2048, 1024, 512, 256, 128):
        if Fp % cand == 0:
            TK = cand
            break
    nk = Fp // TK

    def kernel(x_ref, w1_ref, b1_ref, w2_ref, b2_ref, w3_ref, b3_ref, o_ref, acc_ref):
        kk = pl.program_id(1)

        @pl.when(kk == 0)
        def _init():
            acc_ref[...] = jnp.zeros_like(acc_ref)

        acc_ref[...] += jnp.dot(x_ref[...], w1_ref[...],
                                preferred_element_type=jnp.float32)

        @pl.when(kk == nk - 1)
        def _finish():
            h = _leaky(acc_ref[...] + b1_ref[...])
            h = _leaky(jnp.dot(h, w2_ref[...], preferred_element_type=jnp.float32)
                       + b2_ref[...])
            h = _leaky(jnp.dot(h, w3_ref[...], preferred_element_type=jnp.float32)
                       + b3_ref[...])
            o_ref[...] = h

    flops = 2 * M * (Fp * F1 + F1 * F2 + F2 * F3)
    bytes_accessed = (xf.size * 2 + w1.size * 2 + (w2.size + w3.size) * 4
                      + (b1.size + b2.size + b3.size) * 4 + M * F3 * 4)
    return pl.pallas_call(
        kernel,
        out_shape=jax.ShapeDtypeStruct((M, F3), jnp.float32),
        grid=(M // TM, nk),
        in_specs=[
            pl.BlockSpec((TM, TK), lambda i, k: (i, k)),
            pl.BlockSpec((TK, F1), lambda i, k: (k, 0)),
            pl.BlockSpec((1, F1), lambda i, k: (0, 0)),
            pl.BlockSpec((F1, F2), lambda i, k: (0, 0)),
            pl.BlockSpec((1, F2), lambda i, k: (0, 0)),
            pl.BlockSpec((F2, F3), lambda i, k: (0, 0)),
            pl.BlockSpec((1, F3), lambda i, k: (0, 0)),
        ],
        out_specs=pl.BlockSpec((TM, F3), lambda i, k: (i, 0)),
        scratch_shapes=[pltpu.VMEM((TM, F1), jnp.float32)],
        compiler_params=pltpu.CompilerParams(
            dimension_semantics=("parallel", "arbitrary"),
            vmem_limit_bytes=_VMEM_LIMIT,
        ),
        cost_estimate=pl.CostEstimate(
            flops=flops, transcendentals=0, bytes_accessed=bytes_accessed),
    )(xf, w1, b1, w2, b2, w3, b3)


# ----------------------------------------------------------------------------
# Full ObserverNetwork forward
# ----------------------------------------------------------------------------
def observer_forward(img_nchw, kp):
    """img_nchw: (N, 1, H, W).  Returns tool_reg: (N, output_dims) float32."""
    x = jnp.transpose(img_nchw, (0, 2, 3, 1)).astype(jnp.float32)   # NHWC (C=1)
    x = conv2d_leaky(x, kp["conv1_w"], kp["conv1_b"])
    x = conv2d_leaky(x, kp["conv2_w"], kp["conv2_b"])
    x = conv2d_leaky(x, kp["conv3_w"], kp["conv3_b"])
    # Flatten with no runtime permutation: torch's NCHW flatten order is folded
    # into kp["fc1_w"] at parameter-prep time; xf stays bf16.
    xf = x.reshape(x.shape[0], -1)
    return fc_head_leaky(xf, kp["fc1_w"], kp["fc1_b"], kp["fc2_w"], kp["fc2_b"],
                         kp["fc3_w"], kp["fc3_b"])


# ----------------------------------------------------------------------------
# Parameters: torch-layout init + one-time conversion to kernel layouts
# ----------------------------------------------------------------------------
def init_params(key, input_hw=(64, 64), conv_channels=(16, 32, 64),
                hidden_layers=(64, 8), output_dims=1):
    """Synthetic parameters in the PyTorch module's native layouts."""
    H, W = input_hw
    c1, c2, c3 = conv_channels
    h0, h1 = hidden_layers
    flat = c3 * (H // 8) * (W // 8)
    ks = jax.random.split(key, 12)

    def w(k, shape, scale):
        return jax.random.normal(k, shape, jnp.float32) * scale

    return {
        "conv1_w": w(ks[0], (c1, 1, 5, 5), 0.20), "conv1_b": w(ks[1], (c1,), 0.10),
        "conv2_w": w(ks[2], (c2, c1, 5, 5), 0.05), "conv2_b": w(ks[3], (c2,), 0.05),
        "conv3_w": w(ks[4], (c3, c2, 5, 5), 0.05), "conv3_b": w(ks[5], (c3,), 0.05),
        "fc1_w": w(ks[6], (h0, flat), 0.02), "fc1_b": w(ks[7], (h0,), 0.02),
        "fc2_w": w(ks[8], (h1, h0), 0.10), "fc2_b": w(ks[9], (h1,), 0.10),
        "fc3_w": w(ks[10], (output_dims, h1), 0.10),
        "fc3_b": w(ks[11], (output_dims,), 0.10),
    }


def prepare_params(p, input_hw):
    """One-time conversion of torch-layout params into kernel-ready layouts."""
    H, W = input_hw
    kp = {}
    for i in (1, 2, 3):
        w = jnp.transpose(p[f"conv{i}_w"], (2, 3, 1, 0))        # (5,5,Cin,Cout)
        kp[f"conv{i}_w"] = w.astype(jnp.bfloat16)
        kp[f"conv{i}_b"] = p[f"conv{i}_b"].reshape(1, -1).astype(jnp.float32)
    # fc1: fold torch's NCHW flatten order into the weight; rows ordered (j, k, c).
    h0, flat = p["fc1_w"].shape
    c3 = p["conv3_w"].shape[0]
    Ho3, Wo3 = H // 8, W // 8
    assert flat == c3 * Ho3 * Wo3
    w1 = p["fc1_w"].reshape(h0, c3, Ho3, Wo3).transpose(2, 3, 1, 0)  # (Ho3,Wo3,c3,h0)
    kp["fc1_w"] = w1.reshape(Ho3 * Wo3 * c3, h0).astype(jnp.bfloat16)
    kp["fc1_b"] = p["fc1_b"].reshape(1, -1).astype(jnp.float32)
    kp["fc2_w"] = jnp.transpose(p["fc2_w"]).astype(jnp.float32)
    kp["fc2_b"] = p["fc2_b"].reshape(1, -1).astype(jnp.float32)
    kp["fc3_w"] = jnp.transpose(p["fc3_w"]).astype(jnp.float32)
    kp["fc3_b"] = p["fc3_b"].reshape(1, -1).astype(jnp.float32)
    return kp


# ----------------------------------------------------------------------------
# Plain-XLA reference (same bf16-input / f32-accumulate precision) - self-check
# ----------------------------------------------------------------------------
def _reference_forward(img_nchw, p):
    x = img_nchw.astype(jnp.float32)

    def conv(x, w, b):
        y = jax.lax.conv_general_dilated(
            x.astype(jnp.bfloat16), w.astype(jnp.bfloat16),
            window_strides=(2, 2), padding=((2, 2), (2, 2)),
            dimension_numbers=("NCHW", "OIHW", "NCHW"),
            preferred_element_type=jnp.float32)
        y = y + b.reshape(1, -1, 1, 1).astype(jnp.float32)
        return jnp.where(y >= 0.0, y, NEG_SLOPE * y)

    x = conv(x, p["conv1_w"], p["conv1_b"])
    x = conv(x, p["conv2_w"], p["conv2_b"])
    x = conv(x, p["conv3_w"], p["conv3_b"])
    x = x.reshape(x.shape[0], -1)
    h = jnp.dot(x.astype(jnp.bfloat16), p["fc1_w"].T.astype(jnp.bfloat16),
                preferred_element_type=jnp.float32) + p["fc1_b"]
    h = jnp.where(h >= 0.0, h, NEG_SLOPE * h)
    h = jnp.dot(h, p["fc2_w"].T, preferred_element_type=jnp.float32) + p["fc2_b"]
    h = jnp.where(h >= 0.0, h, NEG_SLOPE * h)
    h = jnp.dot(h, p["fc3_w"].T, preferred_element_type=jnp.float32) + p["fc3_b"]
    return jnp.where(h >= 0.0, h, NEG_SLOPE * h)


if __name__ == "__main__":
    key = jax.random.PRNGKey(0)
    pkey, ikey = jax.random.split(key)

    # Small test config (module default is 256x256; spatial must be /8).
    H = W = 64
    batch = 2
    p_torch = init_params(pkey, input_hw=(H, W))
    kp = prepare_params(p_torch, (H, W))

    img = jax.random.uniform(ikey, (batch, 1, H, W), dtype=jnp.float32)

    out = jax.block_until_ready(jax.jit(observer_forward)(img, kp))
    assert out.shape == (batch, 1), out.shape
    assert bool(jnp.all(jnp.isfinite(out)))

    # Structural self-check against a precision-matched XLA reference.
    ref = _reference_forward(img, p_torch)
    assert bool(jnp.allclose(out, ref, rtol=5e-2, atol=5e-3)), (out, ref)

    print("KERNEL_OK")
</pallas_src>

<mosaic_0001>
module attributes {stable_mosaic.version = 11 : i64} {
  func.func @kernel(%arg0: i32, %arg1: i32, %arg2: memref<1x1x1x256x25xbf16, #tpu.memory_space<vmem>>, %arg3: memref<1x25x16xbf16, #tpu.memory_space<vmem>>, %arg4: memref<1x16xf32, #tpu.memory_space<vmem>>, %arg5: memref<1x256x16xbf16, #tpu.memory_space<vmem>>) attributes {dimension_semantics = [#tpu.dimension_semantics<parallel>, #tpu.dimension_semantics<parallel>], iteration_bounds = array<i64: 2, 4>, scalar_prefetch = 0 : i64, scratch_operands = 0 : i64, tpu.core_type = #tpu.core_type<tc>, window_params = [{transform_indices = @transform_0, window_bounds = array<i64: 1, 1, 1, 256, 25>}, {pipeline_mode = #tpu.pipeline_mode<synchronous>, transform_indices = @transform_1, window_bounds = array<i64: 1, 25, 16>}, {pipeline_mode = #tpu.pipeline_mode<synchronous>, transform_indices = @transform_2, window_bounds = array<i64: 1, 16>}, {transform_indices = @transform_3, window_bounds = array<i64: 1, 256, 16>}]} {
    %c0 = arith.constant 0 : index
    %c0_0 = arith.constant 0 : index
    %c0_1 = arith.constant 0 : index
    %c0_2 = arith.constant 0 : index
    %c0_3 = arith.constant 0 : index
    %0 = vector.load %arg2[%c0, %c0_0, %c0_1, %c0_2, %c0_3] : memref<1x1x1x256x25xbf16, #tpu.memory_space<vmem>>, vector<1x1x1x256x25xbf16>
    %1 = vector.shape_cast %0 : vector<1x1x1x256x25xbf16> to vector<256x25xbf16>
    %c0_4 = arith.constant 0 : index
    %c0_5 = arith.constant 0 : index
    %c0_6 = arith.constant 0 : index
    %2 = vector.load %arg3[%c0_4, %c0_5, %c0_6] : memref<1x25x16xbf16, #tpu.memory_space<vmem>>, vector<1x25x16xbf16>
    %3 = vector.shape_cast %2 : vector<1x25x16xbf16> to vector<25x16xbf16>
    %cst = arith.constant dense<0.000000e+00> : vector<256x16xf32>
    %4 = tpu.matmul %1, %3, %cst {dimension_numbers = #tpu.dot_dimension_numbers<[1], [0], [0], [1], [0, 0, 1, 1], [], []>} : vector<256x25xbf16>, vector<25x16xbf16>, vector<256x16xf32> -> vector<256x16xf32>
    %c0_7 = arith.constant 0 : index
    %c0_8 = arith.constant 0 : index
    %5 = vector.load %arg4[%c0_7, %c0_8] : memref<1x16xf32, #tpu.memory_space<vmem>>, vector<1x16xf32>
    %6 = vector.broadcast %5 : vector<1x16xf32> to vector<256x16xf32>
    %7 = arith.addf %4, %6 : vector<256x16xf32>
    %cst_9 = arith.constant 0.000000e+00 : f32
    %8 = vector.broadcast %cst_9 : f32 to vector<256x16xf32>
    %9 = arith.cmpf oge, %7, %8 : vector<256x16xf32>
    %cst_10 = arith.constant 0.00999999977 : f32
    %10 = vector.broadcast %cst_10 : f32 to vector<256x16xf32>
    %11 = arith.mulf %10, %7 : vector<256x16xf32>
    %12 = arith.select %9, %7, %11 : vector<256x16xi1>, vector<256x16xf32>
    %13 = arith.truncf %12 : vector<256x16xf32> to vector<256x16xbf16>
    %c0_11 = arith.constant 0 : index
    %c0_12 = arith.constant 0 : index
    %c0_13 = arith.constant 0 : index
    %14 = vector.load %arg5[%c0_11, %c0_12, %c0_13] : memref<1x256x16xbf16, #tpu.memory_space<vmem>>, vector<1x256x16xbf16>
    %15 = vector.shape_cast %14 : vector<1x256x16xbf16> to vector<256x16xbf16>
    %16 = vector.shape_cast %13 : vector<256x16xbf16> to vector<1x256x16xbf16>
    tpu.vector_store %arg5[%c0_11, %c0_12, %c0_13], %16 {strides = array<i32>} : memref<1x256x16xbf16, #tpu.memory_space<vmem>>, vector<1x256x16xbf16>,
    return
  }
  func.func @transform_0(%arg0: i32, %arg1: i32) -> (i32, i32, i32, i32, i32) {
    %c0_i32 = arith.constant 0 : i32
    %c0_i32_0 = arith.constant 0 : i32
    %c0_i32_1 = arith.constant 0 : i32
    %c0_i32_2 = arith.constant 0 : i32
    return %arg0, %c0_i32, %arg1, %c0_i32_0, %c0_i32_1 : i32, i32, i32, i32, i32
  }
  func.func @transform_1(%arg0: i32, %arg1: i32) -> (i32, i32, i32) {
    %c0_i32 = arith.constant 0 : i32
    %c0_i32_0 = arith.constant 0 : i32
    %c0_i32_1 = arith.constant 0 : i32
    %c0_i32_2 = arith.constant 0 : i32
    return %c0_i32, %c0_i32_0, %c0_i32_1 : i32, i32, i32
  }
  func.func @transform_2(%arg0: i32, %arg1: i32) -> (i32, i32) {
    %c0_i32 = arith.constant 0 : i32
    %c0_i32_0 = arith.constant 0 : i32
    %c0_i32_1 = arith.constant 0 : i32
    return %c0_i32, %c0_i32_0 : i32, i32
  }
  func.func @transform_3(%arg0: i32, %arg1: i32) -> (i32, i32, i32) {
    %c0_i32 = arith.constant 0 : i32
    %c0_i32_0 = arith.constant 0 : i32
    return %arg0, %arg1, %c0_i32 : i32, i32, i32
  }
}

module attributes {stable_mosaic.version = 11 : i64} {
  func.func @kernel(%arg0: i32, %arg1: i32, %arg2: memref<1x2x1x288x80xbf16, #tpu.memory_space<vmem>>, %arg3: memref<5x80x32xbf16, #tpu.memory_space<vmem>>, %arg4: memref<1x32xf32, #tpu.memory_space<vmem>>, %arg5: memref<1x256x32xbf16, #tpu.memory_space<vmem>>) attributes {dimension_semantics = [#tpu.dimension_semantics<parallel>, #tpu.dimension_semantics<parallel>], iteration_bounds = array<i64: 2, 1>, scalar_prefetch = 0 : i64, scratch_operands = 0 : i64, tpu.core_type = #tpu.core_type<tc>, window_params = [{transform_indices = @transform_0, window_bounds = array<i64: 1, 2, 1, 288, 80>}, {pipeline_mode = #tpu.pipeline_mode<synchronous>, transform_indices = @transform_1, window_bounds = array<i64: 5, 80, 32>}, {pipeline_mode = #tpu.pipeline_mode<synchronous>, transform_indices = @transform_2, window_bounds = array<i64: 1, 32>}, {transform_indices = @transform_3, window_bounds = array<i64: 1, 256, 32>}]} {
    %c0 = arith.constant 0 : index
    %c0_0 = arith.constant 0 : index
    %c0_1 = arith.constant 0 : index
    %c0_2 = arith.constant 0 : index
    %c0_3 = arith.constant 0 : index
    %0 = vector.load %arg2[%c0, %c0_0, %c0_1, %c0_2, %c0_3] : memref<1x2x1x288x80xbf16, #tpu.memory_space<vmem>>, vector<1x1x1x256x80xbf16>
    %1 = vector.shape_cast %0 : vector<1x1x1x256x80xbf16> to vector<256x80xbf16>
    %c0_4 = arith.constant 0 : index
    %c0_5 = arith.constant 0 : index
    %c0_6 = arith.constant 0 : index
    %2 = vector.load %arg3[%c0_4, %c0_5, %c0_6] : memref<5x80x32xbf16, #tpu.memory_space<vmem>>, vector<1x80x32xbf16>
    %3 = vector.shape_cast %2 : vector<1x80x32xbf16> to vector<80x32xbf16>
    %cst = arith.constant dense<0.000000e+00> : vector<256x32xf32>
    %4 = tpu.matmul %1, %3, %cst {dimension_numbers = #tpu.dot_dimension_numbers<[1], [0], [0], [1], [0, 0, 1, 1], [], []>} : vector<256x80xbf16>, vector<80x32xbf16>, vector<256x32xf32> -> vector<256x32xf32>
    %c0_7 = arith.constant 0 : index
    %c1 = arith.constant 1 : index
    %c0_8 = arith.constant 0 : index
    %c0_9 = arith.constant 0 : index
    %c0_10 = arith.constant 0 : index
    %5 = vector.load %arg2[%c0_7, %c1, %c0_8, %c0_9, %c0_10] : memref<1x2x1x288x80xbf16, #tpu.memory_space<vmem>>, vector<1x1x1x256x80xbf16>
    %6 = vector.shape_cast %5 : vector<1x1x1x256x80xbf16> to vector<256x80xbf16>
    %c1_11 = arith.constant 1 : index
    %c0_12 = arith.constant 0 : index
    %c0_13 = arith.constant 0 : index
    %7 = vector.load %arg3[%c1_11, %c0_12, %c0_13] : memref<5x80x32xbf16, #tpu.memory_space<vmem>>, vector<1x80x32xbf16>
    %8 = vector.shape_cast %7 : vector<1x80x32xbf16> to vector<80x32xbf16>
    %cst_14 = arith.constant dense<0.000000e+00> : vector<256x32xf32>
    %9 = tpu.matmul %6, %8, %cst_14 {dimension_numbers = #tpu.dot_dimension_numbers<[1], [0], [0], [1], [0, 0, 1, 1], [], []>} : vector<256x80xbf16>, vector<80x32xbf16>, vector<256x32xf32> -> vector<256x32xf32>
    %10 = arith.addf %4, %9 : vector<256x32xf32>
    %c0_15 = arith.constant 0 : index
    %c0_16 = arith.constant 0 : index
    %c0_17 = arith.constant 0 : index
    %c16 = arith.constant 16 : index
    %c0_18 = arith.constant 0 : index
    %11 = vector.load %arg2[%c0_15, %c0_16, %c0_17, %c16, %c0_18] : memref<1x2x1x288x80xbf16, #tpu.memory_space<vmem>>, vector<1x1x1x256x80xbf16>
    %12 = vector.shape_cast %11 : vector<1x1x1x256x80xbf16> to vector<256x80xbf16>
    %c2 = arith.constant 2 : index
    %c0_19 = arith.constant 0 : index
    %c0_20 = arith.constant 0 : index
    %13 = vector.load %arg3[%c2, %c0_19, %c0_20] : memref<5x80x32xbf16, #tpu.memory_space<vmem>>, vector<1x80x32xbf16>
    %14 = vector.shape_cast %13 : vector<1x80x32xbf16> to vector<80x32xbf16>
    %cst_21 = arith.constant dense<0.000000e+00> : vector<256x32xf32>
    %15 = tpu.matmul %12, %14, %cst_21 {dimension_numbers = #tpu.dot_dimension_numbers<[1], [0], [0], [1], [0, 0, 1, 1], [], []>} : vector<256x80xbf16>, vector<80x32xbf16>, vector<256x32xf32> -> vector<256x32xf32>
    %16 = arith.addf %10, %15 : vector<256x32xf32>
    %c0_22 = arith.constant 0 : index
    %c1_23 = arith.constant 1 : index
    %c0_24 = arith.constant 0 : index
    %c16_25 = arith.constant 16 : index
    %c0_26 = arith.constant 0 : index
    %17 = vector.load %arg2[%c0_22, %c1_23, %c0_24, %c16_25, %c0_26] : memref<1x2x1x288x80xbf16, #tpu.memory_space<vmem>>, vector<1x1x1x256x80xbf16>
    %18 = vector.shape_cast %17 : vector<1x1x1x256x80xbf16> to vector<256x80xbf16>
    %c3 = arith.constant 3 : index
    %c0_27 = arith.constant 0 : index
    %c0_28 = arith.constant 0 : index
    %19 = vector.load %arg3[%c3, %c0_27, %c0_28] : memref<5x80x32xbf16, #tpu.memory_space<vmem>>, vector<1x80x32xbf16>
    %20 = vector.shape_cast %19 : vector<1x80x32xbf16> to vector<80x32xbf16>
    %cst_29 = arith.constant dense<0.000000e+00> : vector<256x32xf32>
    %21 = tpu.matmul %18, %20, %cst_29 {dimension_numbers = #tpu.dot_dimension_numbers<[1], [0], [0], [1], [0, 0, 1, 1], [], []>} : vector<256x80xbf16>, vector<80x32xbf16>, vector<256x32xf32> -> vector<256x32xf32>
    %22 = arith.addf %16, %21 : vector<256x32xf32>
    %c0_30 = arith.constant 0 : index
    %c0_31 = arith.constant 0 : index
    %c0_32 = arith.constant 0 : index
    %c32 = arith.constant 32 : index
    %c0_33 = arith.constant 0 : index
    %23 = vector.load %arg2[%c0_30, %c0_31, %c0_32, %c32, %c0_33] : memref<1x2x1x288x80xbf16, #tpu.memory_space<vmem>>, vector<1x1x1x256x80xbf16>
    %24 = vector.shape_cast %23 : vector<1x1x1x256x80xbf16> to vector<256x80xbf16>
    %c4 = arith.constant 4 : index
    %c0_34 = arith.constant 0 : index
    %c0_35 = arith.constant 0 : index
    %25 = vector.load %arg3[%c4, %c0_34, %c0_35] : memref<5x80x32xbf16, #tpu.memory_space<vmem>>, vector<1x80x32xbf16>
    %26 = vector.shape_cast %25 : vector<1x80x32xbf16> to vector<80x32xbf16>
    %cst_36 = arith.constant dense<0.000000e+00> : vector<256x32xf32>
    %27 = tpu.matmul %24, %26, %cst_36 {dimension_numbers = #tpu.dot_dimension_numbers<[1], [0], [0], [1], [0, 0, 1, 1], [], []>} : vector<256x80xbf16>, vector<80x32xbf16>, vector<256x32xf32> -> vector<256x32xf32>
    %28 = arith.addf %22, %27 : vector<256x32xf32>
    %c0_37 = arith.constant 0 : index
    %c0_38 = arith.constant 0 : index
    %29 = vector.load %arg4[%c0_37, %c0_38] : memref<1x32xf32, #tpu.memory_space<vmem>>, vector<1x32xf32>
    %30 = vector.broadcast %29 : vector<1x32xf32> to vector<256x32xf32>
    %31 = arith.addf %28, %30 : vector<256x32xf32>
    %cst_39 = arith.constant 0.000000e+00 : f32
    %32 = vector.broadcast %cst_39 : f32 to vector<256x32xf32>
    %33 = arith.cmpf oge, %31, %32 : vector<256x32xf32>
    %cst_40 = arith.constant 0.00999999977 : f32
    %34 = vector.broadcast %cst_40 : f32 to vector<256x32xf32>
    %35 = arith.mulf %34, %31 : vector<256x32xf32>
    %36 = arith.select %33, %31, %35 : vector<256x32xi1>, vector<256x32xf32>
    %37 = arith.truncf %36 : vector<256x32xf32> to vector<256x32xbf16>
    %c0_41 = arith.constant 0 : index
    %c0_42 = arith.constant 0 : index
    %c0_43 = arith.constant 0 : index
    %38 = vector.load %arg5[%c0_41, %c0_42, %c0_43] : memref<1x256x32xbf16, #tpu.memory_space<vmem>>, vector<1x256x32xbf16>
    %39 = vector.shape_cast %38 : vector<1x256x32xbf16> to vector<256x32xbf16>
    %40 = vector.shape_cast %37 : vector<256x32xbf16> to vector<1x256x32xbf16>
    tpu.vector_store %arg5[%c0_41, %c0_42, %c0_43], %40 {strides = array<i32>} : memref<1x256x32xbf16, #tpu.memory_space<vmem>>, vector<1x256x32xbf16>,
    return
  }
  func.func @transform_0(%arg0: i32, %arg1: i32) -> (i32, i32, i32, i32, i32) {
    %c0_i32 = arith.constant 0 : i32
    %c0_i32_0 = arith.constant 0 : i32
    %c0_i32_1 = arith.constant 0 : i32
    %c0_i32_2 = arith.constant 0 : i32
    return %arg0, %c0_i32, %arg1, %c0_i32_0, %c0_i32_1 : i32, i32, i32, i32, i32
  }
  func.func @transform_1(%arg0: i32, %arg1: i32) -> (i32, i32, i32) {
    %c0_i32 = arith.constant 0 : i32
    %c0_i32_0 = arith.constant 0 : i32
    %c0_i32_1 = arith.constant 0 : i32
    %c0_i32_2 = arith.constant 0 : i32
    return %c0_i32, %c0_i32_0, %c0_i32_1 : i32, i32, i32
  }
  func.func @transform_2(%arg0: i32, %arg1: i32) -> (i32, i32) {
    %c0_i32 = arith.constant 0 : i32
    %c0_i32_0 = arith.constant 0 : i32
    %c0_i32_1 = arith.constant 0 : i32
    return %c0_i32, %c0_i32_0 : i32, i32
  }
  func.func @transform_3(%arg0: i32, %arg1: i32) -> (i32, i32, i32) {
    %c0_i32 = arith.constant 0 : i32
    %c0_i32_0 = arith.constant 0 : i32
    return %arg0, %arg1, %c0_i32 : i32, i32, i32
  }
}

module attributes {stable_mosaic.version = 11 : i64} {
  func.func @kernel(%arg0: i32, %arg1: i32, %arg2: memref<1x2x1x80x160xbf16, #tpu.memory_space<vmem>>, %arg3: memref<5x160x64xbf16, #tpu.memory_space<vmem>>, %arg4: memref<1x64xf32, #tpu.memory_space<vmem>>, %arg5: memref<1x64x64xbf16, #tpu.memory_space<vmem>>) attributes {dimension_semantics = [#tpu.dimension_semantics<parallel>, #tpu.dimension_semantics<parallel>], iteration_bounds = array<i64: 2, 1>, scalar_prefetch = 0 : i64, scratch_operands = 0 : i64, tpu.core_type = #tpu.core_type<tc>, window_params = [{transform_indices = @transform_0, window_bounds = array<i64: 1, 2, 1, 80, 160>}, {pipeline_mode = #tpu.pipeline_mode<synchronous>, transform_indices = @transform_1, window_bounds = array<i64: 5, 160, 64>}, {pipeline_mode = #tpu.pipeline_mode<synchronous>, transform_indices = @transform_2, window_bounds = array<i64: 1, 64>}, {transform_indices = @transform_3, window_bounds = array<i64: 1, 64, 64>}]} {
    %c0 = arith.constant 0 : index
    %c0_0 = arith.constant 0 : index
    %c0_1 = arith.constant 0 : index
    %c0_2 = arith.constant 0 : index
    %c0_3 = arith.constant 0 : index
    %0 = vector.load %arg2[%c0, %c0_0, %c0_1, %c0_2, %c0_3] : memref<1x2x1x80x160xbf16, #tpu.memory_space<vmem>>, vector<1x1x1x64x160xbf16>
    %1 = vector.shape_cast %0 : vector<1x1x1x64x160xbf16> to vector<64x160xbf16>
    %c0_4 = arith.constant 0 : index
    %c0_5 = arith.constant 0 : index
    %c0_6 = arith.constant 0 : index
    %2 = vector.load %arg3[%c0_4, %c0_5, %c0_6] : memref<5x160x64xbf16, #tpu.memory_space<vmem>>, vector<1x160x64xbf16>
    %3 = vector.shape_cast %2 : vector<1x160x64xbf16> to vector<160x64xbf16>
    %cst = arith.constant dense<0.000000e+00> : vector<64x64xf32>
    %4 = tpu.matmul %1, %3, %cst {dimension_numbers = #tpu.dot_dimension_numbers<[1], [0], [0], [1], [0, 0, 1, 1], [], []>} : vector<64x160xbf16>, vector<160x64xbf16>, vector<64x64xf32> -> vector<64x64xf32>
    %c0_7 = arith.constant 0 : index
    %c1 = arith.constant 1 : index
    %c0_8 = arith.constant 0 : index
    %c0_9 = arith.constant 0 : index
    %c0_10 = arith.constant 0 : index
    %5 = vector.load %arg2[%c0_7, %c1, %c0_8, %c0_9, %c0_10] : memref<1x2x1x80x160xbf16, #tpu.memory_space<vmem>>, vector<1x1x1x64x160xbf16>
    %6 = vector.shape_cast %5 : vector<1x1x1x64x160xbf16> to vector<64x160xbf16>
    %c1_11 = arith.constant 1 : index
    %c0_12 = arith.constant 0 : index
    %c0_13 = arith.constant 0 : index
    %7 = vector.load %arg3[%c1_11, %c0_12, %c0_13] : memref<5x160x64xbf16, #tpu.memory_space<vmem>>, vector<1x160x64xbf16>
    %8 = vector.shape_cast %7 : vector<1x160x64xbf16> to vector<160x64xbf16>
    %cst_14 = arith.constant dense<0.000000e+00> : vector<64x64xf32>
    %9 = tpu.matmul %6, %8, %cst_14 {dimension_numbers = #tpu.dot_dimension_numbers<[1], [0], [0], [1], [0, 0, 1, 1], [], []>} : vector<64x160xbf16>, vector<160x64xbf16>, vector<64x64xf32> -> vector<64x64xf32>
    %10 = arith.addf %4, %9 : vector<64x64xf32>
    %c0_15 = arith.constant 0 : index
    %c0_16 = arith.constant 0 : index
    %c0_17 = arith.constant 0 : index
    %c8 = arith.constant 8 : index
    %c0_18 = arith.constant 0 : index
    %11 = vector.load %arg2[%c0_15, %c0_16, %c0_17, %c8, %c0_18] : memref<1x2x1x80x160xbf16, #tpu.memory_space<vmem>>, vector<1x1x1x64x160xbf16>
    %12 = vector.shape_cast %11 : vector<1x1x1x64x160xbf16> to vector<64x160xbf16>
    %c2 = arith.constant 2 : index
    %c0_19 = arith.constant 0 : index
    %c0_20 = arith.constant 0 : index
    %13 = vector.load %arg3[%c2, %c0_19, %c0_20] : memref<5x160x64xbf16, #tpu.memory_space<vmem>>, vector<1x160x64xbf16>
    %14 = vector.shape_cast %13 : vector<1x160x64xbf16> to vector<160x64xbf16>
    %cst_21 = arith.constant dense<0.000000e+00> : vector<64x64xf32>
    %15 = tpu.matmul %12, %14, %cst_21 {dimension_numbers = #tpu.dot_dimension_numbers<[1], [0], [0], [1], [0, 0, 1, 1], [], []>} : vector<64x160xbf16>, vector<160x64xbf16>, vector<64x64xf32> -> vector<64x64xf32>
    %16 = arith.addf %10, %15 : vector<64x64xf32>
    %c0_22 = arith.constant 0 : index
    %c1_23 = arith.constant 1 : index
    %c0_24 = arith.constant 0 : index
    %c8_25 = arith.constant 8 : index
    %c0_26 = arith.constant 0 : index
    %17 = vector.load %arg2[%c0_22, %c1_23, %c0_24, %c8_25, %c0_26] : memref<1x2x1x80x160xbf16, #tpu.memory_space<vmem>>, vector<1x1x1x64x160xbf16>
    %18 = vector.shape_cast %17 : vector<1x1x1x64x160xbf16> to vector<64x160xbf16>
    %c3 = arith.constant 3 : index
    %c0_27 = arith.constant 0 : index
    %c0_28 = arith.constant 0 : index
    %19 = vector.load %arg3[%c3, %c0_27, %c0_28] : memref<5x160x64xbf16, #tpu.memory_space<vmem>>, vector<1x160x64xbf16>
    %20 = vector.shape_cast %19 : vector<1x160x64xbf16> to vector<160x64xbf16>
    %cst_29 = arith.constant dense<0.000000e+00> : vector<64x64xf32>
    %21 = tpu.matmul %18, %20, %cst_29 {dimension_numbers = #tpu.dot_dimension_numbers<[1], [0], [0], [1], [0, 0, 1, 1], [], []>} : vector<64x160xbf16>, vector<160x64xbf16>, vector<64x64xf32> -> vector<64x64xf32>
    %22 = arith.addf %16, %21 : vector<64x64xf32>
    %c0_30 = arith.constant 0 : index
    %c0_31 = arith.constant 0 : index
    %c0_32 = arith.constant 0 : index
    %c16 = arith.constant 16 : index
    %c0_33 = arith.constant 0 : index
    %23 = vector.load %arg2[%c0_30, %c0_31, %c0_32, %c16, %c0_33] : memref<1x2x1x80x160xbf16, #tpu.memory_space<vmem>>, vector<1x1x1x64x160xbf16>
    %24 = vector.shape_cast %23 : vector<1x1x1x64x160xbf16> to vector<64x160xbf16>
    %c4 = arith.constant 4 : index
    %c0_34 = arith.constant 0 : index
    %c0_35 = arith.constant 0 : index
    %25 = vector.load %arg3[%c4, %c0_34, %c0_35] : memref<5x160x64xbf16, #tpu.memory_space<vmem>>, vector<1x160x64xbf16>
    %26 = vector.shape_cast %25 : vector<1x160x64xbf16> to vector<160x64xbf16>
    %cst_36 = arith.constant dense<0.000000e+00> : vector<64x64xf32>
    %27 = tpu.matmul %24, %26, %cst_36 {dimension_numbers = #tpu.dot_dimension_numbers<[1], [0], [0], [1], [0, 0, 1, 1], [], []>} : vector<64x160xbf16>, vector<160x64xbf16>, vector<64x64xf32> -> vector<64x64xf32>
    %28 = arith.addf %22, %27 : vector<64x64xf32>
    %c0_37 = arith.constant 0 : index
    %c0_38 = arith.constant 0 : index
    %29 = vector.load %arg4[%c0_37, %c0_38] : memref<1x64xf32, #tpu.memory_space<vmem>>, vector<1x64xf32>
    %30 = vector.broadcast %29 : vector<1x64xf32> to vector<64x64xf32>
    %31 = arith.addf %28, %30 : vector<64x64xf32>
    %cst_39 = arith.constant 0.000000e+00 : f32
    %32 = vector.broadcast %cst_39 : f32 to vector<64x64xf32>
    %33 = arith.cmpf oge, %31, %32 : vector<64x64xf32>
    %cst_40 = arith.constant 0.00999999977 : f32
    %34 = vector.broadcast %cst_40 : f32 to vector<64x64xf32>
    %35 = arith.mulf %34, %31 : vector<64x64xf32>
    %36 = arith.select %33, %31, %35 : vector<64x64xi1>, vector<64x64xf32>
    %37 = arith.truncf %36 : vector<64x64xf32> to vector<64x64xbf16>
    %c0_41 = arith.constant 0 : index
    %c0_42 = arith.constant 0 : index
    %c0_43 = arith.constant 0 : index
    %38 = vector.load %arg5[%c0_41, %c0_42, %c0_43] : memref<1x64x64xbf16, #tpu.memory_space<vmem>>, vector<1x64x64xbf16>
    %39 = vector.shape_cast %38 : vector<1x64x64xbf16> to vector<64x64xbf16>
    %40 = vector.shape_cast %37 : vector<64x64xbf16> to vector<1x64x64xbf16>
    tpu.vector_store %arg5[%c0_41, %c0_42, %c0_43], %40 {strides = array<i32>} : memref<1x64x64xbf16, #tpu.memory_space<vmem>>, vector<1x64x64xbf16>,
    return
  }
  func.func @transform_0(%arg0: i32, %arg1: i32) -> (i32, i32, i32, i32, i32) {
    %c0_i32 = arith.constant 0 : i32
    %c0_i32_0 = arith.constant 0 : i32
    %c0_i32_1 = arith.constant 0 : i32
    %c0_i32_2 = arith.constant 0 : i32
    return %arg0, %c0_i32, %arg1, %c0_i32_0, %c0_i32_1 : i32, i32, i32, i32, i32
  }
  func.func @transform_1(%arg0: i32, %arg1: i32) -> (i32, i32, i32) {
    %c0_i32 = arith.constant 0 : i32
    %c0_i32_0 = arith.constant 0 : i32
    %c0_i32_1 = arith.constant 0 : i32
    %c0_i32_2 = arith.constant 0 : i32
    return %c0_i32, %c0_i32_0, %c0_i32_1 : i32, i32, i32
  }
  func.func @transform_2(%arg0: i32, %arg1: i32) -> (i32, i32) {
    %c0_i32 = arith.constant 0 : i32
    %c0_i32_0 = arith.constant 0 : i32
    %c0_i32_1 = arith.constant 0 : i32
    return %c0_i32, %c0_i32_0 : i32, i32
  }
  func.func @transform_3(%arg0: i32, %arg1: i32) -> (i32, i32, i32) {
    %c0_i32 = arith.constant 0 : i32
    %c0_i32_0 = arith.constant 0 : i32
    return %arg0, %arg1, %c0_i32 : i32, i32, i32
  }
}

module attributes {stable_mosaic.version = 11 : i64} {
  func.func @kernel(%arg0: i32, %arg1: i32, %arg2: memref<2x2048xbf16, #tpu.memory_space<vmem>>, %arg3: memref<2048x64xbf16, #tpu.memory_space<vmem>>, %arg4: memref<1x64xf32, #tpu.memory_space<vmem>>, %arg5: memref<64x8xf32, #tpu.memory_space<vmem>>, %arg6: memref<1x8xf32, #tpu.memory_space<vmem>>, %arg7: memref<8x1xf32, #tpu.memory_space<vmem>>, %arg8: memref<1x1xf32, #tpu.memory_space<vmem>>, %arg9: memref<2x1xf32, #tpu.memory_space<vmem>>, %arg10: memref<2x64xf32, #tpu.memory_space<vmem>>) attributes {dimension_semantics = [#tpu.dimension_semantics<parallel>, #tpu.dimension_semantics<arbitrary>], iteration_bounds = array<i64: 1, 2>, scalar_prefetch = 0 : i64, scratch_operands = 1 : i64, tpu.core_type = #tpu.core_type<tc>, window_params = [{transform_indices = @transform_0, window_bounds = array<i64: 2, 2048>}, {transform_indices = @transform_1, window_bounds = array<i64: 2048, 64>}, {pipeline_mode = #tpu.pipeline_mode<synchronous>, transform_indices = @transform_2, window_bounds = array<i64: 1, 64>}, {pipeline_mode = #tpu.pipeline_mode<synchronous>, transform_indices = @transform_3, window_bounds = array<i64: 64, 8>}, {pipeline_mode = #tpu.pipeline_mode<synchronous>, transform_indices = @transform_4, window_bounds = array<i64: 1, 8>}, {pipeline_mode = #tpu.pipeline_mode<synchronous>, transform_indices = @transform_5, window_bounds = array<i64: 8, 1>}, {pipeline_mode = #tpu.pipeline_mode<synchronous>, transform_indices = @transform_6, window_bounds = array<i64: 1, 1>}, {transform_indices = @transform_7, window_bounds = array<i64: 2, 1>}]} {
    %c0_i32 = arith.constant 0 : i32
    %0 = arith.cmpi eq, %arg1, %c0_i32 : i32
    %1 = arith.extui %0 : i1 to i32
    %c0_i32_0 = arith.constant 0 : i32
    %2 = arith.cmpi ne, %1, %c0_i32_0 : i32
    scf.if %2 {
      %cst_9 = arith.constant 0.000000e+00 : f32
      %12 = vector.broadcast %cst_9 : f32 to vector<2x64xf32>
      %c0_10 = arith.constant 0 : index
      %c0_11 = arith.constant 0 : index
      %13 = vector.load %arg10[%c0_10, %c0_11] : memref<2x64xf32, #tpu.memory_space<vmem>>, vector<2x64xf32>
      tpu.vector_store %arg10[%c0_10, %c0_11], %12 {strides = array<i32>} : memref<2x64xf32, #tpu.memory_space<vmem>>, vector<2x64xf32>,
    } else {
    }
    %c0 = arith.constant 0 : index
    %c0_1 = arith.constant 0 : index
    %3 = vector.load %arg10[%c0, %c0_1] : memref<2x64xf32, #tpu.memory_space<vmem>>, vector<2x64xf32>
    %c0_2 = arith.constant 0 : index
    %c0_3 = arith.constant 0 : index
    %4 = vector.load %arg2[%c0_2, %c0_3] : memref<2x2048xbf16, #tpu.memory_space<vmem>>, vector<2x2048xbf16>
    %c0_4 = arith.constant 0 : index
    %c0_5 = arith.constant 0 : index
    %5 = vector.load %arg3[%c0_4, %c0_5] : memref<2048x64xbf16, #tpu.memory_space<vmem>>, vector<2048x64xbf16>
    %cst = arith.constant dense<0.000000e+00> : vector<2x64xf32>
    %6 = tpu.matmul %4, %5, %cst {dimension_numbers = #tpu.dot_dimension_numbers<[1], [0], [0], [1], [0, 0, 1, 1], [], []>} : vector<2x2048xbf16>, vector<2048x64xbf16>, vector<2x64xf32> -> vector<2x64xf32>
    %7 = arith.addf %3, %6 : vector<2x64xf32>
    %c0_6 = arith.constant 0 : index
    %c0_7 = arith.constant 0 : index
    %8 = vector.load %arg10[%c0_6, %c0_7] : memref<2x64xf32, #tpu.memory_space<vmem>>, vector<2x64xf32>
    tpu.vector_store %arg10[%c0_6, %c0_7], %7 {strides = array<i32>} : memref<2x64xf32, #tpu.memory_space<vmem>>, vector<2x64xf32>,
    %c1_i32 = arith.constant 1 : i32
    %9 = arith.cmpi eq, %arg1, %c1_i32 : i32
    %10 = arith.extui %9 : i1 to i32
    %c0_i32_8 = arith.constant 0 : i32
    %11 = arith.cmpi ne, %10, %c0_i32_8 : i32
    scf.if %11 {
      %c0_9 = arith.constant 0 : index
      %c0_10 = arith.constant 0 : index
      %12 = vector.load %arg10[%c0_9, %c0_10] : memref<2x64xf32, #tpu.memory_space<vmem>>, vector<2x64xf32>
      %c0_11 = arith.constant 0 : index
      %c0_12 = arith.constant 0 : index
      %13 = vector.load %arg4[%c0_11, %c0_12] : memref<1x64xf32, #tpu.memory_space<vmem>>, vector<1x64xf32>
      %14 = vector.broadcast %13 : vector<1x64xf32> to vector<2x64xf32>
      %15 = arith.addf %12, %14 : vector<2x64xf32>
      %cst_13 = arith.constant 0.000000e+00 : f32
      %16 = vector.broadcast %cst_13 : f32 to vector<2x64xf32>
      %17 = arith.cmpf oge, %15, %16 : vector<2x64xf32>
      %cst_14 = arith.constant 0.00999999977 : f32
      %18 = vector.broadcast %cst_14 : f32 to vector<2x64xf32>
      %19 = arith.mulf %18, %15 : vector<2x64xf32>
      %20 = arith.select %17, %15, %19 : vector<2x64xi1>, vector<2x64xf32>
      %c0_15 = arith.constant 0 : index
      %c0_16 = arith.constant 0 : index
      %21 = vector.load %arg5[%c0_15, %c0_16] : memref<64x8xf32, #tpu.memory_space<vmem>>, vector<64x8xf32>
      %cst_17 = arith.constant dense<0.000000e+00> : vector<2x8xf32>
      %22 = tpu.matmul %20, %21, %cst_17 {dimension_numbers = #tpu.dot_dimension_numbers<[1], [0], [0], [1], [0, 0, 1, 1], [], []>} : vector<2x64xf32>, vector<64x8xf32>, vector<2x8xf32> -> vector<2x8xf32>
      %c0_18 = arith.constant 0 : index
      %c0_19 = arith.constant 0 : index
      %23 = vector.load %arg6[%c0_18, %c0_19] : memref<1x8xf32, #tpu.memory_space<vmem>>, vector<1x8xf32>
      %24 = vector.broadcast %23 : vector<1x8xf32> to vector<2x8xf32>
      %25 = arith.addf %22, %24 : vector<2x8xf32>
      %cst_20 = arith.constant 0.000000e+00 : f32
      %26 = vector.broadcast %cst_20 : f32 to vector<2x8xf32>
      %27 = arith.cmpf oge, %25, %26 : vector<2x8xf32>
      %cst_21 = arith.constant 0.00999999977 : f32
      %28 = vector.broadcast %cst_21 : f32 to vector<2x8xf32>
      %29 = arith.mulf %28, %25 : vector<2x8xf32>
      %30 = arith.select %27, %25, %29 : vector<2x8xi1>, vector<2x8xf32>
      %c0_22 = arith.constant 0 : index
      %c0_23 = arith.constant 0 : index
      %31 = vector.load %arg7[%c0_22, %c0_23] : memref<8x1xf32, #tpu.memory_space<vmem>>, vector<8x1xf32>
      %cst_24 = arith.constant dense<0.000000e+00> : vector<2x1xf32>
      %32 = tpu.matmul %30, %31, %cst_24 {dimension_numbers = #tpu.dot_dimension_numbers<[1], [0], [0], [1], [0, 0, 1, 1], [], []>} : vector<2x8xf32>, vector<8x1xf32>, vector<2x1xf32> -> vector<2x1xf32>
      %c0_25 = arith.constant 0 : index
      %c0_26 = arith.constant 0 : index
      %33 = vector.load %arg8[%c0_25, %c0_26] : memref<1x1xf32, #tpu.memory_space<vmem>>, vector<1x1xf32>
      %34 = vector.broadcast %33 : vector<1x1xf32> to vector<2x1xf32>
      %35 = arith.addf %32, %34 : vector<2x1xf32>
      %cst_27 = arith.constant 0.000000e+00 : f32
      %36 = vector.broadcast %cst_27 : f32 to vector<2x1xf32>
      %37 = arith.cmpf oge, %35, %36 : vector<2x1xf32>
      %cst_28 = arith.constant 0.00999999977 : f32
      %38 = vector.broadcast %cst_28 : f32 to vector<2x1xf32>
      %39 = arith.mulf %38, %35 : vector<2x1xf32>
      %40 = arith.select %37, %35, %39 : vector<2x1xi1>, vector<2x1xf32>
      %c0_29 = arith.constant 0 : index
      %c0_30 = arith.constant 0 : index
      %41 = vector.load %arg9[%c0_29, %c0_30] : memref<2x1xf32, #tpu.memory_space<vmem>>, vector<2x1xf32>
      tpu.vector_store %arg9[%c0_29, %c0_30], %40 {strides = array<i32>} : memref<2x1xf32, #tpu.memory_space<vmem>>, vector<2x1xf32>,
    } else {
    }
    return
  }
  func.func @transform_0(%arg0: i32, %arg1: i32) -> (i32, i32) {
    %c0_i32 = arith.constant 0 : i32
    return %arg0, %arg1 : i32, i32
  }
  func.func @transform_1(%arg0: i32, %arg1: i32) -> (i32, i32) {
    %c0_i32 = arith.constant 0 : i32
    %c0_i32_0 = arith.constant 0 : i32
    return %arg1, %c0_i32 : i32, i32
  }
  func.func @transform_2(%arg0: i32, %arg1: i32) -> (i32, i32) {
    %c0_i32 = arith.constant 0 : i32
    %c0_i32_0 = arith.constant 0 : i32
    %c0_i32_1 = arith.constant 0 : i32
    return %c0_i32, %c0_i32_0 : i32, i32
  }
  func.func @transform_3(%arg0: i32, %arg1: i32) -> (i32, i32) {
    %c0_i32 = arith.constant 0 : i32
    %c0_i32_0 = arith.constant 0 : i32
    %c0_i32_1 = arith.constant 0 : i32
    return %c0_i32, %c0_i32_0 : i32, i32
  }
  func.func @transform_4(%arg0: i32, %arg1: i32) -> (i32, i32) {
    %c0_i32 = arith.constant 0 : i32
    %c0_i32_0 = arith.constant 0 : i32
    %c0_i32_1 = arith.constant 0 : i32
    return %c0_i32, %c0_i32_0 : i32, i32
  }
  func.func @transform_5(%arg0: i32, %arg1: i32) -> (i32, i32) {
    %c0_i32 = arith.constant 0 : i32
    %c0_i32_0 = arith.constant 0 : i32
    %c0_i32_1 = arith.constant 0 : i32
    return %c0_i32, %c0_i32_0 : i32, i32
  }
  func.func @transform_6(%arg0: i32, %arg1: i32) -> (i32, i32) {
    %c0_i32 = arith.constant 0 : i32
    %c0_i32_0 = arith.constant 0 : i32
    %c0_i32_1 = arith.constant 0 : i32
    return %c0_i32, %c0_i32_0 : i32, i32
  }
  func.func @transform_7(%arg0: i32, %arg1: i32) -> (i32, i32) {
    %c0_i32 = arith.constant 0 : i32
    %c0_i32_0 = arith.constant 0 : i32
    return %arg0, %c0_i32 : i32, i32
  }
}

</mosaic_0001>

<bundles_post_ra>
// kernel: observer_forward.4
= control target key start
LH: loop header
LB: loop body
LE: loop exit
PB: predicated region body
PF: predicated region fallthrough
CT: control target
= control target key end

     0   :  { %s1200_s12 = smov 0   ;;  %s1202_s13 = smov 0   ;;  %s1408_s0 = inlined_call_operand.vmem [shape: bf16[2,1,4,256,25], index: 0, kind: input, shape index: {}]   ;;  %s1409_s1 = inlined_call_operand.vmem [shape: bf16[1,25,16], index: 1, kind: input, shape index: {}]   ;;  %s1410_s2 = inlined_call_operand.vmem [shape: f32[1,16], index: 2, kind: input, shape index: {}]   ;;  %s1411_s3 = inlined_call_operand.vmem [shape: bf16[2,1024,16], index: 3, kind: output, shape index: {}]  }
   0x1   :  { %s1204_s14 = smov 0   ;;  %s1206_s15 = smov 0  }
   0x2   :  { %s1208_s16 = smov 0  }
   0x3 LB: > { %s22_s17 = sadd.s32 1, %s1169_s14  ;;  %s25_s18 = sadd.s32 1, %s1173_s15  ;;  %s1177_s16 = sphi %s1208_s16, %s13_s16   ;;  %s1173_s15 = sphi %s1206_s15, %s1415_s15   ;;  %s1169_s14 = sphi %s1204_s14, %s1414_s14   ;;  %s1165_s13 = sphi %s1202_s13, %s1413_s13   ;;  %s1161_s12 = sphi %s1200_s12, %s1412_s12  }
   0x4   : > { %p23_p0 = scmp.ge.s32.totalorder %s22_s17, 4  ;;  %p914_p1 = scmp.ge.s32.totalorder %s1177_s16, 1 }
   0x5   : > { %p157_p2 = scmp.lt.s32.totalorder %s1177_s16, 9 }
   0x6   : > { %s1417_s17 = smov (%p23_p0, %s22_s17), 0  ;;  %s1419_s18 = smov (!%p23_p0, %s25_s18), %s1173_s15 }
   0x7   : > { %p158_p3 = pnand %p914_p1, %p157_p2  ;;  %p27_p4 = scmp.ge.s32.totalorder %s1419_s18, 2 }
   0x8   : > { %v1121_v0 = vld [vmem:[%s1409_s1] sm:$0xff] (!%p158_p3)   ;;  %vm392_vm0 = vcmask (!%p158_p3), 1043456   ;;  %v1122_v1 = vld [vmem:[%s1409_s1 + $0x8] sm:$0x1f] (!%p158_p3)   ;;  %vm393_vm1 = vcmask (!%p158_p3), 1044480   ;;  %p189_p5 = scmp.lt.s32.totalorder (!%p158_p3), %s1165_s13, 1 }
   0x9   : > { %s1421_s18 = smov (%p27_p4, %s1419_s18), 0  ;;  %161 = sbr.rel (%p158_p3) target bundleno = 283 (0x11b), region = 32 }
   0xa   : > { %1040 = vmatprep.subr.bf16.mxu0 (!%p158_p3), %v1121_v0  ;;  %1076 = vmatprep.subr.bf16.mxu1 (!%p158_p3), %v1121_v0  ;;  %p191_p6 = scmp.lt.s32.totalorder (!%p158_p3), %s1161_s12, 3  ;;  %v1179_v2 = vmov (!%p158_p3), 65535   ;;  %vm343_vm2 = vcmask (!%p158_p3), 203776   ;;  %s918_s4 = sshll.u32 (!%p158_p3), %s1161_s12, 5  ;;  %v1286_v22 = vld [vmem:[%s1410_s2] ss:$0 sm:$0xff] (!%p158_p3) }
   0xb   : > { %1041 = vmatpush3.bf16.msra.mxu0 (!%p158_p3), %v1121_v0  ;;  %1078 = vmatpush3.bf16.msra.mxu1 (!%p158_p3), %v1121_v0  ;;  %v394_v3 = vsel (!%p158_p3), %vm392_vm0, 4294967295, %v1179_v2  ;;  %p201_p7 = scmp.lt.s32.totalorder (!%p158_p3), %s918_s4, 127  ;;  %vm784_vm3 = vcmask (!%p158_p3), 125952  }
   0xc   : > { %v395_v4 = vsel (!%p158_p3), %vm393_vm1, %v394_v3, 0 }
   0xd   : > { %v397_v5 = vand.u32 (!%p158_p3), %v1122_v1, %v395_v4 }
   0xf   : > { %1042 = vmatprep.subr.bf16.mxu0 (!%p158_p3), %v397_v5  ;;  %1077 = vmatprep.subr.bf16.mxu1 (!%p158_p3), %v397_v5 }
  0x10   : > { %s1423_s13 = smov (!%p189_p5, %s1165_s13), 1  ;;  %1043 = vmatpush3.bf16.msra.mxu0 %v397_v5  ;;  %1079 = vmatpush3.bf16.msra.mxu1 %v397_v5  ;;  %s1425_s4 = smov (!%p201_p7, %s918_s4), 127 }
  0x11   : > { %s192_s23 = scalar_select %p191_p6, %s1161_s12, 3 }
  0x12   : > { %s916_s24 = sshll.u32 %s1423_s13, 7 }
  0x13   : > { %s915_s25 = sshll.u32 %s192_s23, 5  ;;  %s204_s7 = sadd.s32 %s916_s24, %s1425_s4 }
  0x14   : > { %s195_s26 = sadd.s32 %s916_s24, %s915_s25  ;;  %s920_s8 = sshll.u32 %s204_s7, 2 }
  0x15   : > { %s917_s27 = sshll.u32 %s195_s26, 2  ;;  %s1298_s11 = scalar_lea.vmem %s1411_s3, %s920_s8 }
  0x16   : > { %s1248_s30 = scalar_lea.vmem %s1408_s0, %s917_s27 }
  0x17   : > { %v1123_v6 = vld [vmem:[%s1248_s30] sm:$0xff]   ;;  %v1125_v8 = vld [vmem:[%s1248_s30 + $0x8] sm:$0xff]   ;;  %v1127_v10 = vld [vmem:[%s1248_s30 + $0x10] sm:$0xff]  }
  0x18   : > { %v1124_v7 = vld [vmem:[%s1248_s30 + $0x40] sm:$0xff]   ;;  %1044 = vmatprep.mubr.msk.bf16.mxu0 %vm343_vm2, %v1123_v6  ;;  %v1126_v9 = vld [vmem:[%s1248_s30 + $0x48] sm:$0xff]   ;;  %v1128_v11 = vld [vmem:[%s1248_s30 + $0x50] sm:$0xff]  }
  0x19   : > { %1060 = vmatprep.mubr.msk.bf16.mxu1 %vm343_vm2, %v1124_v7  ;;  %1045 = vmatmul.mubr.msk.bf16.vlgmr.msra.gmra.mrb[0].mxu0 %vm343_vm2, %v1125_v8  ;;  %v1129_v12 = vld [vmem:[%s1248_s30 + $0x18] sm:$0xff]   ;;  %v1131_v14 = vld [vmem:[%s1248_s30 + $0x20] sm:$0xff]   ;;  %v1133_v16 = vld [vmem:[%s1248_s30 + $0x28] sm:$0xff]  }
  0x1a   : > { %1061 = vmatmul.mubr.msk.bf16.vlgmr.msra.gmra.mrb[0].mxu1 %vm343_vm2, %v1126_v9  ;;  %1048 = vmatprep.mubr.msk.bf16.mxu0 %vm343_vm2, %v1127_v10  ;;  %v1130_v13 = vld [vmem:[%s1248_s30 + $0x58] sm:$0xff]   ;;  %v1132_v15 = vld [vmem:[%s1248_s30 + $0x60] sm:$0xff]   ;;  %v1134_v17 = vld [vmem:[%s1248_s30 + $0x68] sm:$0xff]  }
  0x1b   : > { %1064 = vmatprep.mubr.msk.bf16.mxu1 %vm343_vm2, %v1128_v11  ;;  %v1135_v18 = vld [vmem:[%s1248_s30 + $0x30] sm:$0xff]   ;;  %v1137_v20 = vld [vmem:[%s1248_s30 + $0x38] sm:$0xff]  }
  0x1c   : > { %v1136_v19 = vld [vmem:[%s1248_s30 + $0x70] sm:$0xff]   ;;  %v1138_v21 = vld [vmem:[%s1248_s30 + $0x78] sm:$0xff]  }
  0x21   : > { %1049 = vmatmul.mubr.msk.bf16.gmra.mrb[4].mxu0 %vm343_vm2, %v1129_v12 }
  0x22   : > { %1065 = vmatmul.mubr.msk.bf16.gmra.mrb[4].mxu1 %vm343_vm2, %v1130_v13  ;;  %1052 = vmatprep.mubr.msk.bf16.mxu0 %vm343_vm2, %v1131_v14 }
  0x23   : > { %1068 = vmatprep.mubr.msk.bf16.mxu1 %vm343_vm2, %v1132_v15 }
  0x29   : > { %1053 = vmatmul.mubr.msk.bf16.gmra.mrb[8].mxu0 %vm343_vm2, %v1133_v16 }
  0x2a   : > { %1069 = vmatmul.mubr.msk.bf16.gmra.mrb[8].mxu1 %vm343_vm2, %v1134_v17  ;;  %1056 = vmatprep.mubr.msk.bf16.mxu0 %vm343_vm2, %v1135_v18 }
  0x2b   : > { %1072 = vmatprep.mubr.msk.bf16.mxu1 %vm343_vm2, %v1136_v19 }
  0x31   : > { %1057 = vmatmul.mubr.msk.bf16.gmra.mrb[12].mxu0 %vm343_vm2, %v1137_v20 }
  0x32   : > { %1073 = vmatmul.mubr.msk.bf16.gmra.mrb[12].mxu1 %vm343_vm2, %v1138_v21 }
  0xec   : > { %v1046_v23 = vpop.f32.mrb[0].mxu0 }
  0xed   : > { %v442_v24 = vadd.f32 %v1046_v23, %v1286_v22  ;;  %v1062_v25 = vpop.f32.mrb[0].mxu1  ;;  %v433_v26 = vpop.f32.mrb[1].mxu0 }
  0xee   : > { %v506_v27 = vadd.f32 %v1062_v25, %v1286_v22  ;;  %v434_v28 = vadd.f32 %v1286_v22, %v433_v26  ;;  %v497_v29 = vpop.f32.mrb[1].mxu1  ;;  %v1047_v30 = vpop.f32.mrb[2].mxu0 }
  0xef   : > { %vm562_vm4 = vcmp.ge.f32.partialorder %v442_v24, 0.0  ;;  %v594_v31 = vmul.f32 0.01, %v442_v24  ;;  %v498_v32 = vadd.f32 %v1286_v22, %v497_v29  ;;  %v445_v33 = vadd.f32 %v1047_v30, %v1286_v22  ;;  %v1063_v34 = vpop.f32.mrb[2].mxu1  ;;  %v436_v35 = vpop.f32.mrb[3].mxu0 }
  0xf0   : > { %vm578_vm5 = vcmp.ge.f32.partialorder %v506_v27, 0.0  ;;  %v610_v36 = vmul.f32 0.01, %v506_v27  ;;  %vm560_vm6 = vcmp.ge.f32.partialorder %v434_v28, 0.0  ;;  %v592_v37 = vmul.f32 0.01, %v434_v28 }
  0xf1   : > { %v626_v38 = vsel %vm562_vm4, %v442_v24, %v594_v31  ;;  %vm576_vm7 = vcmp.ge.f32.partialorder %v498_v32, 0.0  ;;  %v608_v39 = vmul.f32 0.01, %v498_v32  ;;  %vm563_vm8 = vcmp.ge.f32.partialorder %v445_v33, 0.0  ;;  %v500_v40 = vpop.f32.mrb[3].mxu1 }
  0xf2   : > { %v992_v41 = vpack.c.bf16 %v626_v38, %v626_v38  ;;  %v642_v42 = vsel %vm578_vm5, %v506_v27, %v610_v36  ;;  %v624_v43 = vsel %vm560_vm6, %v434_v28, %v592_v37  ;;  %v595_v44 = vmul.f32 0.01, %v445_v33 }
  0xf3   : > { %v1008_v45 = vpack.c.bf16 %v642_v42, %v642_v42  ;;  %v990_v46 = vpack.c.bf16 %v624_v43, %v624_v43  ;;  %v640_v47 = vsel %vm576_vm7, %v498_v32, %v608_v39  ;;  %v509_v48 = vadd.f32 %v1063_v34, %v1286_v22 }
  0xf4   : > { %787 = vst.msk [vmem:[%s1298_s11 + $0x8] sm:$0xf] %vm784_vm3, %v992_v41  ;;  %v1006_v49 = vpack.c.bf16 %v640_v47, %v640_v47  ;;  %v627_v50 = vsel %vm563_vm8, %v445_v33, %v595_v44  ;;  %v437_v51 = vadd.f32 %v1286_v22, %v436_v35  ;;  %v501_v52 = vadd.f32 %v1286_v22, %v500_v40  ;;  %v1050_v53 = vpop.f32.mrb[4].mxu0 }
  0xf5   : > { %803 = vst.msk [vmem:[%s1298_s11 + $0x48] sm:$0xf] %vm784_vm3, %v1008_v45  ;;  %785 = vst.msk [vmem:[%s1298_s11] sm:$0xf] %vm784_vm3, %v990_v46  ;;  %v993_v54 = vpack.c.bf16 %v627_v50, %v627_v50  ;;  %vm579_vm9 = vcmp.ge.f32.partialorder %v509_v48, 0.0  ;;  %v458_v56 = vadd.f32 %v1050_v53, %v1286_v22  ;;  %v1066_v57 = vpop.f32.mrb[4].mxu1 }
  0xf6   : > { %v611_v55 = vmul.f32 0.01, %v509_v48  ;;  %v449_v58 = vpop.f32.mrb[5].mxu0  ;;  %801 = vst.msk [vmem:[%s1298_s11 + $0x40] sm:$0xf] %vm784_vm3, %v1006_v49  ;;  %vm561_vm10 = vcmp.ge.f32.partialorder %v437_v51, 0.0  ;;  %v522_v63 = vadd.f32 %v1066_v57, %v1286_v22 }
  0xf7   : > { %v593_v59 = vmul.f32 0.01, %v437_v51  ;;  %vm577_vm11 = vcmp.ge.f32.partialorder %v501_v52, 0.0  ;;  %v609_v60 = vmul.f32 0.01, %v501_v52  ;;  %vm566_vm12 = vcmp.ge.f32.partialorder %v458_v56, 0.0 }
  0xf8   : > { %788 = vst.msk [vmem:[%s1298_s11 + $0xc] sm:$0xf] %vm784_vm3, %v993_v54  ;;  %v643_v61 = vsel %vm579_vm9, %v509_v48, %v611_v55  ;;  %v598_v62 = vmul.f32 0.01, %v458_v56  ;;  %v513_v0 = vpop.f32.mrb[5].mxu1  ;;  %v1051_v1 = vpop.f32.mrb[6].mxu0  ;;  %v450_v5 = vadd.f32 %v1286_v22, %v449_v58 }
  0xf9   : > { %v1009_v2 = vpack.c.bf16 %v643_v61, %v643_v61  ;;  %v625_v3 = vsel %vm561_vm10, %v437_v51, %v593_v59  ;;  %v641_v4 = vsel %vm577_vm11, %v501_v52, %v609_v60  ;;  %v1067_v6 = vpop.f32.mrb[6].mxu1  ;;  %v452_v7 = vpop.f32.mrb[7].mxu0  ;;  %vm582_vm13 = vcmp.ge.f32.partialorder %v522_v63, 0.0 }
  0xfa   : > { %v991_v8 = vpack.c.bf16 %v625_v3, %v625_v3  ;;  %v1007_v9 = vpack.c.bf16 %v641_v4, %v641_v4  ;;  %v630_v10 = vsel %vm566_vm12, %v458_v56, %v598_v62  ;;  %v516_v11 = vpop.f32.mrb[7].mxu1  ;;  %v614_v13 = vmul.f32 0.01, %v522_v63 }
  0xfb   : > { %804 = vst.msk [vmem:[%s1298_s11 + $0x4c] sm:$0xf] %vm784_vm3, %v1009_v2  ;;  %v996_v12 = vpack.c.bf16 %v630_v10, %v630_v10  ;;  %vm564_vm14 = vcmp.ge.f32.partialorder %v450_v5, 0.0  ;;  %v596_v14 = vmul.f32 0.01, %v450_v5  ;;  %v514_v15 = vadd.f32 %v1286_v22, %v513_v0 }
  0xfc   : > { %786 = vst.msk [vmem:[%s1298_s11 + $0x4] sm:$0xf] %vm784_vm3, %v991_v8  ;;  %802 = vst.msk [vmem:[%s1298_s11 + $0x44] sm:$0xf] %vm784_vm3, %v1007_v9  ;;  %v461_v16 = vadd.f32 %v1051_v1, %v1286_v22  ;;  %v525_v17 = vadd.f32 %v1067_v6, %v1286_v22  ;;  %v453_v18 = vadd.f32 %v1286_v22, %v452_v7  ;;  %v1054_v23 = vpop.f32.mrb[8].mxu0 }
  0xfd   : > { %791 = vst.msk [vmem:[%s1298_s11 + $0x18] sm:$0xf] %vm784_vm3, %v996_v12  ;;  %v646_v19 = vsel %vm582_vm13, %v522_v63, %v614_v13  ;;  %v628_v20 = vsel %vm564_vm14, %v450_v5, %v596_v14  ;;  %v517_v21 = vadd.f32 %v1286_v22, %v516_v11  ;;  %vm580_vm15 = vcmp.ge.f32.partialorder %v514_v15, 0.0  ;;  %v1070_v27 = vpop.f32.mrb[8].mxu1  ;;  %v465_v28 = vpop.f32.mrb[9].mxu0 }
  0xfe   : > { %v1012_v24 = vpack.c.bf16 %v646_v19, %v646_v19  ;;  %v994_v25 = vpack.c.bf16 %v628_v20, %v628_v20  ;;  %v612_v26 = vmul.f32 0.01, %v514_v15  ;;  %vm567_vm0 = vcmp.ge.f32.partialorder %v461_v16, 0.0  ;;  %v529_v33 = vpop.f32.mrb[9].mxu1  ;;  %v1055_v34 = vpop.f32.mrb[10].mxu0 }
  0xff   : > { %v599_v29 = vmul.f32 0.01, %v461_v16  ;;  %vm583_vm1 = vcmp.ge.f32.partialorder %v525_v17, 0.0  ;;  %v615_v30 = vmul.f32 0.01, %v525_v17  ;;  %vm565_vm2 = vcmp.ge.f32.partialorder %v453_v18, 0.0 }
 0x100   : > { %807 = vst.msk [vmem:[%s1298_s11 + $0x58] sm:$0xf] %vm784_vm3, %v1012_v24  ;;  %789 = vst.msk [vmem:[%s1298_s11 + $0x10] sm:$0xf] %vm784_vm3, %v994_v25  ;;  %v644_v31 = vsel %vm580_vm15, %v514_v15, %v612_v26  ;;  %v597_v32 = vmul.f32 0.01, %v453_v18  ;;  %v474_v44 = vadd.f32 %v1054_v23, %v1286_v22  ;;  %v538_v48 = vadd.f32 %v1070_v27, %v1286_v22 }
 0x101   : > { %vm581_vm4 = vcmp.ge.f32.partialorder %v517_v21, 0.0  ;;  %v1010_v35 = vpack.c.bf16 %v644_v31, %v644_v31  ;;  %v631_v36 = vsel %vm567_vm0, %v461_v16, %v599_v29  ;;  %v647_v37 = vsel %vm583_vm1, %v525_v17, %v615_v30  ;;  %v1071_v39 = vpop.f32.mrb[10].mxu1  ;;  %v468_v40 = vpop.f32.mrb[11].mxu0 }
 0x102   : > { %v613_v38 = vmul.f32 0.01, %v517_v21  ;;  %v997_v41 = vpack.c.bf16 %v631_v36, %v631_v36  ;;  %v1013_v42 = vpack.c.bf16 %v647_v37, %v647_v37  ;;  %v629_v43 = vsel %vm565_vm2, %v453_v18, %v597_v32  ;;  %v532_v45 = vpop.f32.mrb[11].mxu1 }
 0x103   : > { %805 = vst.msk [vmem:[%s1298_s11 + $0x50] sm:$0xf] %vm784_vm3, %v1010_v35  ;;  %v995_v46 = vpack.c.bf16 %v629_v43, %v629_v43  ;;  %v466_v49 = vadd.f32 %v1286_v22, %v465_v28  ;;  %vm570_vm5 = vcmp.ge.f32.partialorder %v474_v44, 0.0  ;;  %v602_v51 = vmul.f32 0.01, %v474_v44 }
 0x104   : > { %v645_v47 = vsel %vm581_vm4, %v517_v21, %v613_v38  ;;  %792 = vst.msk [vmem:[%s1298_s11 + $0x1c] sm:$0xf] %vm784_vm3, %v997_v41  ;;  %808 = vst.msk [vmem:[%s1298_s11 + $0x5c] sm:$0xf] %vm784_vm3, %v1013_v42  ;;  %v530_v52 = vadd.f32 %v1286_v22, %v529_v33  ;;  %vm586_vm6 = vcmp.ge.f32.partialorder %v538_v48, 0.0  ;;  %v477_v57 = vadd.f32 %v1055_v34, %v1286_v22  ;;  %v1058_v58 = vpop.f32.mrb[12].mxu0 }
 0x105   : > { %v1011_v50 = vpack.c.bf16 %v645_v47, %v645_v47  ;;  %790 = vst.msk [vmem:[%s1298_s11 + $0x14] sm:$0xf] %vm784_vm3, %v995_v46  ;;  %v618_v53 = vmul.f32 0.01, %v538_v48  ;;  %vm568_vm7 = vcmp.ge.f32.partialorder %v466_v49, 0.0  ;;  %v634_v55 = vsel %vm570_vm5, %v474_v44, %v602_v51  ;;  %v1074_v59 = vpop.f32.mrb[12].mxu1 }
 0x106   : > { %v600_v54 = vmul.f32 0.01, %v466_v49  ;;  %vm584_vm8 = vcmp.ge.f32.partialorder %v530_v52, 0.0  ;;  %v616_v56 = vmul.f32 0.01, %v530_v52  ;;  %v1000_v60 = vpack.c.bf16 %v634_v55, %v634_v55  ;;  %v481_v0 = vpop.f32.mrb[13].mxu0 }
 0x107   : > { %806 = vst.msk [vmem:[%s1298_s11 + $0x54] sm:$0xf] %vm784_vm3, %v1011_v50  ;;  %v650_v61 = vsel %vm586_vm6, %v538_v48, %v618_v53  ;;  %v541_v63 = vadd.f32 %v1071_v39, %v1286_v22  ;;  %v545_v1 = vpop.f32.mrb[13].mxu1  ;;  %vm571_vm9 = vcmp.ge.f32.partialorder %v477_v57, 0.0  ;;  %v1059_v5 = vpop.f32.mrb[14].mxu0  ;;  %v469_v11 = vadd.f32 %v1286_v22, %v468_v40 }
 0x108   : > { %v632_v62 = vsel %vm568_vm7, %v466_v49, %v600_v54  ;;  %v1016_v2 = vpack.c.bf16 %v650_v61, %v650_v61  ;;  %v648_v4 = vsel %vm584_vm8, %v530_v52, %v616_v56  ;;  %v1075_v6 = vpop.f32.mrb[14].mxu1  ;;  %795 = vst.msk [vmem:[%s1298_s11 + $0x28] sm:$0xf] %vm784_vm3, %v1000_v60  ;;  %v603_v8 = vmul.f32 0.01, %v477_v57  ;;  %v484_v10 = vpop.f32.mrb[15].mxu0 }
 0x109   : > { %v998_v3 = vpack.c.bf16 %v632_v62, %v632_v62  ;;  %v1014_v7 = vpack.c.bf16 %v648_v4, %v648_v4  ;;  %vm587_vm10 = vcmp.ge.f32.partialorder %v541_v63, 0.0  ;;  %v619_v9 = vmul.f32 0.01, %v541_v63  ;;  %v548_v15 = vpop.f32.mrb[15].mxu1 }
 0x10a   : > { %811 = vst.msk [vmem:[%s1298_s11 + $0x68] sm:$0xf] %vm784_vm3, %v1016_v2  ;;  %v533_v12 = vadd.f32 %v1286_v22, %v532_v45  ;;  %v490_v13 = vadd.f32 %v1058_v58, %v1286_v22  ;;  %v554_v14 = vadd.f32 %v1074_v59, %v1286_v22  ;;  %v635_v16 = vsel %vm571_vm9, %v477_v57, %v603_v8 }
 0x10b   : > { %793 = vst.msk [vmem:[%s1298_s11 + $0x20] sm:$0xf] %vm784_vm3, %v998_v3  ;;  %809 = vst.msk [vmem:[%s1298_s11 + $0x60] sm:$0xf] %vm784_vm3, %v1014_v7  ;;  %v651_v17 = vsel %vm587_vm10, %v541_v63, %v619_v9  ;;  %v482_v18 = vadd.f32 %v1286_v22, %v481_v0  ;;  %v546_v19 = vadd.f32 %v1286_v22, %v545_v1  ;;  %vm569_vm11 = vcmp.ge.f32.partialorder %v469_v11, 0.0 }
 0x10c   : > { %v1001_v20 = vpack.c.bf16 %v635_v16, %v635_v16  ;;  %v1017_v21 = vpack.c.bf16 %v651_v17, %v651_v17  ;;  %v601_v23 = vmul.f32 0.01, %v469_v11  ;;  %vm585_vm12 = vcmp.ge.f32.partialorder %v533_v12, 0.0 }
 0x10d   : > { %v617_v24 = vmul.f32 0.01, %v533_v12  ;;  %vm574_vm13 = vcmp.ge.f32.partialorder %v490_v13, 0.0  ;;  %v606_v25 = vmul.f32 0.01, %v490_v13  ;;  %vm590_vm14 = vcmp.ge.f32.partialorder %v554_v14, 0.0 }
 0x10e   : > { %796 = vst.msk [vmem:[%s1298_s11 + $0x2c] sm:$0xf] %vm784_vm3, %v1001_v20  ;;  %812 = vst.msk [vmem:[%s1298_s11 + $0x6c] sm:$0xf] %vm784_vm3, %v1017_v21  ;;  %v633_v26 = vsel %vm569_vm11, %v469_v11, %v601_v23  ;;  %v622_v27 = vmul.f32 0.01, %v554_v14  ;;  %v493_v38 = vadd.f32 %v1059_v5, %v1286_v22  ;;  %v557_v40 = vadd.f32 %v1075_v6, %v1286_v22 }
 0x10f   : > { %vm572_vm15 = vcmp.ge.f32.partialorder %v482_v18, 0.0  ;;  %v999_v28 = vpack.c.bf16 %v633_v26, %v633_v26  ;;  %v649_v29 = vsel %vm585_vm12, %v533_v12, %v617_v24  ;;  %v638_v30 = vsel %vm574_vm13, %v490_v13, %v606_v25 }
 0x110   : > { %v604_v31 = vmul.f32 0.01, %v482_v18  ;;  %v1015_v32 = vpack.c.bf16 %v649_v29, %v649_v29  ;;  %v1004_v33 = vpack.c.bf16 %v638_v30, %v638_v30  ;;  %v654_v34 = vsel %vm590_vm14, %v554_v14, %v622_v27 }
 0x111   : > { %vm588_vm0 = vcmp.ge.f32.partialorder %v546_v19, 0.0  ;;  %794 = vst.msk [vmem:[%s1298_s11 + $0x24] sm:$0xf] %vm784_vm3, %v999_v28  ;;  %v1020_v35 = vpack.c.bf16 %v654_v34, %v654_v34  ;;  %v620_v37 = vmul.f32 0.01, %v546_v19  ;;  %v485_v41 = vadd.f32 %v1286_v22, %v484_v10 }
 0x112   : > { %v636_v36 = vsel %vm572_vm15, %v482_v18, %v604_v31  ;;  %810 = vst.msk [vmem:[%s1298_s11 + $0x64] sm:$0xf] %vm784_vm3, %v1015_v32  ;;  %799 = vst.msk [vmem:[%s1298_s11 + $0x38] sm:$0xf] %vm784_vm3, %v1004_v33  ;;  %v549_v42 = vadd.f32 %v1286_v22, %v548_v15  ;;  %vm575_vm1 = vcmp.ge.f32.partialorder %v493_v38, 0.0  ;;  %vm591_vm2 = vcmp.ge.f32.partialorder %v557_v40, 0.0 }
 0x113   : > { %v1002_v39 = vpack.c.bf16 %v636_v36, %v636_v36  ;;  %815 = vst.msk [vmem:[%s1298_s11 + $0x78] sm:$0xf] %vm784_vm3, %v1020_v35  ;;  %v652_v43 = vsel %vm588_vm0, %v546_v19, %v620_v37  ;;  %v607_v44 = vmul.f32 0.01, %v493_v38  ;;  %v623_v46 = vmul.f32 0.01, %v557_v40 }
 0x114   : > { %v1018_v45 = vpack.c.bf16 %v652_v43, %v652_v43  ;;  %vm573_vm4 = vcmp.ge.f32.partialorder %v485_v41, 0.0  ;;  %v605_v48 = vmul.f32 0.01, %v485_v41  ;;  %vm589_vm5 = vcmp.ge.f32.partialorder %v549_v42, 0.0 }
 0x115   : > { %797 = vst.msk [vmem:[%s1298_s11 + $0x30] sm:$0xf] %vm784_vm3, %v1002_v39  ;;  %v639_v47 = vsel %vm575_vm1, %v493_v38, %v607_v44  ;;  %v621_v49 = vmul.f32 0.01, %v549_v42  ;;  %v655_v50 = vsel %vm591_vm2, %v557_v40, %v623_v46 }
 0x116   : > { %813 = vst.msk [vmem:[%s1298_s11 + $0x70] sm:$0xf] %vm784_vm3, %v1018_v45  ;;  %v1005_v22 = vpack.c.bf16 %v639_v47, %v639_v47  ;;  %v1021_v51 = vpack.c.bf16 %v655_v50, %v655_v50  ;;  %v637_v52 = vsel %vm573_vm4, %v485_v41, %v605_v48 }
 0x117   : > { %v653_v53 = vsel %vm589_vm5, %v549_v42, %v621_v49  ;;  %v1003_v54 = vpack.c.bf16 %v637_v52, %v637_v52 }
 0x118   : > { %800 = vst.msk [vmem:[%s1298_s11 + $0x3c] sm:$0xf] %vm784_vm3, %v1005_v22  ;;  %v1019_v55 = vpack.c.bf16 %v653_v53, %v653_v53  ;;  %816 = vst.msk [vmem:[%s1298_s11 + $0x7c] sm:$0xf] %vm784_vm3, %v1021_v51 }
 0x119   : > { %798 = vst.msk [vmem:[%s1298_s11 + $0x34] sm:$0xf] %vm784_vm3, %v1003_v54 }
 0x11a   : > { %814 = vst.msk [vmem:[%s1298_s11 + $0x74] sm:$0xf] %vm784_vm3, %v1019_v55 }
 0x11b PF: > { %s13_s16 = sadd.s32 1, %s1177_s16   ;;  %s1412_s12 = smov %s1169_s14 }
 0x11c   : > { %p10_p8 = scmp.ge.s32.totalorder %s13_s16, 10   ;;  %s1413_s13 = smov %s1173_s15 }
 0x11d   : > { %s1414_s14 = smov %s1417_s17  ;;  %s1415_s15 = smov %s1421_s18 }
 0x11e   :  { %12 = sbr.rel (!%p10_p8) target bundleno = 3 (0x3), region = 62 }

// kernel: observer_forward.5
= control target key start
LH: loop header
LB: loop body
LE: loop exit
PB: predicated region body
PF: predicated region fallthrough
CT: control target
= control target key end

     0   :  { %s3494_s12 = smov 0   ;;  %s3496_s13 = smov 0   ;;  %s3925_s0 = inlined_call_operand.vmem [shape: bf16[2,2,1,288,80], index: 0, kind: input, shape index: {}]   ;;  %s3926_s1 = inlined_call_operand.vmem [shape: bf16[5,80,32], index: 1, kind: input, shape index: {}]   ;;  %s3927_s2 = inlined_call_operand.vmem [shape: f32[1,32], index: 2, kind: input, shape index: {}]   ;;  %s3928_s3 = inlined_call_operand.vmem [shape: bf16[2,256,32], index: 3, kind: output, shape index: {}]  }
   0x1   :  { %s3498_s14 = smov 0  }
   0x2 LB: > { %s25_s15 = sadd.s32 1, %s3468_s13  ;;  %p2506_p0 = scmp.ge.s32.totalorder %s3472_s14, 1  ;;  %s3472_s14 = sphi %s3498_s14, %s13_s14   ;;  %s3468_s13 = sphi %s3496_s13, %s3930_s13   ;;  %s3464_s12 = sphi %s3494_s12, %s3929_s12  }
   0x3   : > { %p27_p1 = scmp.ge.s32.totalorder %s25_s15, 2  ;;  %p157_p2 = scmp.lt.s32.totalorder %s3472_s14, 3 }
   0x5   : > { %s3932_s15 = smov (%p27_p1, %s25_s15), 0  ;;  %p158_p3 = pnand %p2506_p0, %p157_p2 }
   0x6   : > { %v3345_v0 = vld [vmem:[%s3926_s1 + $0x28] sm:$0xff] (!%p158_p3)   ;;  %p189_p4 = scmp.lt.s32.totalorder (!%p158_p3), %s3464_s12, 1  ;;  %v3518_v1 = vld [vmem:[%s3926_s1 + $0x50] sm:$0xff] (!%p158_p3)   ;;  %v3529_v3 = vld [vmem:[%s3926_s1 + $0x58] sm:$0xff] (!%p158_p3)   ;;  %vm405_vm0 = vcmask (!%p158_p3), 654336   ;;  %vm2379_vm3 = vcmask (!%p158_p3), 257024  }
   0x7   : > { %161 = sbr.rel (%p158_p3) target bundleno = 404 (0x194), region = 32  ;;  %2972 = vmatprep.subr.bf16.mxu1 (!%p158_p3), %v3345_v0  ;;  %v3347_v2 = vld [vmem:[%s3926_s1 + $0x30] sm:$0xff] (!%p158_p3)   ;;  %3056 = vmatprep.subr.bf16.mxu0 (!%p158_p3), %v3518_v1  ;;  %v3349_v4 = vld [vmem:[%s3926_s1 + $0x38] sm:$0xff] (!%p158_p3)   ;;  %v3540_v5 = vld [vmem:[%s3926_s1 + $0x60] sm:$0xff] (!%p158_p3)  }
   0x8   : > { %2973 = vmatpush3.bf16.msra.mxu1 (!%p158_p3), %v3345_v0  ;;  %3057 = vmatpush3.bf16.msra.mxu0 (!%p158_p3), %v3518_v1  ;;  %v3351_v6 = vld [vmem:[%s3926_s1 + $0x40] sm:$0xff] (!%p158_p3)   ;;  %v3555_v7 = vld [vmem:[%s3926_s1 + $0x68] sm:$0xff] (!%p158_p3)   ;;  %v3567_v11 = vld [vmem:[%s3926_s1 + $0x70] sm:$0xff] (!%p158_p3)  }
   0x9   : > { %2974 = vmatprep.subr.bf16.mxu1 (!%p158_p3), %v3347_v2  ;;  %3058 = vmatprep.subr.bf16.mxu0 (!%p158_p3), %v3529_v3  ;;  %v3353_v10 = vld [vmem:[%s3926_s1 + $0x48] sm:$0xff] (!%p158_p3)   ;;  %v3358_v13 = vld [vmem:[%s3926_s1] sm:$0xff] (!%p158_p3)   ;;  %v3360_v14 = vld [vmem:[%s3926_s1 + $0x78] sm:$0xff] (!%p158_p3)  }
   0xa   : > { %v3363_v18 = vld [vmem:[%s3926_s1 + $0x80] sm:$0xff] (!%p158_p3)   ;;  %v3366_v19 = vld [vmem:[%s3926_s1 + $0x8] sm:$0xff] (!%p158_p3)   ;;  %v3372_v25 = vld [vmem:[%s3926_s1 + $0x90] sm:$0xff] (!%p158_p3)  }
   0xb   : > { %v3367_v21 = vld [vmem:[%s3926_s1 + $0x88] sm:$0xff] (!%p158_p3)   ;;  %v3377_v27 = vld [vmem:[%s3926_s1 + $0x10] sm:$0xff] (!%p158_p3)   ;;  %v3378_v28 = vld [vmem:[%s3926_s1 + $0x98] sm:$0xff] (!%p158_p3)  }
   0xc   : > { %2975 = vmatpush3.bf16.msra.mxu1 (!%p158_p3), %v3347_v2  ;;  %3059 = vmatpush3.bf16.msra.mxu0 (!%p158_p3), %v3529_v3  ;;  %v3383_v32 = vld [vmem:[%s3926_s1 + $0xa0] sm:$0xff] (!%p158_p3)   ;;  %v3385_v33 = vld [vmem:[%s3926_s1 + $0x18] sm:$0xff] (!%p158_p3)   ;;  %v3389_v43 = vld [vmem:[%s3926_s1 + $0xa8] sm:$0xff] (!%p158_p3)  }
   0xd   : > { %2976 = vmatprep.subr.bf16.mxu1 (!%p158_p3), %v3349_v4  ;;  %3060 = vmatprep.subr.bf16.mxu0 (!%p158_p3), %v3540_v5  ;;  %v3394_v39 = vld [vmem:[%s3926_s1 + $0x20] sm:$0xff] (!%p158_p3)   ;;  %v3399_v45 = vld [vmem:[%s3926_s1 + $0xb0] sm:$0xff] (!%p158_p3)   ;;  %v3406_v49 = vld [vmem:[%s3926_s1 + $0xb8] sm:$0xff] (!%p158_p3)  }
   0xe   : > { %s3934_s12 = smov (!%p189_p4, %s3464_s12), 1  ;;  %v3413_v54 = vld [vmem:[%s3926_s1 + $0xc0] sm:$0xff]  }
   0xf   : > { %s3320_s26 = smul.u32 288, %s3934_s12 }
  0x10   : > { %2977 = vmatpush3.bf16.msra.mxu1 %v3349_v4  ;;  %3061 = vmatpush3.bf16.msra.mxu0 %v3540_v5 }
  0x11   : > { %s3545_s4 = scalar_lea.vmem %s3925_s0, %s3320_s26  ;;  %2978 = vmatprep.subr.bf16.mxu1 %v3351_v6  ;;  %3062 = vmatprep.subr.bf16.mxu0 %v3555_v7  ;;  %s2834_s26 = sshll.u32 %s3934_s12, 7 }
  0x12   : > { %v3355_v8 = vld [vmem:[%s3545_s4 + $0x90] sm:$0xff]   ;;  %v3356_v9 = vld [vmem:[%s3545_s4 + $0x8] sm:$0xff]   ;;  %v3357_v12 = vld [vmem:[%s3545_s4 + $0x98] sm:$0xff]   ;;  %s3814_s29 = scalar_lea.vmem %s3928_s3, %s2834_s26 }
  0x13   : > { %2982 = vmatprep.mubr.msk.bf16.mxu1 %vm405_vm0, %v3355_v8  ;;  %3066 = vmatprep.mubr.msk.bf16.mxu0 %vm405_vm0, %v3356_v9  ;;  %v3359_v15 = vld [vmem:[%s3545_s4 + $0x10] sm:$0xff]   ;;  %v3361_v16 = vld [vmem:[%s3545_s4 + $0xa0] sm:$0xff]   ;;  %v3362_v17 = vld [vmem:[%s3545_s4 + $0x18] sm:$0xff]  }
  0x14   : > { %2979 = vmatpush3.bf16.msra.mxu1 %v3351_v6  ;;  %3063 = vmatpush3.bf16.msra.mxu0 %v3555_v7  ;;  %v3364_v20 = vld [vmem:[%s3545_s4 + $0xa8] sm:$0xff]   ;;  %v3365_v22 = vld [vmem:[%s3545_s4 + $0x20] sm:$0xff]   ;;  %v3368_v23 = vld [vmem:[%s3545_s4 + $0xb0] sm:$0xff]  }
  0x15   : > { %2980 = vmatprep.subr.bf16.mxu1 %v3353_v10  ;;  %3064 = vmatprep.subr.bf16.mxu0 %v3567_v11  ;;  %v3369_v24 = vld [vmem:[%s3545_s4 + $0x28] sm:$0xff]   ;;  %v3370_v26 = vld [vmem:[%s3545_s4 + $0xb8] sm:$0xff]   ;;  %v3371_v29 = vld [vmem:[%s3545_s4 + $0x30] sm:$0xff]  }
  0x16   : > { %v3373_v30 = vld [vmem:[%s3545_s4 + $0xc0] sm:$0xff]   ;;  %v3374_v31 = vld [vmem:[%s3545_s4 + $0x38] sm:$0xff]   ;;  %v3375_v34 = vld [vmem:[%s3545_s4 + $0xc8] sm:$0xff]  }
  0x17   : > { %v3376_v35 = vld [vmem:[%s3545_s4 + $0x40] sm:$0xff]   ;;  %v3379_v36 = vld [vmem:[%s3545_s4 + $0xd0] sm:$0xff]   ;;  %v3380_v37 = vld [vmem:[%s3545_s4 + $0x98] sm:$0xff]  }
  0x18   : > { %2981 = vmatpush3.bf16.msra.mxu1 %v3353_v10  ;;  %3065 = vmatpush3.bf16.msra.mxu0 %v3567_v11  ;;  %v3381_v38 = vld [vmem:[%s3545_s4 + $0xd8] sm:$0xff]   ;;  %v3382_v40 = vld [vmem:[%s3545_s4 + $0xa0] sm:$0xff]   ;;  %v3386_v42 = vld [vmem:[%s3545_s4 + $0xa8] sm:$0xff]  }
  0x19   : > { %3014 = vmatprep.subr.bf16.mxu1 %v3358_v13  ;;  %3098 = vmatprep.subr.bf16.mxu0 %v3360_v14  ;;  %v3384_v41 = vld [vmem:[%s3545_s4 + $0xe0] sm:$0xff]   ;;  %v3387_v44 = vld [vmem:[%s3545_s4 + $0xe8] sm:$0xff]   ;;  %v3388_v46 = vld [vmem:[%s3545_s4 + $0xb0] sm:$0xff]  }
  0x1a   : > { %v3390_v47 = vld [vmem:[%s3545_s4 + $0xf0] sm:$0xff]   ;;  %v3391_v48 = vld [vmem:[%s3545_s4 + $0xb8] sm:$0xff]   ;;  %v3393_v51 = vld [vmem:[%s3545_s4 + $0xc0] sm:$0xff]  }
  0x1b   : > { %2983 = vmatmul.mubr.msk.bf16.vlgmr.msra.gmra.mrb[0].mxu1 %vm405_vm0, %v3357_v12  ;;  %3067 = vmatmul.mubr.msk.bf16.vlgmr.msra.gmra.mrb[0].mxu0 %vm405_vm0, %v3359_v15  ;;  %v3392_v50 = vld [vmem:[%s3545_s4 + $0xf8] sm:$0xff]   ;;  %v3395_v52 = vld [vmem:[%s3545_s4 + $0x100] sm:$0xff]   ;;  %v3396_v53 = vld [vmem:[%s3545_s4 + $0xc8] sm:$0xff]  }
  0x1c   : > { %3015 = vmatpush3.bf16.msra.mxu1 %v3358_v13  ;;  %3099 = vmatpush3.bf16.msra.mxu0 %v3360_v14  ;;  %v3397_v55 = vld [vmem:[%s3545_s4 + $0x108] sm:$0xff]   ;;  %v3398_v56 = vld [vmem:[%s3545_s4 + $0xd0] sm:$0xff]   ;;  %v3400_v57 = vld [vmem:[%s3545_s4] sm:$0xff]  }
  0x1d   : > { %2986 = vmatprep.mubr.msk.bf16.mxu1 %vm405_vm0, %v3361_v16  ;;  %3070 = vmatprep.mubr.msk.bf16.mxu0 %vm405_vm0, %v3362_v17  ;;  %v3401_v58 = vld [vmem:[%s3545_s4 + $0xd8] sm:$0xff]   ;;  %v3402_v59 = vld [vmem:[%s3545_s4 + $0x8] sm:$0xff]   ;;  %v3403_v60 = vld [vmem:[%s3545_s4 + $0xe0] sm:$0xff]  }
  0x1e   : > { %3100 = vmatprep.subr.bf16.mxu0 %v3363_v18  ;;  %3016 = vmatprep.subr.bf16.mxu1 %v3366_v19  ;;  %v3404_v61 = vld [vmem:[%s3545_s4 + $0x10] sm:$0xff]   ;;  %v3405_v62 = vld [vmem:[%s3545_s4 + $0xe8] sm:$0xff]   ;;  %v3407_v63 = vld [vmem:[%s3545_s4 + $0x18] sm:$0xff]  }
  0x1f   : > { %v3408_v0 = vld [vmem:[%s3545_s4 + $0xf0] sm:$0xff]   ;;  %v3409_v2 = vld [vmem:[%s3545_s4 + $0x20] sm:$0xff]   ;;  %v3410_v4 = vld [vmem:[%s3545_s4 + $0xf8] sm:$0xff]  }
  0x20   : > { %3017 = vmatpush3.bf16.msra.mxu1 %v3366_v19  ;;  %3101 = vmatpush3.bf16.msra.mxu0 %v3363_v18  ;;  %v3414_v6 = vld [vmem:[%s3545_s4 + $0x30] sm:$0xff]   ;;  %v3415_v8 = vld [vmem:[%s3545_s4 + $0x108] sm:$0xff]   ;;  %v3421_v13 = vld [vmem:[%s3545_s4 + $0x18] sm:$0xff]  }
  0x21   : > { %3102 = vmatprep.subr.bf16.mxu0 %v3367_v21  ;;  %3018 = vmatprep.subr.bf16.mxu1 %v3377_v27  ;;  %v3417_v9 = vld [vmem:[%s3545_s4 + $0x110] sm:$0xff]   ;;  %v3420_v12 = vld [vmem:[%s3545_s4 + $0x48] sm:$0xff]   ;;  %v3423_v14 = vld [vmem:[%s3545_s4 + $0x20] sm:$0xff]  }
  0x22   : > { %v3419_v10 = vld [vmem:[%s3545_s4 + $0x10] sm:$0xff]   ;;  %v3424_v15 = vld [vmem:[%s3545_s4 + $0x58] sm:$0xff]   ;;  %v3425_v16 = vld [vmem:[%s3545_s4 + $0x28] sm:$0xff]  }
  0x23   : > { %2987 = vmatmul.mubr.msk.bf16.gmra.mrb[4].mxu1 %vm405_vm0, %v3364_v20  ;;  %3071 = vmatmul.mubr.msk.bf16.gmra.mrb[4].mxu0 %vm405_vm0, %v3365_v22  ;;  %v3426_v17 = vld [vmem:[%s3545_s4 + $0x60] sm:$0xff]   ;;  %v3427_v18 = vld [vmem:[%s3545_s4 + $0x30] sm:$0xff]   ;;  %v3428_v19 = vld [vmem:[%s3545_s4 + $0x68] sm:$0xff]  }
  0x24   : > { %2990 = vmatprep.mubr.msk.bf16.mxu1 %vm405_vm0, %v3368_v23  ;;  %3103 = vmatpush3.bf16.msra.mxu0 %v3367_v21  ;;  %v3429_v20 = vld [vmem:[%s3545_s4 + $0x38] sm:$0xff]   ;;  %v3430_v21 = vld [vmem:[%s3545_s4 + $0x70] sm:$0xff]   ;;  %v3431_v22 = vld [vmem:[%s3545_s4 + $0x40] sm:$0xff]  }
  0x25   : > { %3074 = vmatprep.mubr.msk.bf16.mxu0 %vm405_vm0, %v3369_v24  ;;  %3104 = vmatprep.subr.bf16.mxu0 %v3372_v25  ;;  %v3432_v23 = vld [vmem:[%s3545_s4 + $0x78] sm:$0xff]   ;;  %v3433_v24 = vld [vmem:[%s3545_s4 + $0x48] sm:$0xff]  }
  0x26   : > { %3019 = vmatpush3.bf16.msra.mxu1 %v3377_v27  ;;  %v3436_v27 = vld [vmem:[%s3545_s4 + $0x50] sm:$0xff]  }
  0x27   : > { %3020 = vmatprep.subr.bf16.mxu1 %v3385_v33 }
  0x28   : > { %3105 = vmatpush3.bf16.msra.mxu0 %v3372_v25  ;;  %v3434_v25 = vld [vmem:[%s3545_s4 + $0x48] sm:$0xff]  }
  0x29   : > { %3106 = vmatprep.subr.bf16.mxu0 %v3378_v28 }
  0x2a   : > { %3021 = vmatpush3.bf16.msra.mxu1 %v3385_v33  ;;  %v3442_v33 = vld [vmem:[%s3545_s4 + $0x68] sm:$0xff]  }
  0x2b   : > { %2991 = vmatmul.mubr.msk.bf16.gmra.mrb[8].mxu1 %vm405_vm0, %v3370_v26  ;;  %3075 = vmatmul.mubr.msk.bf16.gmra.mrb[8].mxu0 %vm405_vm0, %v3371_v29  ;;  %v3435_v26 = vld [vmem:[%s3545_s4 + $0x50] sm:$0xff]   ;;  %v3438_v29 = vld [vmem:[%s3545_s4 + $0x58] sm:$0xff]  }
  0x2c   : > { %2994 = vmatprep.mubr.msk.bf16.mxu1 %vm405_vm0, %v3373_v30  ;;  %3078 = vmatprep.mubr.msk.bf16.mxu0 %vm405_vm0, %v3374_v31  ;;  %v3439_v30 = vld [vmem:[%s3545_s4 + $0x60] sm:$0xff]  }
  0x2d   : > { %3107 = vmatpush3.bf16.msra.mxu0 %v3378_v28  ;;  %3022 = vmatprep.subr.bf16.mxu1 %v3394_v39  ;;  %v3437_v28 = vld [vmem:[%s3545_s4 + $0x58] sm:$0xff]   ;;  %v3440_v31 = vld [vmem:[%s3545_s4 + $0x60] sm:$0xff]  }
  0x2e   : > { %3140 = vmatprep.subr.bf16.mxu0 %v3383_v32  ;;  %3023 = vmatpush3.bf16.msra.mxu1 %v3394_v39  ;;  %v3448_v39 = vld [vmem:[%s3545_s4 + $0x80] sm:$0xff]  }
  0x2f   : > { %3182 = vmatprep.subr.bf16.mxu1 %v3518_v1 }
  0x33   : > { %2995 = vmatmul.mubr.msk.bf16.gmra.mrb[12].mxu1 %vm405_vm0, %v3375_v34  ;;  %3079 = vmatmul.mubr.msk.bf16.gmra.mrb[12].mxu0 %vm405_vm0, %v3376_v35  ;;  %v3443_v34 = vld [vmem:[%s3545_s4 + $0x70] sm:$0xff]  }
  0x34   : > { %2998 = vmatprep.mubr.msk.bf16.mxu1 %vm405_vm0, %v3379_v36  ;;  %3108 = vmatprep.mubr.msk.bf16.mxu0 %vm405_vm0, %v3380_v37  ;;  %v3444_v35 = vld [vmem:[%s3545_s4 + $0x70] sm:$0xff]   ;;  %v3445_v36 = vld [vmem:[%s3545_s4 + $0x78] sm:$0xff]  }
  0x35   : > { %v3446_v37 = vld [vmem:[%s3545_s4 + $0x78] sm:$0xff]  }
  0x3b   : > { %2999 = vmatmul.mubr.msk.bf16.gmra.mrb[16].mxu1 %vm405_vm0, %v3381_v38  ;;  %3109 = vmatmul.mubr.msk.bf16.vlgmr.msra.gmra.mrb[0].mxu0 %vm405_vm0, %v3382_v40  ;;  %v3447_v38 = vld [vmem:[%s3545_s4 + $0x80] sm:$0xff]   ;;  %v3449_v40 = vld [vmem:[%s3545_s4 + $0x88] sm:$0xff]  }
  0x3c   : > { %3002 = vmatprep.mubr.msk.bf16.mxu1 %vm405_vm0, %v3384_v41  ;;  %3141 = vmatpush3.bf16.msra.mxu0 %v3383_v32  ;;  %v3441_v32 = vld [vmem:[%s3545_s4 + $0x68] sm:$0xff]  }
  0x3d   : > { %3112 = vmatprep.mubr.msk.bf16.mxu0 %vm405_vm0, %v3386_v42  ;;  %3142 = vmatprep.subr.bf16.mxu0 %v3389_v43 }
  0x40   : > { %3143 = vmatpush3.bf16.msra.mxu0 %v3389_v43 }
  0x41   : > { %3144 = vmatprep.subr.bf16.mxu0 %v3399_v45 }
  0x43   : > { %3003 = vmatmul.mubr.msk.bf16.gmra.mrb[20].mxu1 %vm405_vm0, %v3387_v44  ;;  %3113 = vmatmul.mubr.msk.bf16.gmra.mrb[4].mxu0 %vm405_vm0, %v3388_v46 }
  0x44   : > { %3006 = vmatprep.mubr.msk.bf16.mxu1 %vm405_vm0, %v3390_v47  ;;  %3116 = vmatprep.mubr.msk.bf16.mxu0 %vm405_vm0, %v3391_v48 }
  0x45   : > { %3145 = vmatpush3.bf16.msra.mxu0 %v3399_v45 }
  0x46   : > { %3146 = vmatprep.subr.bf16.mxu0 %v3406_v49 }
  0x49   : > { %3147 = vmatpush3.bf16.msra.mxu0 %v3406_v49 }
  0x4a   : > { %3148 = vmatprep.subr.bf16.mxu0 %v3413_v54 }
  0x4b   : > { %3007 = vmatmul.mubr.msk.bf16.gmra.mrb[24].mxu1 %vm405_vm0, %v3392_v50  ;;  %3117 = vmatmul.mubr.msk.bf16.gmra.mrb[8].mxu0 %vm405_vm0, %v3393_v51 }
  0x4c   : > { %3010 = vmatprep.mubr.msk.bf16.mxu1 %vm405_vm0, %v3395_v52  ;;  %3120 = vmatprep.mubr.msk.bf16.mxu0 %vm405_vm0, %v3396_v53 }
  0x4d   : > { %3149 = vmatpush3.bf16.msra.mxu0 %v3413_v54 }
  0x53   : > { %3011 = vmatmul.mubr.msk.bf16.gmra.mrb[28].mxu1 %vm405_vm0, %v3397_v55  ;;  %3121 = vmatmul.mubr.msk.bf16.gmra.mrb[12].mxu0 %vm405_vm0, %v3398_v56 }
  0x54   : > { %3024 = vmatprep.mubr.msk.bf16.mxu1 %vm405_vm0, %v3400_v57  ;;  %3124 = vmatprep.mubr.msk.bf16.mxu0 %vm405_vm0, %v3401_v58  ;;  %v3804_v58 = vld [vmem:[%s3927_s2] ss:$0 sm:$0xff] }
  0x5b   : > { %3025 = vmatmul.mubr.msk.bf16.vlgmr.msra.gmra.mrb[0].mxu1 %vm405_vm0, %v3402_v59  ;;  %3125 = vmatmul.mubr.msk.bf16.gmra.mrb[16].mxu0 %vm405_vm0, %v3403_v60 }
  0x5c   : > { %3187 = vmatpush3.bf16.msra.mxu1 %v3518_v1  ;;  %3028 = vmatprep.mubr.msk.bf16.mxu1 %vm405_vm0, %v3404_v61  ;;  %v3411_v1 = vld [vmem:[%s3545_s4 + $0x28] sm:$0xff]  }
  0x5d   : > { %3128 = vmatprep.mubr.msk.bf16.mxu0 %vm405_vm0, %v3405_v62  ;;  %3183 = vmatprep.subr.bf16.mxu1 %v3529_v3 }
  0x60   : > { %3188 = vmatpush3.bf16.msra.mxu1 %v3529_v3  ;;  %v3412_v3 = vld [vmem:[%s3545_s4 + $0x100] sm:$0xff]  }
  0x61   : > { %3184 = vmatprep.subr.bf16.mxu1 %v3540_v5 }
  0x63   : > { %3029 = vmatmul.mubr.msk.bf16.gmra.mrb[4].mxu1 %vm405_vm0, %v3407_v63  ;;  %3129 = vmatmul.mubr.msk.bf16.gmra.mrb[20].mxu0 %vm405_vm0, %v3408_v0 }
  0x64   : > { %3032 = vmatprep.mubr.msk.bf16.mxu1 %vm405_vm0, %v3409_v2  ;;  %3132 = vmatprep.mubr.msk.bf16.mxu0 %vm405_vm0, %v3410_v4 }
  0x65   : > { %3189 = vmatpush3.bf16.msra.mxu1 %v3540_v5  ;;  %v3416_v5 = vld [vmem:[%s3545_s4 + $0x38] sm:$0xff]  }
  0x66   : > { %3185 = vmatprep.subr.bf16.mxu1 %v3555_v7 }
  0x69   : > { %3190 = vmatpush3.bf16.msra.mxu1 %v3555_v7  ;;  %v3418_v7 = vld [vmem:[%s3545_s4 + $0x40] sm:$0xff]  }
  0x6a   : > { %3186 = vmatprep.subr.bf16.mxu1 %v3567_v11 }
  0x6b   : > { %3033 = vmatmul.mubr.msk.bf16.gmra.mrb[8].mxu1 %vm405_vm0, %v3411_v1  ;;  %3133 = vmatmul.mubr.msk.bf16.gmra.mrb[24].mxu0 %vm405_vm0, %v3412_v3 }
  0x6c   : > { %3036 = vmatprep.mubr.msk.bf16.mxu1 %vm405_vm0, %v3414_v6  ;;  %3136 = vmatprep.mubr.msk.bf16.mxu0 %vm405_vm0, %v3415_v8 }
  0x6d   : > { %3191 = vmatpush3.bf16.msra.mxu1 %v3567_v11  ;;  %v3422_v11 = vld [vmem:[%s3545_s4 + $0x50] sm:$0xff]  }
  0x73   : > { %3037 = vmatmul.mubr.msk.bf16.gmra.mrb[12].mxu1 %vm405_vm0, %v3416_v5  ;;  %3137 = vmatmul.mubr.msk.bf16.gmra.mrb[28].mxu0 %vm405_vm0, %v3417_v9 }
  0x74   : > { %3040 = vmatprep.mubr.msk.bf16.mxu1 %vm405_vm0, %v3418_v7  ;;  %3150 = vmatprep.mubr.msk.bf16.mxu0 %vm405_vm0, %v3419_v10 }
  0x7b   : > { %3041 = vmatmul.mubr.msk.bf16.gmra.mrb[16].mxu1 %vm405_vm0, %v3420_v12  ;;  %3151 = vmatmul.mubr.msk.bf16.vlgmr.msra.gmra.mrb[0].mxu0 %vm405_vm0, %v3421_v13 }
  0x7c   : > { %3044 = vmatprep.mubr.msk.bf16.mxu1 %vm405_vm0, %v3422_v11  ;;  %3154 = vmatprep.mubr.msk.bf16.mxu0 %vm405_vm0, %v3423_v14 }
  0x83   : > { %3045 = vmatmul.mubr.msk.bf16.gmra.mrb[20].mxu1 %vm405_vm0, %v3424_v15  ;;  %3155 = vmatmul.mubr.msk.bf16.gmra.mrb[4].mxu0 %vm405_vm0, %v3425_v16 }
  0x84   : > { %3048 = vmatprep.mubr.msk.bf16.mxu1 %vm405_vm0, %v3426_v17  ;;  %3158 = vmatprep.mubr.msk.bf16.mxu0 %vm405_vm0, %v3427_v18 }
  0x8b   : > { %3049 = vmatmul.mubr.msk.bf16.gmra.mrb[24].mxu1 %vm405_vm0, %v3428_v19  ;;  %3159 = vmatmul.mubr.msk.bf16.gmra.mrb[8].mxu0 %vm405_vm0, %v3429_v20 }
  0x8c   : > { %3052 = vmatprep.mubr.msk.bf16.mxu1 %vm405_vm0, %v3430_v21  ;;  %3162 = vmatprep.mubr.msk.bf16.mxu0 %vm405_vm0, %v3431_v22 }
  0x93   : > { %3053 = vmatmul.mubr.msk.bf16.gmra.mrb[28].mxu1 %vm405_vm0, %v3432_v23  ;;  %3163 = vmatmul.mubr.msk.bf16.gmra.mrb[12].mxu0 %vm405_vm0, %v3433_v24 }
  0x94   : > { %3082 = vmatprep.mubr.msk.bf16.mxu1 %vm405_vm0, %v3434_v25  ;;  %3166 = vmatprep.mubr.msk.bf16.mxu0 %vm405_vm0, %v3435_v26 }
  0x9b   : > { %3083 = vmatmul.mubr.msk.bf16.vlgmr.msra.gmra.mrb[16].mxu1 %vm405_vm0, %v3436_v27  ;;  %3167 = vmatmul.mubr.msk.bf16.gmra.mrb[16].mxu0 %vm405_vm0, %v3437_v28 }
  0x9c   : > { %3086 = vmatprep.mubr.msk.bf16.mxu1 %vm405_vm0, %v3438_v29  ;;  %3170 = vmatprep.mubr.msk.bf16.mxu0 %vm405_vm0, %v3439_v30 }
  0xa3   : > { %3087 = vmatmul.mubr.msk.bf16.gmra.mrb[20].mxu1 %vm405_vm0, %v3440_v31  ;;  %3171 = vmatmul.mubr.msk.bf16.gmra.mrb[20].mxu0 %vm405_vm0, %v3441_v32 }
  0xa4   : > { %3090 = vmatprep.mubr.msk.bf16.mxu1 %vm405_vm0, %v3442_v33  ;;  %3174 = vmatprep.mubr.msk.bf16.mxu0 %vm405_vm0, %v3443_v34 }
  0xab   : > { %3091 = vmatmul.mubr.msk.bf16.gmra.mrb[24].mxu1 %vm405_vm0, %v3444_v35  ;;  %3175 = vmatmul.mubr.msk.bf16.gmra.mrb[24].mxu0 %vm405_vm0, %v3445_v36 }
  0xac   : > { %3094 = vmatprep.mubr.msk.bf16.mxu1 %vm405_vm0, %v3446_v37  ;;  %3178 = vmatprep.mubr.msk.bf16.mxu0 %vm405_vm0, %v3447_v38 }
  0xb3   : > { %3095 = vmatmul.mubr.msk.bf16.gmra.mrb[28].mxu1 %vm405_vm0, %v3448_v39  ;;  %3179 = vmatmul.mubr.msk.bf16.gmra.mrb[28].mxu0 %vm405_vm0, %v3449_v40 }
 0x12e   : > { %v3026_v41 = vpop.f32.mrb[0].mxu1 }
 0x12f   : > { %v807_v42 = vpop.f32.mrb[1].mxu1 }
 0x130   : > { %v3027_v43 = vpop.f32.mrb[2].mxu1 }
 0x131   : > { %v810_v44 = vpop.f32.mrb[3].mxu1 }
 0x136   : > { %v3030_v45 = vpop.f32.mrb[4].mxu1 }
 0x137   : > { %v823_v46 = vpop.f32.mrb[5].mxu1 }
 0x138   : > { %v3031_v47 = vpop.f32.mrb[6].mxu1 }
 0x139   : > { %v826_v48 = vpop.f32.mrb[7].mxu1 }
 0x13e   : > { %v3785_v49 = vpop.f32.mrb[8].mxu1 }
 0x13f   : > { %v3787_v50 = vpop.f32.mrb[9].mxu1 }
 0x140   : > { %v3789_v51 = vpop.f32.mrb[10].mxu1 }
 0x141   : > { %v3791_v52 = vpop.f32.mrb[11].mxu1 }
 0x146   : > { %v3793_v53 = vpop.f32.mrb[12].mxu1 }
 0x147   : > { %v3795_v54 = vpop.f32.mrb[13].mxu1 }
 0x148   : > { %v3797_v55 = vpop.f32.mrb[14].mxu1 }
 0x149   : > { %v3799_v56 = vpop.f32.mrb[15].mxu1 }
 0x14e   : > { %v3152_v57 = vpop.f32.mrb[0].mxu0 }
 0x14f   : > { %v3192_v59 = vadd.f32 %v3152_v57, %v3026_v41  ;;  %v1957_v60 = vpop.f32.mrb[1].mxu0 }
 0x150   : > { %v3193_v61 = vadd.f32 %v1957_v60, %v807_v42  ;;  %v3153_v62 = vpop.f32.mrb[2].mxu0 }
 0x151   : > { %v2125_v63 = vadd.f32 %v3192_v59, %v3804_v58  ;;  %v3194_v0 = vadd.f32 %v3153_v62, %v3027_v43  ;;  %v1960_v2 = vpop.f32.mrb[3].mxu0 }
 0x152   : > { %v2123_v4 = vadd.f32 %v3193_v61, %v3804_v58  ;;  %v3195_v1 = vadd.f32 %v1960_v2, %v810_v44 }
 0x153   : > { %vm2157_vm1 = vcmp.ge.f32.partialorder %v2125_v63, 0.0  ;;  %v2189_v3 = vmul.f32 0.01, %v2125_v63  ;;  %v2126_v6 = vadd.f32 %v3194_v0, %v3804_v58 }
 0x154   : > { %vm2155_vm2 = vcmp.ge.f32.partialorder %v2123_v4, 0.0  ;;  %v2187_v8 = vmul.f32 0.01, %v2123_v4  ;;  %v2124_v5 = vadd.f32 %v3195_v1, %v3804_v58 }
 0x155   : > { %v2221_v9 = vsel %vm2157_vm1, %v2125_v63, %v2189_v3  ;;  %vm2158_vm4 = vcmp.ge.f32.partialorder %v2126_v6, 0.0  ;;  %v2190_v7 = vmul.f32 0.01, %v2126_v6 }
 0x156   : > { %v2837_v10 = vpack.c.bf16 %v2221_v9, %v2221_v9  ;;  %v2219_v12 = vsel %vm2155_vm2, %v2123_v4, %v2187_v8  ;;  %vm2156_vm5 = vcmp.ge.f32.partialorder %v2124_v5, 0.0  ;;  %v2188_v13 = vmul.f32 0.01, %v2124_v5  ;;  %v3156_v11 = vpop.f32.mrb[4].mxu0 }
 0x157   : > { %v2835_v14 = vpack.c.bf16 %v2219_v12, %v2219_v12  ;;  %v2222_v15 = vsel %vm2158_vm4, %v2126_v6, %v2190_v7  ;;  %v3196_v16 = vadd.f32 %v3156_v11, %v3030_v45  ;;  %v1973_v17 = vpop.f32.mrb[5].mxu0 }
 0x158   : > { %2382 = vst.msk [vmem:[%s3814_s29 + $0x8] sm:$0xf] %vm2379_vm3, %v2837_v10  ;;  %v2838_v18 = vpack.c.bf16 %v2222_v15, %v2222_v15  ;;  %v2220_v19 = vsel %vm2156_vm5, %v2124_v5, %v2188_v13  ;;  %v3197_v20 = vadd.f32 %v1973_v17, %v823_v46  ;;  %v3157_v21 = vpop.f32.mrb[6].mxu0 }
 0x159   : > { %2380 = vst.msk [vmem:[%s3814_s29] sm:$0xf] %vm2379_vm3, %v2835_v14  ;;  %v2836_v22 = vpack.c.bf16 %v2220_v19, %v2220_v19  ;;  %v2129_v23 = vadd.f32 %v3196_v16, %v3804_v58  ;;  %v3198_v24 = vadd.f32 %v3157_v21, %v3031_v47  ;;  %v1976_v25 = vpop.f32.mrb[7].mxu0 }
 0x15a   : > { %2383 = vst.msk [vmem:[%s3814_s29 + $0xc] sm:$0xf] %vm2379_vm3, %v2838_v18  ;;  %v2127_v26 = vadd.f32 %v3197_v20, %v3804_v58  ;;  %v3199_v27 = vadd.f32 %v1976_v25, %v826_v48 }
 0x15b   : > { %2381 = vst.msk [vmem:[%s3814_s29 + $0x4] sm:$0xf] %vm2379_vm3, %v2836_v22  ;;  %vm2161_vm6 = vcmp.ge.f32.partialorder %v2129_v23, 0.0  ;;  %v2193_v28 = vmul.f32 0.01, %v2129_v23  ;;  %v2130_v29 = vadd.f32 %v3198_v24, %v3804_v58 }
 0x15c   : > { %vm2159_vm7 = vcmp.ge.f32.partialorder %v2127_v26, 0.0  ;;  %v2191_v30 = vmul.f32 0.01, %v2127_v26  ;;  %v2128_v31 = vadd.f32 %v3199_v27, %v3804_v58 }
 0x15d   : > { %v2225_v32 = vsel %vm2161_vm6, %v2129_v23, %v2193_v28  ;;  %vm2162_vm8 = vcmp.ge.f32.partialorder %v2130_v29, 0.0  ;;  %v2194_v33 = vmul.f32 0.01, %v2130_v29 }
 0x15e   : > { %v2841_v34 = vpack.c.bf16 %v2225_v32, %v2225_v32  ;;  %v2223_v35 = vsel %vm2159_vm7, %v2127_v26, %v2191_v30  ;;  %vm2160_vm9 = vcmp.ge.f32.partialorder %v2128_v31, 0.0  ;;  %v2192_v36 = vmul.f32 0.01, %v2128_v31  ;;  %v3160_v37 = vpop.f32.mrb[8].mxu0 }
 0x15f   : > { %v2839_v38 = vpack.c.bf16 %v2223_v35, %v2223_v35  ;;  %v2226_v39 = vsel %vm2162_vm8, %v2130_v29, %v2194_v33  ;;  %v3200_v40 = vadd.f32 %v3160_v37, %v3785_v49  ;;  %v1989_v41 = vpop.f32.mrb[9].mxu0 }
 0x160   : > { %2386 = vst.msk [vmem:[%s3814_s29 + $0x18] sm:$0xf] %vm2379_vm3, %v2841_v34  ;;  %v2842_v42 = vpack.c.bf16 %v2226_v39, %v2226_v39  ;;  %v2224_v43 = vsel %vm2160_vm9, %v2128_v31, %v2192_v36  ;;  %v3201_v44 = vadd.f32 %v1989_v41, %v3787_v50  ;;  %v3161_v45 = vpop.f32.mrb[10].mxu0 }
 0x161   : > { %2384 = vst.msk [vmem:[%s3814_s29 + $0x10] sm:$0xf] %vm2379_vm3, %v2839_v38  ;;  %v2840_v46 = vpack.c.bf16 %v2224_v43, %v2224_v43  ;;  %v2133_v47 = vadd.f32 %v3200_v40, %v3804_v58  ;;  %v3202_v48 = vadd.f32 %v3161_v45, %v3789_v51  ;;  %v1992_v57 = vpop.f32.mrb[11].mxu0 }
 0x162   : > { %2387 = vst.msk [vmem:[%s3814_s29 + $0x1c] sm:$0xf] %vm2379_vm3, %v2842_v42  ;;  %v2131_v49 = vadd.f32 %v3201_v44, %v3804_v58  ;;  %v3203_v59 = vadd.f32 %v1992_v57, %v3791_v52 }
 0x163   : > { %2385 = vst.msk [vmem:[%s3814_s29 + $0x14] sm:$0xf] %vm2379_vm3, %v2840_v46  ;;  %vm2165_vm10 = vcmp.ge.f32.partialorder %v2133_v47, 0.0  ;;  %v2197_v60 = vmul.f32 0.01, %v2133_v47  ;;  %v2134_v50 = vadd.f32 %v3202_v48, %v3804_v58 }
 0x164   : > { %vm2163_vm11 = vcmp.ge.f32.partialorder %v2131_v49, 0.0  ;;  %v2195_v61 = vmul.f32 0.01, %v2131_v49  ;;  %v2132_v62 = vadd.f32 %v3203_v59, %v3804_v58 }
 0x165   : > { %v2229_v63 = vsel %vm2165_vm10, %v2133_v47, %v2197_v60  ;;  %vm2166_vm12 = vcmp.ge.f32.partialorder %v2134_v50, 0.0  ;;  %v2198_v51 = vmul.f32 0.01, %v2134_v50 }
 0x166   : > { %v2845_v0 = vpack.c.bf16 %v2229_v63, %v2229_v63  ;;  %v2227_v2 = vsel %vm2163_vm11, %v2131_v49, %v2195_v61  ;;  %vm2164_vm13 = vcmp.ge.f32.partialorder %v2132_v62, 0.0  ;;  %v2196_v4 = vmul.f32 0.01, %v2132_v62  ;;  %v3164_v52 = vpop.f32.mrb[12].mxu0 }
 0x167   : > { %v2843_v1 = vpack.c.bf16 %v2227_v2, %v2227_v2  ;;  %v2230_v3 = vsel %vm2166_vm12, %v2134_v50, %v2198_v51  ;;  %v3204_v6 = vadd.f32 %v3164_v52, %v3793_v53  ;;  %v2005_v8 = vpop.f32.mrb[13].mxu0 }
 0x168   : > { %2390 = vst.msk [vmem:[%s3814_s29 + $0x28] sm:$0xf] %vm2379_vm3, %v2845_v0  ;;  %v2846_v5 = vpack.c.bf16 %v2230_v3, %v2230_v3  ;;  %v2228_v9 = vsel %vm2164_vm13, %v2132_v62, %v2196_v4  ;;  %v3205_v7 = vadd.f32 %v2005_v8, %v3795_v54  ;;  %v3165_v10 = vpop.f32.mrb[14].mxu0 }
 0x169   : > { %2388 = vst.msk [vmem:[%s3814_s29 + $0x20] sm:$0xf] %vm2379_vm3, %v2843_v1  ;;  %v2844_v12 = vpack.c.bf16 %v2228_v9, %v2228_v9  ;;  %v2137_v13 = vadd.f32 %v3204_v6, %v3804_v58  ;;  %v3206_v11 = vadd.f32 %v3165_v10, %v3797_v55  ;;  %v2008_v14 = vpop.f32.mrb[15].mxu0 }
 0x16a   : > { %2391 = vst.msk [vmem:[%s3814_s29 + $0x2c] sm:$0xf] %vm2379_vm3, %v2846_v5  ;;  %v2135_v53 = vadd.f32 %v3205_v7, %v3804_v58  ;;  %v3207_v15 = vadd.f32 %v2008_v14, %v3799_v56 }
 0x16b   : > { %2389 = vst.msk [vmem:[%s3814_s29 + $0x24] sm:$0xf] %vm2379_vm3, %v2844_v12  ;;  %vm2169_vm14 = vcmp.ge.f32.partialorder %v2137_v13, 0.0  ;;  %v2201_v16 = vmul.f32 0.01, %v2137_v13  ;;  %v2138_v54 = vadd.f32 %v3206_v11, %v3804_v58 }
 0x16c   : > { %vm2167_vm15 = vcmp.ge.f32.partialorder %v2135_v53, 0.0  ;;  %v2199_v17 = vmul.f32 0.01, %v2135_v53  ;;  %v2136_v18 = vadd.f32 %v3207_v15, %v3804_v58 }
 0x16d   : > { %v2233_v19 = vsel %vm2169_vm14, %v2137_v13, %v2201_v16  ;;  %vm2170_vm0 = vcmp.ge.f32.partialorder %v2138_v54, 0.0  ;;  %v2202_v55 = vmul.f32 0.01, %v2138_v54 }
 0x16e   : > { %v3084_v20 = vpop.f32.mrb[16].mxu1  ;;  %v2849_v21 = vpack.c.bf16 %v2233_v19, %v2233_v19  ;;  %v2231_v22 = vsel %vm2167_vm15, %v2135_v53, %v2199_v17  ;;  %vm2168_vm1 = vcmp.ge.f32.partialorder %v2136_v18, 0.0  ;;  %v2200_v56 = vmul.f32 0.01, %v2136_v18  ;;  %v3168_v23 = vpop.f32.mrb[16].mxu0 }
 0x16f   : > { %v1233_v24 = vpop.f32.mrb[17].mxu1  ;;  %v2847_v25 = vpack.c.bf16 %v2231_v22, %v2231_v22  ;;  %v2234_v26 = vsel %vm2170_vm0, %v2138_v54, %v2202_v55  ;;  %v3208_v27 = vadd.f32 %v3168_v23, %v3084_v20  ;;  %v2021_v28 = vpop.f32.mrb[17].mxu0 }
 0x170   : > { %v3085_v29 = vpop.f32.mrb[18].mxu1  ;;  %2394 = vst.msk [vmem:[%s3814_s29 + $0x38] sm:$0xf] %vm2379_vm3, %v2849_v21  ;;  %v2850_v30 = vpack.c.bf16 %v2234_v26, %v2234_v26  ;;  %v2232_v31 = vsel %vm2168_vm1, %v2136_v18, %v2200_v56  ;;  %v3209_v32 = vadd.f32 %v2021_v28, %v1233_v24  ;;  %v3169_v33 = vpop.f32.mrb[18].mxu0 }
 0x171   : > { %v1236_v34 = vpop.f32.mrb[19].mxu1  ;;  %2392 = vst.msk [vmem:[%s3814_s29 + $0x30] sm:$0xf] %vm2379_vm3, %v2847_v25  ;;  %v2848_v35 = vpack.c.bf16 %v2232_v31, %v2232_v31  ;;  %v2141_v36 = vadd.f32 %v3208_v27, %v3804_v58  ;;  %v3210_v37 = vadd.f32 %v3169_v33, %v3085_v29  ;;  %v2024_v38 = vpop.f32.mrb[19].mxu0 }
 0x172   : > { %2395 = vst.msk [vmem:[%s3814_s29 + $0x3c] sm:$0xf] %vm2379_vm3, %v2850_v30  ;;  %v2139_v39 = vadd.f32 %v3209_v32, %v3804_v58  ;;  %v3211_v40 = vadd.f32 %v2024_v38, %v1236_v34 }
 0x173   : > { %2393 = vst.msk [vmem:[%s3814_s29 + $0x34] sm:$0xf] %vm2379_vm3, %v2848_v35  ;;  %vm2173_vm2 = vcmp.ge.f32.partialorder %v2141_v36, 0.0  ;;  %v2205_v41 = vmul.f32 0.01, %v2141_v36  ;;  %v2142_v42 = vadd.f32 %v3210_v37, %v3804_v58 }
 0x174   : > { %vm2171_vm4 = vcmp.ge.f32.partialorder %v2139_v39, 0.0  ;;  %v2203_v43 = vmul.f32 0.01, %v2139_v39  ;;  %v2140_v44 = vadd.f32 %v3211_v40, %v3804_v58 }
 0x175   : > { %v2237_v45 = vsel %vm2173_vm2, %v2141_v36, %v2205_v41  ;;  %vm2174_vm5 = vcmp.ge.f32.partialorder %v2142_v42, 0.0  ;;  %v2206_v46 = vmul.f32 0.01, %v2142_v42 }
 0x176   : > { %v3088_v47 = vpop.f32.mrb[20].mxu1  ;;  %v2853_v48 = vpack.c.bf16 %v2237_v45, %v2237_v45  ;;  %v2235_v57 = vsel %vm2171_vm4, %v2139_v39, %v2203_v43  ;;  %vm2172_vm6 = vcmp.ge.f32.partialorder %v2140_v44, 0.0  ;;  %v2204_v49 = vmul.f32 0.01, %v2140_v44  ;;  %v3172_v59 = vpop.f32.mrb[20].mxu0 }
 0x177   : > { %v1249_v60 = vpop.f32.mrb[21].mxu1  ;;  %v2851_v50 = vpack.c.bf16 %v2235_v57, %v2235_v57  ;;  %v2238_v61 = vsel %vm2174_vm5, %v2142_v42, %v2206_v46  ;;  %v3212_v62 = vadd.f32 %v3172_v59, %v3088_v47  ;;  %v2037_v63 = vpop.f32.mrb[21].mxu0 }
 0x178   : > { %v3089_v51 = vpop.f32.mrb[22].mxu1  ;;  %2398 = vst.msk [vmem:[%s3814_s29 + $0x48] sm:$0xf] %vm2379_vm3, %v2853_v48  ;;  %v2854_v0 = vpack.c.bf16 %v2238_v61, %v2238_v61  ;;  %v2236_v2 = vsel %vm2172_vm6, %v2140_v44, %v2204_v49  ;;  %v3213_v4 = vadd.f32 %v2037_v63, %v1249_v60  ;;  %v3173_v52 = vpop.f32.mrb[22].mxu0 }
 0x179   : > { %v1252_v1 = vpop.f32.mrb[23].mxu1  ;;  %2396 = vst.msk [vmem:[%s3814_s29 + $0x40] sm:$0xf] %vm2379_vm3, %v2851_v50  ;;  %v2852_v3 = vpack.c.bf16 %v2236_v2, %v2236_v2  ;;  %v2145_v6 = vadd.f32 %v3212_v62, %v3804_v58  ;;  %v3214_v8 = vadd.f32 %v3173_v52, %v3089_v51  ;;  %v2040_v5 = vpop.f32.mrb[23].mxu0 }
 0x17a   : > { %2399 = vst.msk [vmem:[%s3814_s29 + $0x4c] sm:$0xf] %vm2379_vm3, %v2854_v0  ;;  %v2143_v9 = vadd.f32 %v3213_v4, %v3804_v58  ;;  %v3215_v7 = vadd.f32 %v2040_v5, %v1252_v1 }
 0x17b   : > { %2397 = vst.msk [vmem:[%s3814_s29 + $0x44] sm:$0xf] %vm2379_vm3, %v2852_v3  ;;  %vm2177_vm7 = vcmp.ge.f32.partialorder %v2145_v6, 0.0  ;;  %v2209_v10 = vmul.f32 0.01, %v2145_v6  ;;  %v2146_v12 = vadd.f32 %v3214_v8, %v3804_v58 }
 0x17c   : > { %vm2175_vm8 = vcmp.ge.f32.partialorder %v2143_v9, 0.0  ;;  %v2207_v13 = vmul.f32 0.01, %v2143_v9  ;;  %v2144_v11 = vadd.f32 %v3215_v7, %v3804_v58 }
 0x17d   : > { %v2241_v14 = vsel %vm2177_vm7, %v2145_v6, %v2209_v10  ;;  %vm2178_vm9 = vcmp.ge.f32.partialorder %v2146_v12, 0.0  ;;  %v2210_v53 = vmul.f32 0.01, %v2146_v12 }
 0x17e   : > { %v3092_v15 = vpop.f32.mrb[24].mxu1  ;;  %v2857_v16 = vpack.c.bf16 %v2241_v14, %v2241_v14  ;;  %v2239_v54 = vsel %vm2175_vm8, %v2143_v9, %v2207_v13  ;;  %vm2176_vm10 = vcmp.ge.f32.partialorder %v2144_v11, 0.0  ;;  %v2208_v17 = vmul.f32 0.01, %v2144_v11  ;;  %v3176_v18 = vpop.f32.mrb[24].mxu0 }
 0x17f   : > { %v1265_v19 = vpop.f32.mrb[25].mxu1  ;;  %v2855_v55 = vpack.c.bf16 %v2239_v54, %v2239_v54  ;;  %v2242_v20 = vsel %vm2178_vm9, %v2146_v12, %v2210_v53  ;;  %v3216_v21 = vadd.f32 %v3176_v18, %v3092_v15  ;;  %v2053_v22 = vpop.f32.mrb[25].mxu0 }
 0x180   : > { %v3093_v56 = vpop.f32.mrb[26].mxu1  ;;  %2402 = vst.msk [vmem:[%s3814_s29 + $0x58] sm:$0xf] %vm2379_vm3, %v2857_v16  ;;  %v2858_v23 = vpack.c.bf16 %v2242_v20, %v2242_v20  ;;  %v2240_v24 = vsel %vm2176_vm10, %v2144_v11, %v2208_v17  ;;  %v3217_v25 = vadd.f32 %v2053_v22, %v1265_v19  ;;  %v3177_v26 = vpop.f32.mrb[26].mxu0 }
 0x181   : > { %v1268_v27 = vpop.f32.mrb[27].mxu1  ;;  %2400 = vst.msk [vmem:[%s3814_s29 + $0x50] sm:$0xf] %vm2379_vm3, %v2855_v55  ;;  %v2856_v28 = vpack.c.bf16 %v2240_v24, %v2240_v24  ;;  %v2149_v29 = vadd.f32 %v3216_v21, %v3804_v58  ;;  %v3218_v30 = vadd.f32 %v3177_v26, %v3093_v56  ;;  %v2056_v31 = vpop.f32.mrb[27].mxu0 }
 0x182   : > { %2403 = vst.msk [vmem:[%s3814_s29 + $0x5c] sm:$0xf] %vm2379_vm3, %v2858_v23  ;;  %v2147_v32 = vadd.f32 %v3217_v25, %v3804_v58  ;;  %v3219_v33 = vadd.f32 %v2056_v31, %v1268_v27 }
 0x183   : > { %2401 = vst.msk [vmem:[%s3814_s29 + $0x54] sm:$0xf] %vm2379_vm3, %v2856_v28  ;;  %vm2181_vm11 = vcmp.ge.f32.partialorder %v2149_v29, 0.0  ;;  %v2213_v34 = vmul.f32 0.01, %v2149_v29  ;;  %v2150_v35 = vadd.f32 %v3218_v30, %v3804_v58 }
 0x184   : > { %vm2179_vm12 = vcmp.ge.f32.partialorder %v2147_v32, 0.0  ;;  %v2211_v36 = vmul.f32 0.01, %v2147_v32  ;;  %v2148_v37 = vadd.f32 %v3219_v33, %v3804_v58 }
 0x185   : > { %v2245_v38 = vsel %vm2181_vm11, %v2149_v29, %v2213_v34  ;;  %vm2182_vm13 = vcmp.ge.f32.partialorder %v2150_v35, 0.0  ;;  %v2214_v39 = vmul.f32 0.01, %v2150_v35 }
 0x186   : > { %v3096_v40 = vpop.f32.mrb[28].mxu1  ;;  %v2861_v41 = vpack.c.bf16 %v2245_v38, %v2245_v38  ;;  %v2243_v42 = vsel %vm2179_vm12, %v2147_v32, %v2211_v36  ;;  %vm2180_vm14 = vcmp.ge.f32.partialorder %v2148_v37, 0.0  ;;  %v2212_v43 = vmul.f32 0.01, %v2148_v37  ;;  %v3180_v44 = vpop.f32.mrb[28].mxu0 }
 0x187   : > { %v1281_v45 = vpop.f32.mrb[29].mxu1  ;;  %v2859_v46 = vpack.c.bf16 %v2243_v42, %v2243_v42  ;;  %v2246_v47 = vsel %vm2182_vm13, %v2150_v35, %v2214_v39  ;;  %v3220_v48 = vadd.f32 %v3180_v44, %v3096_v40  ;;  %v2069_v57 = vpop.f32.mrb[29].mxu0 }
 0x188   : > { %v3097_v49 = vpop.f32.mrb[30].mxu1  ;;  %2406 = vst.msk [vmem:[%s3814_s29 + $0x68] sm:$0xf] %vm2379_vm3, %v2861_v41  ;;  %v2862_v59 = vpack.c.bf16 %v2246_v47, %v2246_v47  ;;  %v2244_v60 = vsel %vm2180_vm14, %v2148_v37, %v2212_v43  ;;  %v3221_v50 = vadd.f32 %v2069_v57, %v1281_v45  ;;  %v3181_v61 = vpop.f32.mrb[30].mxu0 }
 0x189   : > { %v1284_v62 = vpop.f32.mrb[31].mxu1  ;;  %2404 = vst.msk [vmem:[%s3814_s29 + $0x60] sm:$0xf] %vm2379_vm3, %v2859_v46  ;;  %v2860_v63 = vpack.c.bf16 %v2244_v60, %v2244_v60  ;;  %v2153_v51 = vadd.f32 %v3220_v48, %v3804_v58  ;;  %v3222_v0 = vadd.f32 %v3181_v61, %v3097_v49  ;;  %v2072_v2 = vpop.f32.mrb[31].mxu0 }
 0x18a   : > { %2407 = vst.msk [vmem:[%s3814_s29 + $0x6c] sm:$0xf] %vm2379_vm3, %v2862_v59  ;;  %v2151_v4 = vadd.f32 %v3221_v50, %v3804_v58  ;;  %v3223_v52 = vadd.f32 %v2072_v2, %v1284_v62 }
 0x18b   : > { %2405 = vst.msk [vmem:[%s3814_s29 + $0x64] sm:$0xf] %vm2379_vm3, %v2860_v63  ;;  %vm2185_vm15 = vcmp.ge.f32.partialorder %v2153_v51, 0.0  ;;  %v2217_v1 = vmul.f32 0.01, %v2153_v51  ;;  %v2154_v3 = vadd.f32 %v3222_v0, %v3804_v58 }
 0x18c   : > { %vm2183_vm0 = vcmp.ge.f32.partialorder %v2151_v4, 0.0  ;;  %v2215_v6 = vmul.f32 0.01, %v2151_v4  ;;  %v2152_v8 = vadd.f32 %v3223_v52, %v3804_v58 }
 0x18d   : > { %v2249_v5 = vsel %vm2185_vm15, %v2153_v51, %v2217_v1  ;;  %vm2186_vm1 = vcmp.ge.f32.partialorder %v2154_v3, 0.0  ;;  %v2218_v9 = vmul.f32 0.01, %v2154_v3 }
 0x18e   : > { %v2865_v7 = vpack.c.bf16 %v2249_v5, %v2249_v5  ;;  %v2247_v10 = vsel %vm2183_vm0, %v2151_v4, %v2215_v6  ;;  %vm2184_vm2 = vcmp.ge.f32.partialorder %v2152_v8, 0.0  ;;  %v2216_v12 = vmul.f32 0.01, %v2152_v8 }
 0x18f   : > { %v2863_v13 = vpack.c.bf16 %v2247_v10, %v2247_v10  ;;  %v2250_v11 = vsel %vm2186_vm1, %v2154_v3, %v2218_v9 }
 0x190   : > { %2410 = vst.msk [vmem:[%s3814_s29 + $0x78] sm:$0xf] %vm2379_vm3, %v2865_v7  ;;  %v2866_v14 = vpack.c.bf16 %v2250_v11, %v2250_v11  ;;  %v2248_v53 = vsel %vm2184_vm2, %v2152_v8, %v2216_v12 }
 0x191   : > { %2408 = vst.msk [vmem:[%s3814_s29 + $0x70] sm:$0xf] %vm2379_vm3, %v2863_v13  ;;  %v2864_v15 = vpack.c.bf16 %v2248_v53, %v2248_v53 }
 0x192   : > { %2411 = vst.msk [vmem:[%s3814_s29 + $0x7c] sm:$0xf] %vm2379_vm3, %v2866_v14 }
 0x193   : > { %2409 = vst.msk [vmem:[%s3814_s29 + $0x74] sm:$0xf] %vm2379_vm3, %v2864_v15 }
 0x194 PF: > { %s13_s14 = sadd.s32 1, %s3472_s14   ;;  %s3929_s12 = smov %s3468_s13 }
 0x195   : > { %p10_p5 = scmp.ge.s32.totalorder %s13_s14, 4   ;;  %s3930_s13 = smov %s3932_s15 }
 0x197   :  { %12 = sbr.rel (!%p10_p5) target bundleno = 2 (0x2), region = 67 }

// kernel: observer_forward.6
= control target key start
LH: loop header
LB: loop body
LE: loop exit
PB: predicated region body
PF: predicated region fallthrough
CT: control target
= control target key end

     0   :  { %s1823_s12 = smov 0   ;;  %s1825_s13 = smov 0   ;;  %s2246_s0 = inlined_call_operand.vmem [shape: bf16[2,2,1,80,160], index: 0, kind: input, shape index: {}]   ;;  %s2247_s1 = inlined_call_operand.vmem [shape: bf16[5,160,64], index: 1, kind: input, shape index: {}]   ;;  %s2248_s2 = inlined_call_operand.vmem [shape: f32[1,64], index: 2, kind: input, shape index: {}]   ;;  %s2249_s3 = inlined_call_operand.vmem [shape: bf16[2,64,64], index: 3, kind: output, shape index: {}]  }
   0x1   :  { %s1827_s14 = smov 0  }
   0x2 LB: > { %s25_s15 = sadd.s32 1, %s1796_s13  ;;  %p1418_p0 = scmp.ge.s32.totalorder %s1800_s14, 1  ;;  %s1800_s14 = sphi %s1827_s14, %s13_s14   ;;  %s1796_s13 = sphi %s1825_s13, %s2251_s13   ;;  %s1792_s12 = sphi %s1823_s12, %s2250_s12  }
   0x3   : > { %p27_p1 = scmp.ge.s32.totalorder %s25_s15, 2  ;;  %p157_p2 = scmp.lt.s32.totalorder %s1800_s14, 3 }
   0x5   : > { %s2253_s15 = smov (%p27_p1, %s25_s15), 0  ;;  %p158_p3 = pnand %p1418_p0, %p157_p2 }
   0x6   : > { %v1694_v0 = vld [vmem:[%s2247_s1 + $0x50] sm:$0xff] (!%p158_p3)   ;;  %v1802_v1 = vmov (!%p158_p3), 0   ;;  %v1695_v2 = vld [vmem:[%s2247_s1] sm:$0xff] (!%p158_p3)   ;;  %v1696_v3 = vld [vmem:[%s2247_s1 + $0x58] sm:$0xff] (!%p158_p3)   ;;  %p189_p4 = scmp.lt.s32.totalorder (!%p158_p3), %s1792_s12, 1  ;;  %vm363_vm0 = vcmask (!%p158_p3), 261120  }
   0x7   : > { %161 = sbr.rel (%p158_p3) target bundleno = 360 (0x168), region = 32  ;;  %376 = vmatprep.subr.bf16.mxu0 (!%p158_p3), %v1802_v1  ;;  %549 = vmatprep.subr.bf16.mxu1 (!%p158_p3), %v1802_v1  ;;  %v1697_v4 = vld [vmem:[%s2247_s1 + $0x8] sm:$0xff] (!%p158_p3)   ;;  %v1698_v5 = vld [vmem:[%s2247_s1 + $0x60] sm:$0xff] (!%p158_p3)   ;;  %v1699_v6 = vld [vmem:[%s2247_s1 + $0x10] sm:$0xff] (!%p158_p3)   ;;  %vm1315_vm3 = vcmask (!%p158_p3), 519168  }
   0x8   : > { %377 = vmatpush1.bf16.msra.mxu0 (!%p158_p3), %v1694_v0  ;;  %550 = vmatpush1.bf16.msra.mxu1 (!%p158_p3), %v1695_v2  ;;  %v1700_v7 = vld [vmem:[%s2247_s1 + $0x68] sm:$0xff] (!%p158_p3)   ;;  %v1701_v8 = vld [vmem:[%s2247_s1 + $0x18] sm:$0xff] (!%p158_p3)   ;;  %v1702_v9 = vld [vmem:[%s2247_s1 + $0x70] sm:$0xff] (!%p158_p3)  }
   0x9   : > { %378 = vmatprep.subr.bf16.mxu0 (!%p158_p3), %v1802_v1  ;;  %551 = vmatprep.subr.bf16.mxu1 (!%p158_p3), %v1802_v1  ;;  %v1703_v10 = vld [vmem:[%s2247_s1 + $0x20] sm:$0xff] (!%p158_p3)   ;;  %v1704_v11 = vld [vmem:[%s2247_s1 + $0x78] sm:$0xff] (!%p158_p3)   ;;  %v1705_v12 = vld [vmem:[%s2247_s1 + $0x28] sm:$0xff] (!%p158_p3)  }
   0xa   : > { %v1706_v18 = vld [vmem:[%s2247_s1 + $0x80] sm:$0xff] (!%p158_p3)   ;;  %v1707_v20 = vld [vmem:[%s2247_s1 + $0x30] sm:$0xff] (!%p158_p3)   ;;  %v1708_v21 = vld [vmem:[%s2247_s1 + $0x88] sm:$0xff] (!%p158_p3)  }
   0xb   : > { %v1709_v22 = vld [vmem:[%s2247_s1 + $0x38] sm:$0xff] (!%p158_p3)   ;;  %v1710_v23 = vld [vmem:[%s2247_s1 + $0x90] sm:$0xff] (!%p158_p3)   ;;  %v1711_v24 = vld [vmem:[%s2247_s1 + $0x40] sm:$0xff] (!%p158_p3)  }
   0xc   : > { %379 = vmatpush1.bf16.msra.mxu0 (!%p158_p3), %v1696_v3  ;;  %552 = vmatpush1.bf16.msra.mxu1 (!%p158_p3), %v1697_v4  ;;  %v1712_v25 = vld [vmem:[%s2247_s1 + $0x98] sm:$0xff] (!%p158_p3)   ;;  %v1713_v26 = vld [vmem:[%s2247_s1 + $0x48] sm:$0xff] (!%p158_p3)   ;;  %v1718_v31 = vld [vmem:[%s2247_s1 + $0xa0] sm:$0xff] (!%p158_p3)  }
   0xd   : > { %380 = vmatprep.subr.bf16.mxu0 (!%p158_p3), %v1802_v1  ;;  %553 = vmatprep.subr.bf16.mxu1 (!%p158_p3), %v1802_v1  ;;  %v1719_v34 = vld [vmem:[%s2247_s1 + $0xf0] sm:$0xff] (!%p158_p3)   ;;  %v1720_v36 = vld [vmem:[%s2247_s1 + $0xa8] sm:$0xff] (!%p158_p3)   ;;  %v1721_v38 = vld [vmem:[%s2247_s1 + $0xf8] sm:$0xff] (!%p158_p3)  }
   0xe   : > { %s2255_s12 = smov (!%p189_p4, %s1792_s12), 1  ;;  %v1722_v40 = vld [vmem:[%s2247_s1 + $0xb0] sm:$0xff]   ;;  %v1723_v46 = vld [vmem:[%s2247_s1 + $0x100] sm:$0xff]   ;;  %v1726_v49 = vld [vmem:[%s2247_s1 + $0xb8] sm:$0xff]  }
   0xf   : > { %s1668_s5 = smul.u32 160, %s2255_s12  ;;  %v1727_v50 = vld [vmem:[%s2247_s1 + $0x108] sm:$0xff]   ;;  %v1730_v52 = vld [vmem:[%s2247_s1 + $0xc0] sm:$0xff]   ;;  %v1731_v58 = vld [vmem:[%s2247_s1 + $0x110] sm:$0xff]  }
  0x10   : > { %381 = vmatpush1.bf16.msra.mxu0 %v1698_v5  ;;  %554 = vmatpush1.bf16.msra.mxu1 %v1699_v6  ;;  %v1734_v61 = vld [vmem:[%s2247_s1 + $0xc8] sm:$0xff]   ;;  %v1735_v62 = vld [vmem:[%s2247_s1 + $0x118] sm:$0xff]   ;;  %v1738_v0 = vld [vmem:[%s2247_s1 + $0xd0] sm:$0xff]  }
  0x11   : > { %382 = vmatprep.subr.bf16.mxu0 %v1802_v1  ;;  %555 = vmatprep.subr.bf16.mxu1 %v1802_v1  ;;  %s1887_s16 = scalar_lea.vmem %s2246_s0, %s1668_s5  ;;  %v1739_v3 = vld [vmem:[%s2247_s1 + $0x120] sm:$0xff]   ;;  %v1742_v6 = vld [vmem:[%s2247_s1 + $0xd8] sm:$0xff]   ;;  %s1639_s5 = sshll.u32 %s2255_s12, 5 }
  0x12   : > { %v1422_v13 = vld [vmem:[%s1887_s16 + $0x50] sm:$0xff]  ;;  %v1899_v14 = vld [vmem:[%s1887_s16 + $0x58] sm:$0xff]  ;;  %v209_v15 = vld [vmem:[%s1887_s16] sm:$0xff]  ;;  %s2217_s8 = scalar_lea.vmem %s2249_s3, %s1639_s5 }
  0x13   : > { %v1451_v16 = vcombine.high %v1422_v13, %v1899_v14  ;;  %v1904_v17 = vld [vmem:[%s1887_s16 + $0x8] sm:$0xff]  ;;  %v1942_v27 = vld [vmem:[%s1887_s16 + $0x60] sm:$0xff]  ;;  %v1450_v28 = vcombine.low %v1422_v13, %v1899_v14  ;;  %v1953_v32 = vld [vmem:[%s1887_s16 + $0x10] sm:$0xff] }
  0x14   : > { %383 = vmatpush1.bf16.msra.mxu0 %v1700_v7  ;;  %556 = vmatpush1.bf16.msra.mxu1 %v1701_v8  ;;  %v1473_v19 = vcombine.high %v209_v15, %v1904_v17  ;;  %v1946_v29 = vld [vmem:[%s1887_s16 + $0x68] sm:$0xff]  ;;  %v1472_v30 = vcombine.low %v209_v15, %v1904_v17  ;;  %v1956_v33 = vld [vmem:[%s1887_s16 + $0x18] sm:$0xff]  ;;  %v1977_v39 = vld [vmem:[%s1887_s16 + $0x70] sm:$0xff]  ;;  %v1515_v4 = vcombine.high %v1904_v17, %v1953_v32 }
  0x15   : > { %384 = vmatprep.subr.bf16.mxu0 %v1802_v1  ;;  %557 = vmatprep.subr.bf16.mxu1 %v1802_v1  ;;  %v1453_v35 = vcombine.high %v1942_v27, %v1946_v29  ;;  %v1970_v37 = vcombine.high %v1953_v32, %v1956_v33  ;;  %v1985_v41 = vld [vmem:[%s1887_s16 + $0x78] sm:$0xff]  ;;  %v1452_v42 = vcombine.low %v1942_v27, %v1946_v29  ;;  %v1992_v43 = vld [vmem:[%s1887_s16 + $0x20] sm:$0xff]  ;;  %v1999_v45 = vld [vmem:[%s1887_s16 + $0x28] sm:$0xff] }
  0x16   : > { %1468 = vmatprep.mubr.msk.bf16.mxu0 %vm363_vm0, %v1451_v16  ;;  %1490 = vmatprep.mubr.msk.bf16.mxu1 %vm363_vm0, %v1473_v19  ;;  %v1996_v44 = vcombine.low %v1953_v32, %v1956_v33  ;;  %v1455_v47 = vcombine.high %v1977_v39, %v1985_v41  ;;  %v2010_v48 = vcombine.high %v1992_v43, %v1999_v45  ;;  %v2021_v51 = vld [vmem:[%s1887_s16 + $0x80] sm:$0xff]  ;;  %v2029_v53 = vld [vmem:[%s1887_s16 + $0x88] sm:$0xff]  ;;  %v2036_v55 = vld [vmem:[%s1887_s16 + $0x30] sm:$0xff] }
  0x17   : > { %v1454_v54 = vcombine.low %v1977_v39, %v1985_v41  ;;  %v2040_v56 = vcombine.low %v1992_v43, %v1999_v45  ;;  %v2043_v57 = vld [vmem:[%s1887_s16 + $0x38] sm:$0xff]  ;;  %v1457_v59 = vcombine.high %v2021_v51, %v2029_v53  ;;  %v1456_v63 = vcombine.low %v2021_v51, %v2029_v53  ;;  %v1743_v7 = vld [vmem:[%s2247_s1 + $0x128] sm:$0xff]   ;;  %v1746_v8 = vld [vmem:[%s2247_s1 + $0xe0] sm:$0xff]  }
  0x18   : > { %385 = vmatpush1.bf16.msra.mxu0 %v1702_v9  ;;  %558 = vmatpush1.bf16.msra.mxu1 %v1703_v10  ;;  %v2054_v60 = vcombine.high %v2036_v55, %v2043_v57  ;;  %v2075_v2 = vcombine.low %v2036_v55, %v2043_v57  ;;  %v1565_v5 = vcombine.high %v1899_v14, %v1942_v27  ;;  %v1747_v9 = vld [vmem:[%s2247_s1 + $0x130] sm:$0xff]   ;;  %v1748_v10 = vld [vmem:[%s2247_s1 + $0xe8] sm:$0xff]   ;;  %v1754_v15 = vld [vmem:[%s2247_s1 + $0x140] sm:$0xff]  }
  0x19   : > { %386 = vmatprep.subr.bf16.mxu0 %v1802_v1  ;;  %559 = vmatprep.subr.bf16.mxu1 %v1802_v1  ;;  %v1564_v13 = vcombine.low %v1899_v14, %v1942_v27  ;;  %v1517_v16 = vcombine.high %v1956_v33, %v1992_v43  ;;  %v1755_v14 = vld [vmem:[%s2247_s1 + $0x148] sm:$0xff]   ;;  %v1759_v19 = vld [vmem:[%s2247_s1 + $0x150] sm:$0xff]   ;;  %v1568_v27 = vcombine.low %v1985_v41, %v2021_v51 }
  0x1c   : > { %387 = vmatpush1.bf16.msra.mxu0 %v1704_v11  ;;  %560 = vmatpush1.bf16.msra.mxu1 %v1705_v12  ;;  %v1749_v11 = vld [vmem:[%s2247_s1 + $0x138] sm:$0xff]   ;;  %v1514_v12 = vcombine.low %v1904_v17, %v1953_v32  ;;  %v1567_v17 = vcombine.high %v1946_v29, %v1977_v39 }
  0x1d   : > { %388 = vmatprep.subr.bf16.mxu0 %v1802_v1  ;;  %561 = vmatprep.subr.bf16.mxu1 %v1802_v1 }
  0x20   : > { %389 = vmatpush1.bf16.msra.mxu0 %v1706_v18  ;;  %562 = vmatpush1.bf16.msra.mxu1 %v1707_v20  ;;  %v1516_v18 = vcombine.low %v1956_v33, %v1992_v43  ;;  %v1566_v20 = vcombine.low %v1946_v29, %v1977_v39  ;;  %v1771_v33 = vld [vmem:[%s2247_s1 + $0x170] sm:$0xff]  }
  0x21   : > { %390 = vmatprep.subr.bf16.mxu0 %v1802_v1  ;;  %563 = vmatprep.subr.bf16.mxu1 %v1802_v1 }
  0x24   : > { %391 = vmatpush1.bf16.msra.mxu0 %v1708_v21  ;;  %564 = vmatpush1.bf16.msra.mxu1 %v1709_v22  ;;  %v1519_v21 = vcombine.high %v1999_v45, %v2036_v55  ;;  %v1569_v22 = vcombine.high %v1985_v41, %v2021_v51 }
  0x25   : > { %392 = vmatprep.subr.bf16.mxu0 %v1802_v1  ;;  %565 = vmatprep.subr.bf16.mxu1 %v1802_v1 }
  0x28   : > { %393 = vmatpush1.bf16.msra.mxu0 %v1710_v23  ;;  %566 = vmatpush1.bf16.msra.mxu1 %v1711_v24  ;;  %v1761_v23 = vld [vmem:[%s2247_s1 + $0x158] sm:$0xff]   ;;  %v1518_v24 = vcombine.low %v1999_v45, %v2036_v55 }
  0x29   : > { %394 = vmatprep.subr.bf16.mxu0 %v1802_v1  ;;  %567 = vmatprep.subr.bf16.mxu1 %v1802_v1 }
  0x2c   : > { %395 = vmatpush1.bf16.msra.mxu0 %v1712_v25  ;;  %568 = vmatpush1.bf16.msra.mxu1 %v1713_v26  ;;  %v621_v25 = vld [vmem:[%s1887_s16 + $0x40] sm:$0xff] }
  0x2d   : > { %751 = vmatprep.subr.bf16.mxu0 %v1802_v1  ;;  %961 = vmatprep.subr.bf16.mxu1 %v1802_v1  ;;  %v1765_v26 = vld [vmem:[%s2247_s1 + $0x160] sm:$0xff]   ;;  %v1521_v29 = vcombine.high %v2043_v57, %v621_v25  ;;  %v1520_v32 = vcombine.low %v2043_v57, %v621_v25 }
  0x2f   : > { %409 = vmatmul.mubr.bf16.vlgmr.msra.gmra.mrb[0].mxu0 %v1450_v28  ;;  %582 = vmatmul.mubr.bf16.vlgmr.msra.gmra.mrb[0].mxu1 %v1472_v30  ;;  %v1543_v28 = vld [vmem:[%s1887_s16 + $0x90] sm:$0xff] }
  0x30   : > { %752 = vmatpush1.bf16.msra.mxu0 %v1718_v31  ;;  %962 = vmatpush1.bf16.msra.mxu1 %v1719_v34  ;;  %v1571_v30 = vcombine.high %v2029_v53, %v1543_v28  ;;  %v1767_v31 = vld [vmem:[%s2247_s1 + $0x168] sm:$0xff]   ;;  %v1570_v34 = vcombine.low %v2029_v53, %v1543_v28 }
  0x31   : > { %753 = vmatprep.subr.bf16.mxu0 %v1802_v1  ;;  %963 = vmatprep.subr.bf16.mxu1 %v1802_v1 }
  0x32   : > { %1469 = vmatprep.mubr.msk.bf16.mxu0 %vm363_vm0, %v1453_v35  ;;  %1491 = vmatprep.mubr.msk.bf16.mxu1 %vm363_vm0, %v1970_v37  ;;  %v1773_v35 = vld [vmem:[%s2247_s1 + $0x178] sm:$0xff]  }
  0x34   : > { %754 = vmatpush1.bf16.msra.mxu0 %v1720_v36  ;;  %964 = vmatpush1.bf16.msra.mxu1 %v1721_v38  ;;  %v1774_v36 = vld [vmem:[%s2247_s1 + $0x180] sm:$0xff]   ;;  %v1775_v38 = vld [vmem:[%s2247_s1 + $0x188] sm:$0xff]  }
  0x35   : > { %755 = vmatprep.subr.bf16.mxu0 %v1802_v1  ;;  %965 = vmatprep.subr.bf16.mxu1 %v1802_v1 }
  0x37   : > { %417 = vmatmul.mubr.bf16.gmra.mrb[4].mxu0 %v1452_v42  ;;  %590 = vmatmul.mubr.bf16.gmra.mrb[4].mxu1 %v1996_v44 }
  0x38   : > { %756 = vmatpush1.bf16.msra.mxu0 %v1722_v40  ;;  %966 = vmatpush1.bf16.msra.mxu1 %v1723_v46 }
  0x39   : > { %757 = vmatprep.subr.bf16.mxu0 %v1802_v1  ;;  %967 = vmatprep.subr.bf16.mxu1 %v1802_v1 }
  0x3a   : > { %1470 = vmatprep.mubr.msk.bf16.mxu0 %vm363_vm0, %v1455_v47  ;;  %1492 = vmatprep.mubr.msk.bf16.mxu1 %vm363_vm0, %v2010_v48 }
  0x3c   : > { %758 = vmatpush1.bf16.msra.mxu0 %v1726_v49  ;;  %968 = vmatpush1.bf16.msra.mxu1 %v1727_v50 }
  0x3d   : > { %759 = vmatprep.subr.bf16.mxu0 %v1802_v1  ;;  %969 = vmatprep.subr.bf16.mxu1 %v1802_v1 }
  0x3f   : > { %425 = vmatmul.mubr.bf16.gmra.mrb[8].mxu0 %v1454_v54  ;;  %598 = vmatmul.mubr.bf16.gmra.mrb[8].mxu1 %v2040_v56 }
  0x40   : > { %760 = vmatpush1.bf16.msra.mxu0 %v1730_v52  ;;  %970 = vmatpush1.bf16.msra.mxu1 %v1731_v58 }
  0x41   : > { %761 = vmatprep.subr.bf16.mxu0 %v1802_v1  ;;  %971 = vmatprep.subr.bf16.mxu1 %v1802_v1 }
  0x42   : > { %1471 = vmatprep.mubr.msk.bf16.mxu0 %vm363_vm0, %v1457_v59  ;;  %1493 = vmatprep.mubr.msk.bf16.mxu1 %vm363_vm0, %v2054_v60 }
  0x44   : > { %762 = vmatpush1.bf16.msra.mxu0 %v1734_v61  ;;  %972 = vmatpush1.bf16.msra.mxu1 %v1735_v62 }
  0x45   : > { %763 = vmatprep.subr.bf16.mxu0 %v1802_v1  ;;  %973 = vmatprep.subr.bf16.mxu1 %v1802_v1 }
  0x47   : > { %433 = vmatmul.mubr.bf16.gmra.mrb[12].mxu0 %v1456_v63  ;;  %606 = vmatmul.mubr.bf16.gmra.mrb[12].mxu1 %v2075_v2 }
  0x48   : > { %764 = vmatpush1.bf16.msra.mxu0 %v1738_v0  ;;  %974 = vmatpush1.bf16.msra.mxu1 %v1739_v3 }
  0x49   : > { %765 = vmatprep.subr.bf16.mxu0 %v1802_v1  ;;  %975 = vmatprep.subr.bf16.mxu1 %v1802_v1 }
  0x4a   : > { %1532 = vmatprep.mubr.msk.bf16.mxu0 %vm363_vm0, %v1515_v4  ;;  %1582 = vmatprep.mubr.msk.bf16.mxu1 %vm363_vm0, %v1565_v5 }
  0x4c   : > { %766 = vmatpush1.bf16.msra.mxu0 %v1742_v6  ;;  %976 = vmatpush1.bf16.msra.mxu1 %v1743_v7 }
  0x4d   : > { %767 = vmatprep.subr.bf16.mxu0 %v1802_v1  ;;  %977 = vmatprep.subr.bf16.mxu1 %v1802_v1 }
  0x50   : > { %768 = vmatpush1.bf16.msra.mxu0 %v1746_v8  ;;  %978 = vmatpush1.bf16.msra.mxu1 %v1747_v9 }
  0x51   : > { %769 = vmatprep.subr.bf16.mxu0 %v1802_v1  ;;  %979 = vmatprep.subr.bf16.mxu1 %v1802_v1 }
  0x54   : > { %770 = vmatpush1.bf16.msra.mxu0 %v1748_v10  ;;  %980 = vmatpush1.bf16.msra.mxu1 %v1749_v11 }
  0x55   : > { %1171 = vmatprep.subr.bf16.mxu0 %v1802_v1  ;;  %1648 = vmatprep.subr.bf16.mxu1 %v1802_v1 }
  0x57   : > { %784 = vmatmul.mubr.bf16.vlgmr.msra.gmra.mrb[16].mxu0 %v1514_v12  ;;  %994 = vmatmul.mubr.bf16.vlgmr.msra.gmra.mrb[16].mxu1 %v1564_v13 }
  0x58   : > { %1172 = vmatpush1.bf16.msra.mxu0 %v1754_v15  ;;  %1658 = vmatpush1.bf16.msra.mxu1 %v1754_v15 }
  0x59   : > { %1173 = vmatprep.subr.bf16.mxu0 %v1802_v1  ;;  %1649 = vmatprep.subr.bf16.mxu1 %v1802_v1 }
  0x5a   : > { %1533 = vmatprep.mubr.msk.bf16.mxu0 %vm363_vm0, %v1517_v16  ;;  %1583 = vmatprep.mubr.msk.bf16.mxu1 %vm363_vm0, %v1567_v17 }
  0x5c   : > { %1174 = vmatpush1.bf16.msra.mxu0 %v1755_v14  ;;  %1659 = vmatpush1.bf16.msra.mxu1 %v1755_v14 }
  0x5d   : > { %1175 = vmatprep.subr.bf16.mxu0 %v1802_v1  ;;  %1650 = vmatprep.subr.bf16.mxu1 %v1802_v1 }
  0x5f   : > { %792 = vmatmul.mubr.bf16.gmra.mrb[20].mxu0 %v1516_v18  ;;  %1002 = vmatmul.mubr.bf16.gmra.mrb[20].mxu1 %v1566_v20 }
  0x60   : > { %1176 = vmatpush1.bf16.msra.mxu0 %v1759_v19  ;;  %1660 = vmatpush1.bf16.msra.mxu1 %v1759_v19 }
  0x61   : > { %1177 = vmatprep.subr.bf16.mxu0 %v1802_v1  ;;  %1651 = vmatprep.subr.bf16.mxu1 %v1802_v1 }
  0x62   : > { %1534 = vmatprep.mubr.msk.bf16.mxu0 %vm363_vm0, %v1519_v21  ;;  %1584 = vmatprep.mubr.msk.bf16.mxu1 %vm363_vm0, %v1569_v22 }
  0x64   : > { %1178 = vmatpush1.bf16.msra.mxu0 %v1761_v23  ;;  %1661 = vmatpush1.bf16.msra.mxu1 %v1761_v23 }
  0x65   : > { %1179 = vmatprep.subr.bf16.mxu0 %v1802_v1  ;;  %1652 = vmatprep.subr.bf16.mxu1 %v1802_v1 }
  0x67   : > { %800 = vmatmul.mubr.bf16.gmra.mrb[24].mxu0 %v1518_v24  ;;  %1010 = vmatmul.mubr.bf16.gmra.mrb[24].mxu1 %v1568_v27 }
  0x68   : > { %1180 = vmatpush1.bf16.msra.mxu0 %v1765_v26  ;;  %1662 = vmatpush1.bf16.msra.mxu1 %v1765_v26 }
  0x69   : > { %1181 = vmatprep.subr.bf16.mxu0 %v1802_v1  ;;  %1653 = vmatprep.subr.bf16.mxu1 %v1802_v1 }
  0x6a   : > { %1535 = vmatprep.mubr.msk.bf16.mxu0 %vm363_vm0, %v1521_v29  ;;  %1585 = vmatprep.mubr.msk.bf16.mxu1 %vm363_vm0, %v1571_v30 }
  0x6c   : > { %1182 = vmatpush1.bf16.msra.mxu0 %v1767_v31  ;;  %1663 = vmatpush1.bf16.msra.mxu1 %v1767_v31 }
  0x6d   : > { %1183 = vmatprep.subr.bf16.mxu0 %v1802_v1  ;;  %1654 = vmatprep.subr.bf16.mxu1 %v1802_v1 }
  0x6f   : > { %808 = vmatmul.mubr.bf16.gmra.mrb[28].mxu0 %v1520_v32  ;;  %1018 = vmatmul.mubr.bf16.gmra.mrb[28].mxu1 %v1570_v34 }
  0x70   : > { %1184 = vmatpush1.bf16.msra.mxu0 %v1771_v33  ;;  %1664 = vmatpush1.bf16.msra.mxu1 %v1771_v33 }
  0x71   : > { %1185 = vmatprep.subr.bf16.mxu0 %v1802_v1  ;;  %1655 = vmatprep.subr.bf16.mxu1 %v1802_v1 }
  0x72   : > { %1624 = vmatprep.mubr.msk.bf16.mxu0 %vm363_vm0, %v1970_v37  ;;  %1626 = vmatprep.mubr.msk.bf16.mxu1 %vm363_vm0, %v2054_v60  ;;  %v1041_v37 = vld [vmem:[%s1887_s16 + $0x48] sm:$0xff] }
  0x73   : > { %v1613_v39 = vcombine.high %v621_v25, %v1041_v37  ;;  %v1612_v40 = vcombine.low %v621_v25, %v1041_v37 }
  0x74   : > { %1186 = vmatpush1.bf16.msra.mxu0 %v1773_v35  ;;  %1665 = vmatpush1.bf16.msra.mxu1 %v1773_v35 }
  0x75   : > { %1187 = vmatprep.subr.bf16.mxu0 %v1802_v1  ;;  %1656 = vmatprep.subr.bf16.mxu1 %v1802_v1 }
  0x78   : > { %1188 = vmatpush1.bf16.msra.mxu0 %v1774_v36  ;;  %1666 = vmatpush1.bf16.msra.mxu1 %v1774_v36 }
  0x79   : > { %1189 = vmatprep.subr.bf16.mxu0 %v1802_v1  ;;  %1657 = vmatprep.subr.bf16.mxu1 %v1802_v1 }
  0x7c   : > { %1190 = vmatpush1.bf16.msra.mxu0 %v1775_v38  ;;  %1667 = vmatpush1.bf16.msra.mxu1 %v1775_v38 }
  0x7f   : > { %1204 = vmatmul.mubr.bf16.vlgmr.msra.gmra.mrb[32].mxu0 %v1996_v44  ;;  %1220 = vmatmul.mubr.bf16.vlgmr.msra.gmra.mrb[32].mxu1 %v2075_v2 }
  0x80   : > { %1625 = vmatprep.mubr.msk.bf16.mxu0 %vm363_vm0, %v2010_v48  ;;  %1627 = vmatprep.mubr.msk.bf16.mxu1 %vm363_vm0, %v1613_v39 }
  0x87   : > { %1212 = vmatmul.mubr.bf16.gmra.mrb[36].mxu0 %v2040_v56  ;;  %1228 = vmatmul.mubr.bf16.gmra.mrb[36].mxu1 %v1612_v40 }
 0x102   : > { %v410_v41 = vpop.f32.mrb[0].mxu0  ;;  %v583_v42 = vpop.f32.mrb[0].mxu1 }
 0x103   : > { %v412_v1 = vpop.f32.mrb[1].mxu0  ;;  %v584_v43 = vadd.f32 %v583_v42, %v410_v41  ;;  %v585_v45 = vpop.f32.mrb[1].mxu1 }
 0x104   : > { %v413_v46 = vpop.f32.mrb[2].mxu0  ;;  %v586_v47 = vpop.f32.mrb[2].mxu1 }
 0x105   : > { %v415_v49 = vpop.f32.mrb[3].mxu0  ;;  %v587_v44 = vadd.f32 %v586_v47, %v413_v46  ;;  %v588_v50 = vpop.f32.mrb[3].mxu1 }
 0x10a   : > { %v418_v51 = vpop.f32.mrb[4].mxu0  ;;  %v591_v52 = vpop.f32.mrb[4].mxu1 }
 0x10b   : > { %v420_v53 = vpop.f32.mrb[5].mxu0  ;;  %v592_v48 = vadd.f32 %v591_v52, %v418_v51  ;;  %v593_v54 = vpop.f32.mrb[5].mxu1 }
 0x10c   : > { %v421_v55 = vpop.f32.mrb[6].mxu0  ;;  %v594_v57 = vpop.f32.mrb[6].mxu1 }
 0x10d   : > { %v423_v58 = vpop.f32.mrb[7].mxu0  ;;  %v595_v56 = vadd.f32 %v594_v57, %v421_v55  ;;  %v596_v59 = vpop.f32.mrb[7].mxu1 }
 0x112   : > { %v426_v60 = vpop.f32.mrb[8].mxu0  ;;  %v599_v61 = vpop.f32.mrb[8].mxu1 }
 0x113   : > { %v428_v62 = vpop.f32.mrb[9].mxu0  ;;  %v600_v63 = vadd.f32 %v599_v61, %v426_v60  ;;  %v601_v0 = vpop.f32.mrb[9].mxu1 }
 0x114   : > { %v429_v2 = vpop.f32.mrb[10].mxu0  ;;  %v602_v3 = vpop.f32.mrb[10].mxu1 }
 0x115   : > { %v431_v4 = vpop.f32.mrb[11].mxu0  ;;  %v603_v5 = vadd.f32 %v602_v3, %v429_v2  ;;  %v604_v6 = vpop.f32.mrb[11].mxu1  ;;  %v1628_v2 = vld [vmem:[%s2248_s2] ss:$0 sm:$0xff] }
 0x11a   : > { %v434_v7 = vpop.f32.mrb[12].mxu0  ;;  %v607_v8 = vpop.f32.mrb[12].mxu1 }
 0x11b   : > { %v436_v9 = vpop.f32.mrb[13].mxu0  ;;  %v608_v10 = vadd.f32 %v607_v8, %v434_v7  ;;  %v609_v11 = vpop.f32.mrb[13].mxu1 }
 0x11c   : > { %v437_v12 = vpop.f32.mrb[14].mxu0  ;;  %v610_v13 = vpop.f32.mrb[14].mxu1 }
 0x11d   : > { %v439_v15 = vpop.f32.mrb[15].mxu0  ;;  %v611_v16 = vadd.f32 %v610_v13, %v437_v12  ;;  %v612_v17 = vpop.f32.mrb[15].mxu1 }
 0x12a   : > { %v785_v14 = vpop.f32.mrb[16].mxu0  ;;  %v995_v19 = vpop.f32.mrb[16].mxu1 }
 0x12b   : > { %v816_v18 = vadd.f32 %v785_v14, %v584_v43  ;;  %v787_v20 = vpop.f32.mrb[17].mxu0  ;;  %v997_v21 = vpop.f32.mrb[17].mxu1 }
 0x12c   : > { %v788_v22 = vpop.f32.mrb[18].mxu0  ;;  %v998_v25 = vpop.f32.mrb[18].mxu1 }
 0x12d   : > { %v1026_v23 = vadd.f32 %v995_v19, %v816_v18  ;;  %v817_v24 = vadd.f32 %v788_v22, %v587_v44  ;;  %v790_v26 = vpop.f32.mrb[19].mxu0  ;;  %v1000_v27 = vpop.f32.mrb[19].mxu1 }
 0x12f   : > { %v1027_v28 = vadd.f32 %v998_v25, %v817_v24 }
 0x132   : > { %v793_v29 = vpop.f32.mrb[20].mxu0  ;;  %v1003_v32 = vpop.f32.mrb[20].mxu1 }
 0x133   : > { %v818_v30 = vadd.f32 %v793_v29, %v592_v48  ;;  %v795_v31 = vpop.f32.mrb[21].mxu0  ;;  %v1005_v34 = vpop.f32.mrb[21].mxu1 }
 0x134   : > { %v796_v33 = vpop.f32.mrb[22].mxu0  ;;  %v1006_v38 = vpop.f32.mrb[22].mxu1 }
 0x135   : > { %v819_v35 = vadd.f32 %v796_v33, %v595_v56  ;;  %v2206_v36 = vadd.f32 %v1003_v32, %v818_v30  ;;  %v798_v37 = vpop.f32.mrb[23].mxu0  ;;  %v1008_v39 = vpop.f32.mrb[23].mxu1 }
 0x137   : > { %v2208_v40 = vadd.f32 %v1006_v38, %v819_v35 }
 0x13a   : > { %v801_v41 = vpop.f32.mrb[24].mxu0  ;;  %v1011_v43 = vpop.f32.mrb[24].mxu1 }
 0x13b   : > { %v820_v42 = vadd.f32 %v801_v41, %v600_v63  ;;  %v803_v1 = vpop.f32.mrb[25].mxu0  ;;  %v1013_v46 = vpop.f32.mrb[25].mxu1 }
 0x13c   : > { %v804_v45 = vpop.f32.mrb[26].mxu0  ;;  %v1014_v44 = vpop.f32.mrb[26].mxu1 }
 0x13d   : > { %v821_v47 = vadd.f32 %v804_v45, %v603_v5  ;;  %v1030_v49 = vadd.f32 %v1011_v43, %v820_v42  ;;  %v806_v50 = vpop.f32.mrb[27].mxu0  ;;  %v1016_v51 = vpop.f32.mrb[27].mxu1 }
 0x13f   : > { %v1031_v52 = vadd.f32 %v1014_v44, %v821_v47 }
 0x142   : > { %v809_v53 = vpop.f32.mrb[28].mxu0  ;;  %v1019_v55 = vpop.f32.mrb[28].mxu1 }
 0x143   : > { %v822_v48 = vadd.f32 %v809_v53, %v608_v10  ;;  %v811_v54 = vpop.f32.mrb[29].mxu0  ;;  %v1021_v58 = vpop.f32.mrb[29].mxu1 }
 0x144   : > { %v812_v57 = vpop.f32.mrb[30].mxu0  ;;  %v1022_v60 = vpop.f32.mrb[30].mxu1 }
 0x145   : > { %v823_v56 = vadd.f32 %v812_v57, %v611_v16  ;;  %v1032_v59 = vadd.f32 %v1019_v55, %v822_v48  ;;  %v814_v61 = vpop.f32.mrb[31].mxu0  ;;  %v1024_v62 = vpop.f32.mrb[31].mxu1 }
 0x147   : > { %v1033_v63 = vadd.f32 %v1022_v60, %v823_v56 }
 0x152   : > { %v1205_v0 = vpop.f32.mrb[32].mxu0  ;;  %v1221_v4 = vpop.f32.mrb[32].mxu1 }
 0x153   : > { %v1236_v3 = vadd.f32 %v1205_v0, %v1026_v23  ;;  %v1207_v5 = vpop.f32.mrb[33].mxu0  ;;  %v1240_v6 = vadd.f32 %v1221_v4, %v1030_v49  ;;  %v1223_v7 = vpop.f32.mrb[33].mxu1 }
 0x154   : > { %v1208_v8 = vpop.f32.mrb[34].mxu0  ;;  %v1224_v11 = vpop.f32.mrb[34].mxu1 }
 0x155   : > { %v1251_v9 = vadd.f32 %v1628_v2, %v1236_v3  ;;  %v1237_v10 = vadd.f32 %v1208_v8, %v1027_v28  ;;  %v1210_v12 = vpop.f32.mrb[35].mxu0  ;;  %v1255_v13 = vadd.f32 %v1628_v2, %v1240_v6  ;;  %v1241_v15 = vadd.f32 %v1224_v11, %v1031_v52  ;;  %v1226_v16 = vpop.f32.mrb[35].mxu1 }
 0x157   : > { %vm1259_vm1 = vcmp.ge.f32.partialorder %v1251_v9, 0.0  ;;  %v1267_v17 = vmul.f32 0.01, %v1251_v9  ;;  %v1252_v14 = vadd.f32 %v1628_v2, %v1237_v10  ;;  %vm1263_vm2 = vcmp.ge.f32.partialorder %v1255_v13, 0.0 }
 0x158   : > { %v1271_v18 = vmul.f32 0.01, %v1255_v13  ;;  %v1256_v19 = vadd.f32 %v1628_v2, %v1241_v15 }
 0x159   : > { %v1275_v20 = vsel %vm1259_vm1, %v1251_v9, %v1267_v17  ;;  %vm1260_vm4 = vcmp.ge.f32.partialorder %v1252_v14, 0.0  ;;  %v1268_v21 = vmul.f32 0.01, %v1252_v14 }
 0x15a   : > { %v1640_v22 = vpack.c.bf16 %v1275_v20, %v1275_v20  ;;  %v1279_v23 = vsel %vm1263_vm2, %v1255_v13, %v1271_v18  ;;  %vm1264_vm5 = vcmp.ge.f32.partialorder %v1256_v19, 0.0  ;;  %v1272_v24 = vmul.f32 0.01, %v1256_v19  ;;  %v1213_v25 = vpop.f32.mrb[36].mxu0  ;;  %v1229_v29 = vpop.f32.mrb[36].mxu1 }
 0x15b   : > { %v1644_v26 = vpack.c.bf16 %v1279_v23, %v1279_v23  ;;  %v1276_v27 = vsel %vm1260_vm4, %v1252_v14, %v1268_v21  ;;  %v1238_v28 = vadd.f32 %v1213_v25, %v2206_v36  ;;  %v1215_v30 = vpop.f32.mrb[37].mxu0  ;;  %v1242_v33 = vadd.f32 %v1229_v29, %v1032_v59  ;;  %v1231_v34 = vpop.f32.mrb[37].mxu1 }
 0x15c   : > { %1316 = vst.msk [vmem:[%s2217_s8] sm:$0xf] %vm1315_vm3, %v1640_v22  ;;  %v1641_v31 = vpack.c.bf16 %v1276_v27, %v1276_v27  ;;  %v1280_v32 = vsel %vm1264_vm5, %v1256_v19, %v1272_v24  ;;  %v1216_v35 = vpop.f32.mrb[38].mxu0  ;;  %v1232_v41 = vpop.f32.mrb[38].mxu1 }
 0x15d   : > { %1320 = vst.msk [vmem:[%s2217_s8 + $0x10] sm:$0xf] %vm1315_vm3, %v1644_v26  ;;  %v1645_v38 = vpack.c.bf16 %v1280_v32, %v1280_v32  ;;  %v1253_v37 = vadd.f32 %v1628_v2, %v1238_v28  ;;  %v1239_v39 = vadd.f32 %v1216_v35, %v2208_v40  ;;  %v1218_v42 = vpop.f32.mrb[39].mxu0  ;;  %v1257_v36 = vadd.f32 %v1628_v2, %v1242_v33  ;;  %v1234_v43 = vpop.f32.mrb[39].mxu1 }
 0x15e   : > { %1317 = vst.msk [vmem:[%s2217_s8 + $0x4] sm:$0xf] %vm1315_vm3, %v1641_v31  ;;  %v1243_v1 = vadd.f32 %v1232_v41, %v1033_v63 }
 0x15f   : > { %1321 = vst.msk [vmem:[%s2217_s8 + $0x14] sm:$0xf] %vm1315_vm3, %v1645_v38  ;;  %vm1261_vm6 = vcmp.ge.f32.partialorder %v1253_v37, 0.0  ;;  %v1269_v45 = vmul.f32 0.01, %v1253_v37  ;;  %v1254_v46 = vadd.f32 %v1628_v2, %v1239_v39  ;;  %vm1265_vm7 = vcmp.ge.f32.partialorder %v1257_v36, 0.0 }
 0x160   : > { %v1273_v47 = vmul.f32 0.01, %v1257_v36  ;;  %v1258_v49 = vadd.f32 %v1628_v2, %v1243_v1 }
 0x161   : > { %v1277_v40 = vsel %vm1261_vm6, %v1253_v37, %v1269_v45  ;;  %vm1262_vm8 = vcmp.ge.f32.partialorder %v1254_v46, 0.0  ;;  %v1270_v44 = vmul.f32 0.01, %v1254_v46 }
 0x162   : > { %v1642_v50 = vpack.c.bf16 %v1277_v40, %v1277_v40  ;;  %v1281_v51 = vsel %vm1265_vm7, %v1257_v36, %v1273_v47  ;;  %vm1266_vm9 = vcmp.ge.f32.partialorder %v1258_v49, 0.0  ;;  %v1274_v52 = vmul.f32 0.01, %v1258_v49 }
 0x163   : > { %v1646_v53 = vpack.c.bf16 %v1281_v51, %v1281_v51  ;;  %v1278_v48 = vsel %vm1262_vm8, %v1254_v46, %v1270_v44 }
 0x164   : > { %1318 = vst.msk [vmem:[%s2217_s8 + $0x8] sm:$0xf] %vm1315_vm3, %v1642_v50  ;;  %v1643_v54 = vpack.c.bf16 %v1278_v48, %v1278_v48  ;;  %v1282_v55 = vsel %vm1266_vm9, %v1258_v49, %v1274_v52 }
 0x165   : > { %1322 = vst.msk [vmem:[%s2217_s8 + $0x18] sm:$0xf] %vm1315_vm3, %v1646_v53  ;;  %v1647_v57 = vpack.c.bf16 %v1282_v55, %v1282_v55 }
 0x166   : > { %1319 = vst.msk [vmem:[%s2217_s8 + $0xc] sm:$0xf] %vm1315_vm3, %v1643_v54 }
 0x167   : > { %1323 = vst.msk [vmem:[%s2217_s8 + $0x1c] sm:$0xf] %vm1315_vm3, %v1647_v57 }
 0x168 PF: > { %s13_s14 = sadd.s32 1, %s1800_s14   ;;  %s2250_s12 = smov %s1796_s13 }
 0x169   : > { %p10_p5 = scmp.ge.s32.totalorder %s13_s14, 4   ;;  %s2251_s13 = smov %s2253_s15 }
 0x16b   :  { %12 = sbr.rel (!%p10_p5) target bundleno = 2 (0x2), region = 67 }

// kernel: observer_forward.7
= control target key start
LH: loop header
LB: loop body
LE: loop exit
PB: predicated region body
PF: predicated region fallthrough
CT: control target
= control target key end

     0   :  { %s2667_s26 = smov 0   ;;  %s2669_s27 = smov 0   ;;  %s2900_s0 = inlined_call_operand.vmem [shape: bf16[2,4096], index: 0, kind: input, shape index: {}]   ;;  %s2901_s1 = inlined_call_operand.vmem [shape: bf16[4096,64], index: 1, kind: input, shape index: {}]   ;;  %s2902_s2 = inlined_call_operand.vmem [shape: f32[1,64], index: 2, kind: input, shape index: {}]   ;;  %s2903_s3 = inlined_call_operand.vmem [shape: f32[64,8], index: 3, kind: input, shape index: {}]   ;;  %s2904_s4 = inlined_call_operand.vmem [shape: f32[1,8], index: 4, kind: input, shape index: {}]   ;;  %s2905_s5 = inlined_call_operand.vmem [shape: f32[8,1], index: 5, kind: input, shape index: {}]   ;;  %s2906_s6 = inlined_call_operand.<no memory space> [shape: f32[1,1], index: 6, kind: input, shape index: {}]   ;;  %s2907_s7 = inlined_call_operand.vmem [shape: f32[2,1], index: 7, kind: output, shape index: {}]  }
   0x1   :  { %v12_v0 = vstv %s2906_s6  ;;  %s2671_s28 = smov 0  }
   0x2   :  { %13 = vst [vmem:[#allocation3] sm:$0x1] %v12_v0 }
   0x3 LB: > { %s28_s6 = sadd.s32 1, %s2613_s27  ;;  %p2071_p0 = scmp.ge.s32.totalorder %s2617_s28, 1  ;;  %s2617_s28 = sphi %s2671_s28, %s19_s28   ;;  %s2613_s27 = sphi %s2669_s27, %s2909_s27   ;;  %s2609_s26 = sphi %s2667_s26, %s2908_s26  }
   0x4   : > { %p29_p1 = scmp.ge.s32.totalorder %s28_s6, 2  ;;  %p268_p2 = scmp.lt.s32.totalorder %s2617_s28, 3 }
   0x6   : > { %s2911_s6 = smov (%p29_p1, %s28_s6), 0  ;;  %p269_p3 = pnand %p2071_p0, %p268_p2 }
   0x7   : > { %s2072_s29 = sshll.u32 (!%p269_p3), %s2609_s26, 4  ;;  %s2073_s30 = sshll.u32 (!%p269_p3), %s2609_s26, 8 }
   0x8   : > { %272 = sbr.rel (%p269_p3) target bundleno = 823 (0x337), region = 48  ;;  %p310_p4 = scmp.lt.s32.totalorder (!%p269_p3), %s2072_s29, 31 }
   0x9   : > { %p317_p5 = scmp.lt.s32.totalorder (!%p269_p3), %s2073_s30, 511  ;;  %p2075_p6 = scmp.ne.s32.totalorder (!%p269_p3), %s2609_s26, 0 }
   0xf   : > { %s2913_s29 = smov (!%p310_p4, %s2072_s29), 31  ;;  %s2915_s30 = smov (!%p317_p5, %s2073_s30), 511 }
  0x10   : > { %s2692_s10 = scalar_lea.vmem %s2900_s0, %s2913_s29  ;;  %s2074_s11 = sshll.u32 %s2915_s30, 2  ;;  %vm331_vm0 = vcmask (!%p2075_p6), 517120   ;;  %v2619_v1 = vmov (!%p2075_p6), 0.0  }
  0x11   : > { %s2697_s14 = scalar_lea.vmem %s2901_s1, %s2074_s11  ;;  %330 = sbr.rel (%p2075_p6) target bundleno = 24 (0x18), region = 52  ;;  %332 = vst.msk [vmem:[#allocation2] sm:$0x3] (!%p2075_p6), %vm331_vm0, %v2619_v1 }
  0x18 PF: > { %v2465_v2 = vld [vmem:[%s2697_s14 + $0x40] sm:$0xff]   ;;  %v2469_v6 = vld [vmem:[%s2697_s14 + $0x48] sm:$0xff]   ;;  %v2473_v10 = vld [vmem:[%s2697_s14 + $0x50] sm:$0xff]   ;;  %v598_v30 = vlaneseq  ;;  %v2620_v38 = vmov 1966171168   ;;  %vm1797_vm1 = vcmask 517120  }
  0x19   : > { %v2466_v3 = vld [vmem:[%s2697_s14 + $0xc0] sm:$0xff]   ;;  %2213 = vmatprep.subr.bf16.mxu0 %v2465_v2  ;;  %v2470_v7 = vld [vmem:[%s2697_s14 + $0xc8] sm:$0xff]   ;;  %v2474_v11 = vld [vmem:[%s2697_s14 + $0xd0] sm:$0xff]   ;;  %v596_v39 = vunpack.c.l.s4 %v2620_v38  ;;  %p2204_p7 = scmp.ne.s32.totalorder %s2609_s26, 1 }
  0x1a   : > { %v2467_v4 = vld [vmem:[%s2697_s14] sm:$0xff]   ;;  %2235 = vmatprep.subr.bf16.mxu1 %v2466_v3  ;;  %v2471_v8 = vld [vmem:[%s2697_s14 + $0x8] sm:$0xff]   ;;  %v2475_v12 = vld [vmem:[%s2697_s14 + $0x10] sm:$0xff]   ;;  %v599_v35 = vshrl.u32 %v598_v30, 7  ;;  %vm2622_vm2 = vmmov (!%p2204_p7), 0   ;;  %vm1830_vm4 = vcmask (!%p2204_p7), 523264  }
  0x1b   : > { %v2468_v5 = vld [vmem:[%s2697_s14 + $0x80] sm:$0xff]   ;;  %2214 = vmatpush3.bf16.msra.mxu0 %v2467_v4  ;;  %v2472_v9 = vld [vmem:[%s2697_s14 + $0x88] sm:$0xff]   ;;  %v2476_v13 = vld [vmem:[%s2697_s14 + $0x90] sm:$0xff]   ;;  %v597_v42 = vunpack.c.0.s8 %v596_v39  ;;  %vm1915_vm6 = vcmask (!%p2204_p7), 64512   ;;  %vm1992_vm8 = vcmask (!%p2204_p7), 1024  }
  0x1c   : > { %2236 = vmatpush3.bf16.msra.mxu1 %v2468_v5  ;;  %2215 = vmatprep.subr.bf16.mxu0 %v2469_v6  ;;  %v2477_v14 = vld [vmem:[%s2697_s14 + $0x58] sm:$0xff]   ;;  %v2481_v18 = vld [vmem:[%s2697_s14 + $0x60] sm:$0xff]   ;;  %v2485_v22 = vld [vmem:[%s2697_s14 + $0x68] sm:$0xff]  }
  0x1d   : > { %2237 = vmatprep.subr.bf16.mxu1 %v2470_v7  ;;  %v2478_v15 = vld [vmem:[%s2697_s14 + $0xd8] sm:$0xff]   ;;  %v2482_v19 = vld [vmem:[%s2697_s14 + $0xe0] sm:$0xff]   ;;  %v2486_v23 = vld [vmem:[%s2697_s14 + $0xe8] sm:$0xff]   ;;  %v2735_v43 = vsub.s32 %v597_v42, %v599_v35 }
  0x1e   : > { %v2479_v16 = vld [vmem:[%s2697_s14 + $0x18] sm:$0xff]   ;;  %v2483_v20 = vld [vmem:[%s2697_s14 + $0x20] sm:$0xff]   ;;  %v2487_v24 = vld [vmem:[%s2697_s14 + $0x28] sm:$0xff]  }
  0x1f   : > { %2216 = vmatpush3.bf16.msra.mxu0 %v2471_v8  ;;  %v2480_v17 = vld [vmem:[%s2697_s14 + $0x98] sm:$0xff]   ;;  %v2484_v21 = vld [vmem:[%s2697_s14 + $0xa0] sm:$0xff]   ;;  %v2488_v25 = vld [vmem:[%s2697_s14 + $0xa8] sm:$0xff]  }
  0x20   : > { %2238 = vmatpush3.bf16.msra.mxu1 %v2472_v9  ;;  %2217 = vmatprep.subr.bf16.mxu0 %v2473_v10  ;;  %v2489_v26 = vld [vmem:[%s2697_s14 + $0x70] sm:$0xff]   ;;  %v2493_v31 = vld [vmem:[%s2697_s14 + $0x78] sm:$0xff]   ;;  %v334_v36 = vld [vmem:[%s2692_s10] sm:$0xff] }
  0x21   : > { %2239 = vmatprep.subr.bf16.mxu1 %v2474_v11  ;;  %v2490_v27 = vld [vmem:[%s2697_s14 + $0xf0] sm:$0xff]   ;;  %v2494_v32 = vld [vmem:[%s2697_s14 + $0xf8] sm:$0xff]   ;;  %v2498_v37 = vld [vmem:[%s2697_s14 + $0x140] sm:$0xff]   ;;  %v594_v41 = vcombine.high %v334_v36, %v334_v36  ;;  %v601_v44 = vrot.slane %v334_v36, %v2735_v43 }
  0x22   : > { %v2491_v28 = vld [vmem:[%s2697_s14 + $0x30] sm:$0xff]   ;;  %v2495_v33 = vld [vmem:[%s2697_s14 + $0x38] sm:$0xff]   ;;  %v2499_v40 = vld [vmem:[%s2697_s14 + $0x1c0] sm:$0xff]  }
  0x23   : > { %2218 = vmatpush3.bf16.msra.mxu0 %v2475_v12  ;;  %v2492_v29 = vld [vmem:[%s2697_s14 + $0xb0] sm:$0xff]   ;;  %v2496_v34 = vld [vmem:[%s2697_s14 + $0xb8] sm:$0xff]   ;;  %v2739_v45 = vrot.slane %v594_v41, %v2735_v43  ;;  %v609_v46 = vcombine.high %v601_v44, %v601_v44  ;;  %v617_v47 = vrot.slane %v601_v44, %v2735_v43  ;;  %v2500_v50 = vld [vmem:[%s2697_s14 + $0x100] sm:$0xff]  }
  0x24   : > { %2240 = vmatpush3.bf16.msra.mxu1 %v2476_v13  ;;  %2219 = vmatprep.subr.bf16.mxu0 %v2477_v14  ;;  %v2502_v53 = vld [vmem:[%s2697_s14 + $0x148] sm:$0xff]   ;;  %v2501_v55 = vld [vmem:[%s2697_s14 + $0x180] sm:$0xff]   ;;  %v2506_v59 = vld [vmem:[%s2697_s14 + $0x150] sm:$0xff]  }
  0x25   : > { %2241 = vmatprep.subr.bf16.mxu1 %v2478_v15  ;;  %v610_v48 = vcombine.high %v2739_v45, %v2739_v45  ;;  %v631_v49 = vrot.slane %v609_v46, %v2735_v43  ;;  %v639_v52 = vcombine.high %v617_v47, %v617_v47  ;;  %v2503_v56 = vld [vmem:[%s2697_s14 + $0x1c8] sm:$0xff]   ;;  %v2507_v61 = vld [vmem:[%s2697_s14 + $0x1d0] sm:$0xff]   ;;  %v2510_v63 = vld [vmem:[%s2697_s14 + $0x158] sm:$0xff]  }
  0x26   : > { %v2504_v58 = vld [vmem:[%s2697_s14 + $0x108] sm:$0xff]   ;;  %v2508_v62 = vld [vmem:[%s2697_s14 + $0x110] sm:$0xff]   ;;  %v2511_v1 = vld [vmem:[%s2697_s14 + $0x1d8] sm:$0xff]  }
  0x27   : > { %2220 = vmatpush3.bf16.msra.mxu0 %v2479_v16  ;;  %v638_v51 = vrot.slane %v610_v48, %v2735_v43  ;;  %1508 = vmatprep.mubr.bf16.mxu0 %v631_v49  ;;  %v641_v54 = vcombine.high %v631_v49, %v631_v49  ;;  %v2505_v60 = vld [vmem:[%s2697_s14 + $0x188] sm:$0xff]   ;;  %v2509_v0 = vld [vmem:[%s2697_s14 + $0x190] sm:$0xff]   ;;  %v2512_v2 = vld [vmem:[%s2697_s14 + $0x118] sm:$0xff]  }
  0x28   : > { %2242 = vmatpush3.bf16.msra.mxu1 %v2480_v17  ;;  %2221 = vmatprep.subr.bf16.mxu0 %v2481_v18  ;;  %v2514_v3 = vld [vmem:[%s2697_s14 + $0x160] sm:$0xff]   ;;  %v2513_v4 = vld [vmem:[%s2697_s14 + $0x198] sm:$0xff]   ;;  %v2518_v7 = vld [vmem:[%s2697_s14 + $0x168] sm:$0xff]  }
  0x29   : > { %2243 = vmatprep.subr.bf16.mxu1 %v2482_v19  ;;  %v642_v57 = vcombine.high %v638_v51, %v638_v51  ;;  %1548 = vmatprep.mubr.bf16.mxu1 %v641_v54  ;;  %v2515_v5 = vld [vmem:[%s2697_s14 + $0x1e0] sm:$0xff]   ;;  %v2519_v9 = vld [vmem:[%s2697_s14 + $0x1e8] sm:$0xff]   ;;  %v2522_v11 = vld [vmem:[%s2697_s14 + $0x170] sm:$0xff]   ;;  %v624_v19 = vrot.slane %v2739_v45, %v2735_v43 }
  0x2a   : > { %v2516_v6 = vld [vmem:[%s2697_s14 + $0x120] sm:$0xff]   ;;  %v2520_v10 = vld [vmem:[%s2697_s14 + $0x128] sm:$0xff]   ;;  %v2523_v13 = vld [vmem:[%s2697_s14 + $0x1f0] sm:$0xff]  }
  0x2b   : > { %2222 = vmatpush3.bf16.msra.mxu0 %v2483_v20  ;;  %v2517_v8 = vld [vmem:[%s2697_s14 + $0x1a0] sm:$0xff]   ;;  %v2521_v12 = vld [vmem:[%s2697_s14 + $0x1a8] sm:$0xff]   ;;  %v2524_v14 = vld [vmem:[%s2697_s14 + $0x130] sm:$0xff]  }
  0x2c   : > { %2244 = vmatpush3.bf16.msra.mxu1 %v2484_v21  ;;  %2223 = vmatprep.subr.bf16.mxu0 %v2485_v22  ;;  %v2526_v15 = vld [vmem:[%s2697_s14 + $0x178] sm:$0xff]   ;;  %v2525_v16 = vld [vmem:[%s2697_s14 + $0x1b0] sm:$0xff]   ;;  %v2530_v20 = vld [vmem:[%s2697_s14 + $0x240] sm:$0xff]  }
  0x2d   : > { %2245 = vmatprep.subr.bf16.mxu1 %v2486_v23  ;;  %v2527_v17 = vld [vmem:[%s2697_s14 + $0x1f8] sm:$0xff]   ;;  %v2531_v22 = vld [vmem:[%s2697_s14 + $0x2c0] sm:$0xff]   ;;  %v2537_v30 = vld [vmem:[%s2697_s14 + $0x288] sm:$0xff]  }
  0x2e   : > { %v2528_v18 = vld [vmem:[%s2697_s14 + $0x138] sm:$0xff]   ;;  %v2532_v23 = vld [vmem:[%s2697_s14 + $0x200] sm:$0xff]   ;;  %v2550_v41 = vld [vmem:[%s2697_s14 + $0x268] sm:$0xff]  }
  0x2f   : > { %2224 = vmatpush3.bf16.msra.mxu0 %v2487_v24  ;;  %v2529_v21 = vld [vmem:[%s2697_s14 + $0x1b8] sm:$0xff]   ;;  %v640_v24 = vcombine.high %v624_v19, %v624_v19  ;;  %v2547_v39 = vld [vmem:[%s2697_s14 + $0x2e0] sm:$0xff]   ;;  %v2551_v44 = vld [vmem:[%s2697_s14 + $0x2e8] sm:$0xff]  }
  0x30   : > { %2246 = vmatpush3.bf16.msra.mxu1 %v2488_v25  ;;  %2225 = vmatprep.subr.bf16.mxu0 %v2489_v26  ;;  %v2534_v25 = vld [vmem:[%s2697_s14 + $0x248] sm:$0xff]   ;;  %v2533_v26 = vld [vmem:[%s2697_s14 + $0x280] sm:$0xff]   ;;  %v2543_v35 = vld [vmem:[%s2697_s14 + $0x2d8] sm:$0xff]  }
  0x31   : > { %2247 = vmatprep.subr.bf16.mxu1 %v2490_v27  ;;  %v2535_v27 = vld [vmem:[%s2697_s14 + $0x2c8] sm:$0xff]   ;;  %v2544_v36 = vld [vmem:[%s2697_s14 + $0x218] sm:$0xff]   ;;  %v2549_v42 = vld [vmem:[%s2697_s14 + $0x2a0] sm:$0xff]  }
  0x32   : > { %v2545_v38 = vld [vmem:[%s2697_s14 + $0x298] sm:$0xff]   ;;  %v2552_v45 = vld [vmem:[%s2697_s14 + $0x228] sm:$0xff]   ;;  %v2554_v46 = vld [vmem:[%s2697_s14 + $0x270] sm:$0xff]  }
  0x33   : > { %2226 = vmatpush3.bf16.msra.mxu0 %v2491_v28  ;;  %v2536_v28 = vld [vmem:[%s2697_s14 + $0x208] sm:$0xff]  }
  0x34   : > { %2248 = vmatpush3.bf16.msra.mxu1 %v2492_v29  ;;  %2227 = vmatprep.subr.bf16.mxu0 %v2493_v31  ;;  %v2538_v29 = vld [vmem:[%s2697_s14 + $0x250] sm:$0xff]   ;;  %v2553_v48 = vld [vmem:[%s2697_s14 + $0x2a8] sm:$0xff]  }
  0x35   : > { %2249 = vmatprep.subr.bf16.mxu1 %v2494_v32  ;;  %v2539_v31 = vld [vmem:[%s2697_s14 + $0x2d0] sm:$0xff]  }
  0x36   : > { %v2540_v32 = vld [vmem:[%s2697_s14 + $0x210] sm:$0xff]  }
  0x37   : > { %2228 = vmatpush3.bf16.msra.mxu0 %v2495_v33  ;;  %v2542_v33 = vld [vmem:[%s2697_s14 + $0x258] sm:$0xff]  }
  0x38   : > { %2250 = vmatpush3.bf16.msra.mxu1 %v2496_v34  ;;  %2257 = vmatprep.subr.bf16.mxu0 %v2498_v37  ;;  %v2541_v34 = vld [vmem:[%s2697_s14 + $0x290] sm:$0xff]   ;;  %v2546_v37 = vld [vmem:[%s2697_s14 + $0x260] sm:$0xff]  }
  0x39   : > { %2279 = vmatprep.subr.bf16.mxu1 %v2499_v40  ;;  %v2548_v40 = vld [vmem:[%s2697_s14 + $0x220] sm:$0xff]  }
  0x3a   : > { %1509 = vmatmul.mubr.bf16.vlgmr.msra.gmra.mrb[0].mxu0 %v617_v47  ;;  %v335_v47 = vld [vmem:[%s2692_s10 + $0x8] sm:$0xff] }
  0x3b   : > { %2258 = vmatpush3.bf16.msra.mxu0 %v2500_v50  ;;  %1549 = vmatmul.mubr.bf16.vlgmr.msra.gmra.mrb[0].mxu1 %v639_v52  ;;  %v650_v49 = vrot.slane %v335_v47, %v2735_v43  ;;  %v643_v50 = vcombine.high %v335_v47, %v335_v47  ;;  %v2556_v52 = vld [vmem:[%s2697_s14 + $0x230] sm:$0xff]  }
  0x3c   : > { %2259 = vmatprep.subr.bf16.mxu0 %v2502_v53  ;;  %2280 = vmatpush3.bf16.msra.mxu1 %v2501_v55  ;;  %v2558_v55 = vld [vmem:[%s2697_s14 + $0x278] sm:$0xff]  }
  0x3d   : > { %1588 = vmatprep.mubr.bf16.mxu0 %v638_v51  ;;  %2281 = vmatprep.subr.bf16.mxu1 %v2503_v56  ;;  %v2555_v51 = vld [vmem:[%s2697_s14 + $0x2f0] sm:$0xff]   ;;  %v658_v53 = vcombine.high %v650_v49, %v650_v49  ;;  %v2808_v54 = vrot.slane %v643_v50, %v2735_v43 }
  0x3e   : > { %1628 = vmatprep.mubr.bf16.mxu1 %v642_v57  ;;  %v2557_v56 = vld [vmem:[%s2697_s14 + $0x2b0] sm:$0xff]  }
  0x3f   : > { %2260 = vmatpush3.bf16.msra.mxu0 %v2504_v58  ;;  %v680_v57 = vrot.slane %v658_v53, %v2735_v43  ;;  %v659_v58 = vcombine.high %v2808_v54, %v2808_v54 }
  0x40   : > { %2261 = vmatprep.subr.bf16.mxu0 %v2506_v59  ;;  %2282 = vmatpush3.bf16.msra.mxu1 %v2505_v60  ;;  %v2559_v59 = vld [vmem:[%s2697_s14 + $0x2f8] sm:$0xff]  }
  0x41   : > { %2283 = vmatprep.subr.bf16.mxu1 %v2507_v61  ;;  %v2560_v60 = vld [vmem:[%s2697_s14 + $0x238] sm:$0xff]   ;;  %v690_v61 = vcombine.high %v680_v57, %v680_v57 }
  0x43   : > { %2262 = vmatpush3.bf16.msra.mxu0 %v2508_v62  ;;  %v666_v62 = vrot.slane %v650_v49, %v2735_v43 }
  0x44   : > { %2263 = vmatprep.subr.bf16.mxu0 %v2510_v63  ;;  %2284 = vmatpush3.bf16.msra.mxu1 %v2509_v0  ;;  %v2562_v63 = vld [vmem:[%s2697_s14 + $0x340] sm:$0xff]   ;;  %v2561_v0 = vld [vmem:[%s2697_s14 + $0x2b8] sm:$0xff]  }
  0x45   : > { %2285 = vmatprep.subr.bf16.mxu1 %v2511_v1  ;;  %v687_v1 = vrot.slane %v659_v58, %v2735_v43 }
  0x47   : > { %2264 = vmatpush3.bf16.msra.mxu0 %v2512_v2  ;;  %v2563_v2 = vld [vmem:[%s2697_s14 + $0x3c0] sm:$0xff]  }
  0x48   : > { %2265 = vmatprep.subr.bf16.mxu0 %v2514_v3  ;;  %2286 = vmatpush3.bf16.msra.mxu1 %v2513_v4  ;;  %v2564_v3 = vld [vmem:[%s2697_s14 + $0x300] sm:$0xff]   ;;  %v688_v4 = vcombine.high %v666_v62, %v666_v62 }
  0x49   : > { %2287 = vmatprep.subr.bf16.mxu1 %v2515_v5  ;;  %v2566_v5 = vld [vmem:[%s2697_s14 + $0x348] sm:$0xff]  }
  0x4b   : > { %2266 = vmatpush3.bf16.msra.mxu0 %v2516_v6  ;;  %v2565_v6 = vld [vmem:[%s2697_s14 + $0x380] sm:$0xff]  }
  0x4c   : > { %2267 = vmatprep.subr.bf16.mxu0 %v2518_v7  ;;  %2288 = vmatpush3.bf16.msra.mxu1 %v2517_v8  ;;  %v691_v7 = vcombine.high %v687_v1, %v687_v1  ;;  %v2567_v8 = vld [vmem:[%s2697_s14 + $0x3c8] sm:$0xff]  }
  0x4d   : > { %2289 = vmatprep.subr.bf16.mxu1 %v2519_v9  ;;  %v2568_v9 = vld [vmem:[%s2697_s14 + $0x308] sm:$0xff]  }
  0x4f   : > { %2268 = vmatpush3.bf16.msra.mxu0 %v2520_v10  ;;  %v2570_v10 = vld [vmem:[%s2697_s14 + $0x350] sm:$0xff]  }
  0x50   : > { %2269 = vmatprep.subr.bf16.mxu0 %v2522_v11  ;;  %2290 = vmatpush3.bf16.msra.mxu1 %v2521_v12  ;;  %v2569_v11 = vld [vmem:[%s2697_s14 + $0x388] sm:$0xff]   ;;  %v2571_v12 = vld [vmem:[%s2697_s14 + $0x3d0] sm:$0xff]  }
  0x51   : > { %2291 = vmatprep.subr.bf16.mxu1 %v2523_v13  ;;  %v2572_v13 = vld [vmem:[%s2697_s14 + $0x310] sm:$0xff]  }
  0x53   : > { %2270 = vmatpush3.bf16.msra.mxu0 %v2524_v14  ;;  %v2574_v14 = vld [vmem:[%s2697_s14 + $0x358] sm:$0xff]  }
  0x54   : > { %2271 = vmatprep.subr.bf16.mxu0 %v2526_v15  ;;  %2292 = vmatpush3.bf16.msra.mxu1 %v2525_v16  ;;  %v2573_v15 = vld [vmem:[%s2697_s14 + $0x390] sm:$0xff]   ;;  %v2575_v16 = vld [vmem:[%s2697_s14 + $0x3d8] sm:$0xff]  }
  0x55   : > { %2293 = vmatprep.subr.bf16.mxu1 %v2527_v17  ;;  %v2576_v17 = vld [vmem:[%s2697_s14 + $0x318] sm:$0xff]  }
  0x57   : > { %2272 = vmatpush3.bf16.msra.mxu0 %v2528_v18  ;;  %v2578_v18 = vld [vmem:[%s2697_s14 + $0x360] sm:$0xff]  }
  0x58   : > { %2301 = vmatprep.subr.bf16.mxu0 %v2530_v20  ;;  %2294 = vmatpush3.bf16.msra.mxu1 %v2529_v21  ;;  %v2579_v20 = vld [vmem:[%s2697_s14 + $0x3e0] sm:$0xff]  }
  0x59   : > { %2323 = vmatprep.subr.bf16.mxu1 %v2531_v22  ;;  %v2580_v21 = vld [vmem:[%s2697_s14 + $0x320] sm:$0xff]   ;;  %v2582_v22 = vld [vmem:[%s2697_s14 + $0x368] sm:$0xff]  }
  0x5a   : > { %1589 = vmatmul.mubr.bf16.vlgmr.msra.gmra.mrb[4].mxu0 %v624_v19  ;;  %v2577_v19 = vld [vmem:[%s2697_s14 + $0x398] sm:$0xff]  }
  0x5b   : > { %2302 = vmatpush3.bf16.msra.mxu0 %v2532_v23  ;;  %1629 = vmatmul.mubr.bf16.vlgmr.msra.gmra.mrb[4].mxu1 %v640_v24  ;;  %v2581_v23 = vld [vmem:[%s2697_s14 + $0x3a0] sm:$0xff]   ;;  %v2583_v24 = vld [vmem:[%s2697_s14 + $0x3e8] sm:$0xff]  }
  0x5c   : > { %2303 = vmatprep.subr.bf16.mxu0 %v2534_v25  ;;  %2324 = vmatpush3.bf16.msra.mxu1 %v2533_v26  ;;  %v2584_v25 = vld [vmem:[%s2697_s14 + $0x328] sm:$0xff]   ;;  %v2586_v26 = vld [vmem:[%s2697_s14 + $0x370] sm:$0xff]  }
  0x5d   : > { %2325 = vmatprep.subr.bf16.mxu1 %v2535_v27  ;;  %1668 = vmatprep.mubr.bf16.mxu0 %v680_v57  ;;  %v2585_v27 = vld [vmem:[%s2697_s14 + $0x3a8] sm:$0xff]  }
  0x5e   : > { %1708 = vmatprep.mubr.bf16.mxu1 %v690_v61 }
  0x5f   : > { %2304 = vmatpush3.bf16.msra.mxu0 %v2536_v28  ;;  %v2587_v28 = vld [vmem:[%s2697_s14 + $0x3f0] sm:$0xff]  }
  0x60   : > { %2305 = vmatprep.subr.bf16.mxu0 %v2538_v29  ;;  %2326 = vmatpush3.bf16.msra.mxu1 %v2537_v30  ;;  %v2588_v29 = vld [vmem:[%s2697_s14 + $0x330] sm:$0xff]   ;;  %v2590_v30 = vld [vmem:[%s2697_s14 + $0x378] sm:$0xff]  }
  0x61   : > { %2327 = vmatprep.subr.bf16.mxu1 %v2539_v31  ;;  %v2589_v31 = vld [vmem:[%s2697_s14 + $0x3b0] sm:$0xff]  }
  0x63   : > { %2306 = vmatpush3.bf16.msra.mxu0 %v2540_v32  ;;  %v2591_v32 = vld [vmem:[%s2697_s14 + $0x3f8] sm:$0xff]  }
  0x64   : > { %2307 = vmatprep.subr.bf16.mxu0 %v2542_v33  ;;  %2328 = vmatpush3.bf16.msra.mxu1 %v2541_v34  ;;  %v2592_v33 = vld [vmem:[%s2697_s14 + $0x338] sm:$0xff]   ;;  %v673_v34 = vrot.slane %v2808_v54, %v2735_v43 }
  0x65   : > { %2329 = vmatprep.subr.bf16.mxu1 %v2543_v35  ;;  %v2593_v35 = vld [vmem:[%s2697_s14 + $0x3b8] sm:$0xff]  }
  0x67   : > { %2308 = vmatpush3.bf16.msra.mxu0 %v2544_v36  ;;  %v689_v36 = vcombine.high %v673_v34, %v673_v34 }
  0x68   : > { %2309 = vmatprep.subr.bf16.mxu0 %v2546_v37  ;;  %2330 = vmatpush3.bf16.msra.mxu1 %v2545_v38 }
  0x69   : > { %2331 = vmatprep.subr.bf16.mxu1 %v2547_v39 }
  0x6b   : > { %2310 = vmatpush3.bf16.msra.mxu0 %v2548_v40 }
  0x6c   : > { %2311 = vmatprep.subr.bf16.mxu0 %v2550_v41  ;;  %2332 = vmatpush3.bf16.msra.mxu1 %v2549_v42 }
  0x6d   : > { %2333 = vmatprep.subr.bf16.mxu1 %v2551_v44 }
  0x6f   : > { %2312 = vmatpush3.bf16.msra.mxu0 %v2552_v45 }
  0x70   : > { %2313 = vmatprep.subr.bf16.mxu0 %v2554_v46  ;;  %2334 = vmatpush3.bf16.msra.mxu1 %v2553_v48 }
  0x71   : > { %2335 = vmatprep.subr.bf16.mxu1 %v2555_v51 }
  0x73   : > { %2314 = vmatpush3.bf16.msra.mxu0 %v2556_v52 }
  0x74   : > { %2315 = vmatprep.subr.bf16.mxu0 %v2558_v55  ;;  %2336 = vmatpush3.bf16.msra.mxu1 %v2557_v56 }
  0x75   : > { %2337 = vmatprep.subr.bf16.mxu1 %v2559_v59 }
  0x77   : > { %2316 = vmatpush3.bf16.msra.mxu0 %v2560_v60 }
  0x78   : > { %2345 = vmatprep.subr.bf16.mxu0 %v2562_v63  ;;  %2338 = vmatpush3.bf16.msra.mxu1 %v2561_v0 }
  0x79   : > { %2367 = vmatprep.subr.bf16.mxu1 %v2563_v2 }
  0x7a   : > { %1669 = vmatmul.mubr.bf16.vlgmr.msra.gmra.mrb[8].mxu0 %v666_v62 }
  0x7b   : > { %2346 = vmatpush3.bf16.msra.mxu0 %v2564_v3  ;;  %1748 = vmatprep.mubr.bf16.mxu0 %v687_v1 }
  0x7c   : > { %1709 = vmatmul.mubr.bf16.vlgmr.msra.gmra.mrb[8].mxu1 %v688_v4  ;;  %2347 = vmatprep.subr.bf16.mxu0 %v2566_v5 }
  0x7d   : > { %2368 = vmatpush3.bf16.msra.mxu1 %v2565_v6  ;;  %1788 = vmatprep.mubr.bf16.mxu1 %v691_v7 }
  0x7e   : > { %2369 = vmatprep.subr.bf16.mxu1 %v2567_v8 }
  0x7f   : > { %2348 = vmatpush3.bf16.msra.mxu0 %v2568_v9 }
  0x80   : > { %2349 = vmatprep.subr.bf16.mxu0 %v2570_v10 }
  0x81   : > { %2370 = vmatpush3.bf16.msra.mxu1 %v2569_v11 }
  0x82   : > { %2371 = vmatprep.subr.bf16.mxu1 %v2571_v12 }
  0x83   : > { %2350 = vmatpush3.bf16.msra.mxu0 %v2572_v13 }
  0x84   : > { %2351 = vmatprep.subr.bf16.mxu0 %v2574_v14 }
  0x85   : > { %2372 = vmatpush3.bf16.msra.mxu1 %v2573_v15 }
  0x86   : > { %2373 = vmatprep.subr.bf16.mxu1 %v2575_v16 }
  0x87   : > { %2352 = vmatpush3.bf16.msra.mxu0 %v2576_v17 }
  0x88   : > { %2353 = vmatprep.subr.bf16.mxu0 %v2578_v18  ;;  %v333_v18 = vld [vmem:[#allocation2] sm:$0x3] }
  0x89   : > { %2374 = vmatpush3.bf16.msra.mxu1 %v2577_v19 }
  0x8a   : > { %2375 = vmatprep.subr.bf16.mxu1 %v2579_v20 }
  0x8b   : > { %2354 = vmatpush3.bf16.msra.mxu0 %v2580_v21 }
  0x8c   : > { %2355 = vmatprep.subr.bf16.mxu0 %v2582_v22  ;;  %v1815_v22 = vld [vmem:[%s2903_s3] sm:$0xff] (!%p2204_p7) }
  0x8d   : > { %2376 = vmatpush3.bf16.msra.mxu1 %v2581_v23  ;;  %v1816_v23 = vld [vmem:[%s2903_s3 + $0x8] sm:$0xff] (!%p2204_p7) }
  0x8e   : > { %2377 = vmatprep.subr.bf16.mxu1 %v2583_v24  ;;  %v1817_v24 = vld [vmem:[%s2903_s3 + $0x10] sm:$0xff] (!%p2204_p7) }
  0x8f   : > { %2356 = vmatpush3.bf16.msra.mxu0 %v2584_v25  ;;  %v2621_v25 = vmov (!%p2204_p7), 0.0|0.0  }
  0x90   : > { %2357 = vmatprep.subr.bf16.mxu0 %v2586_v26  ;;  %v2425_v26 = vpack.c.bf16 (!%p2204_p7), %v1816_v23, %v1815_v22 }
  0x91   : > { %2378 = vmatpush3.bf16.msra.mxu1 %v2585_v27  ;;  %v1818_v27 = vld [vmem:[%s2903_s3 + $0x18] sm:$0xff] (!%p2204_p7) }
  0x92   : > { %2379 = vmatprep.subr.bf16.mxu1 %v2587_v28  ;;  %v2623_v28 = vmov (!%p2204_p7), 0.0  }
  0x93   : > { %2358 = vmatpush3.bf16.msra.mxu0 %v2588_v29  ;;  %v2428_v29 = vpack.c.bf16 (!%p2204_p7), %v1818_v27, %v1817_v24 }
  0x94   : > { %2359 = vmatprep.subr.bf16.mxu0 %v2590_v30  ;;  %v1819_v30 = vld [vmem:[%s2903_s3 + $0x20] sm:$0xff] (!%p2204_p7) }
  0x95   : > { %2380 = vmatpush3.bf16.msra.mxu1 %v2589_v31  ;;  %v1820_v31 = vld [vmem:[%s2903_s3 + $0x28] sm:$0xff] (!%p2204_p7) }
  0x96   : > { %2381 = vmatprep.subr.bf16.mxu1 %v2591_v32 }
  0x97   : > { %2360 = vmatpush3.bf16.msra.mxu0 %v2592_v33  ;;  %v2205_v33 = vld [vmem:[%s2902_s2] ss:$0 sm:$0xff] (!%p2204_p7) }
  0x98   : > { %2424 = vmatprep.subr.bf16.mxu0 (!%p2204_p7), %v2621_v25 }
  0x99   : > { %2382 = vmatpush3.bf16.msra.mxu1 %v2593_v35 }
  0x9a   : > { %1749 = vmatmul.mubr.bf16.vlgmr.msra.gmra.mrb[12].mxu0 %v673_v34  ;;  %2419 = vmatprep.subr.mxu1 (!%p2204_p7), %v2623_v28  ;;  %v2431_v34 = vpack.c.bf16 (!%p2204_p7), %v1820_v31, %v1819_v30 }
  0x9b   : > { %2416 = vmatprep.mubr.msk.f32.mxu0 (!%p2204_p7), %vm2622_vm2, %v2623_v28  ;;  %2426 = vmatpush3.bf16.msra.mxu0 (!%p2204_p7), %v2425_v26 }
  0x9c   : > { %1789 = vmatmul.mubr.bf16.vlgmr.msra.gmra.mrb[12].mxu1 %v689_v36  ;;  %2427 = vmatprep.subr.bf16.mxu0 (!%p2204_p7), %v2621_v25  ;;  %v1821_v36 = vld [vmem:[%s2903_s3 + $0x30] sm:$0xff] (!%p2204_p7) }
  0x9d   : > { %2421 = vmatprep.mubr.msk.f32.mxu1 (!%p2204_p7), %vm2622_vm2, %v2623_v28 }
  0x9f   : > { %2429 = vmatpush3.bf16.msra.mxu0 (!%p2204_p7), %v2428_v29 }
  0xa0   : > { %2430 = vmatprep.subr.bf16.mxu0 (!%p2204_p7), %v2621_v25 }
  0xa3   : > { %2432 = vmatpush3.bf16.msra.mxu0 (!%p2204_p7), %v2431_v34 }
  0xa4   : > { %2433 = vmatprep.subr.bf16.mxu0 (!%p2204_p7), %v2621_v25 }
 0x10d   : > { %v2229_v37 = vpop.f32.mrb[0].mxu0 }
 0x10e   : > { %v2230_v38 = vpop.f32.mrb[1].mxu0  ;;  %v2251_v39 = vpop.f32.mrb[0].mxu1 }
 0x10f   : > { %v2231_v40 = vadd.f32 %v2230_v38, %v2229_v37  ;;  %v2232_v41 = vpop.f32.mrb[2].mxu0  ;;  %v2252_v42 = vpop.f32.mrb[1].mxu1  ;;  %v1822_v37 = vld [vmem:[%s2903_s3 + $0x38] sm:$0xff] (!%p2204_p7) }
 0x110   : > { %v2233_v44 = vpop.f32.mrb[3].mxu0  ;;  %v2253_v45 = vadd.f32 %v2252_v42, %v2251_v39  ;;  %v2254_v46 = vpop.f32.mrb[2].mxu1  ;;  %v2434_v38 = vpack.c.bf16 (!%p2204_p7), %v1822_v37, %v1821_v36  ;;  %v1907_v41 = vld [vmem:[%s2905_s5] sm:$0xff] (!%p2204_p7) }
 0x111   : > { %v2255_v47 = vpop.f32.mrb[3].mxu1  ;;  %2420 = vmatpush3.msra.mxu1 (!%p2204_p7), %v1907_v41  ;;  %v2206_v42 = vld [vmem:[%s2904_s4] ss:$0 sm:$0xff] (!%p2204_p7) }
 0x112   : > { %v1551_v48 = vadd.f32 %v2253_v45, %v2231_v40  ;;  %2435 = vmatpush3.bf16.msra.mxu0 (!%p2204_p7), %v2434_v38 }
 0x12d   : > { %v2273_v43 = vpop.f32.mrb[4].mxu0 }
 0x12e   : > { %v2274_v49 = vpop.f32.mrb[5].mxu0  ;;  %v2295_v50 = vpop.f32.mrb[4].mxu1 }
 0x12f   : > { %v2275_v51 = vadd.f32 %v2274_v49, %v2273_v43  ;;  %v2276_v52 = vpop.f32.mrb[6].mxu0  ;;  %v2296_v53 = vpop.f32.mrb[5].mxu1  ;;  %v2208_v43 = vld [vmem:[#allocation3] ss:$0 sm:$0xff] (!%p2204_p7) }
 0x130   : > { %v2277_v54 = vpop.f32.mrb[7].mxu0  ;;  %v2297_v56 = vadd.f32 %v2296_v53, %v2295_v50  ;;  %v2298_v57 = vpop.f32.mrb[6].mxu1 }
 0x131   : > { %v1591_v55 = vadd.f32 %v2275_v51, %v1551_v48  ;;  %v2299_v58 = vpop.f32.mrb[7].mxu1 }
 0x133   : > { %v1631_v59 = vadd.f32 %v2297_v56, %v1591_v55 }
 0x14d   : > { %v2317_v60 = vpop.f32.mrb[8].mxu0 }
 0x14e   : > { %v2318_v61 = vpop.f32.mrb[9].mxu0 }
 0x14f   : > { %v2339_v62 = vpop.f32.mrb[8].mxu1  ;;  %v2319_v63 = vadd.f32 %v2318_v61, %v2317_v60  ;;  %v2320_v0 = vpop.f32.mrb[10].mxu0 }
 0x150   : > { %v2340_v1 = vpop.f32.mrb[9].mxu1  ;;  %v2321_v2 = vpop.f32.mrb[11].mxu0 }
 0x151   : > { %v1671_v3 = vadd.f32 %v2319_v63, %v1631_v59  ;;  %v2341_v4 = vadd.f32 %v2340_v1, %v2339_v62  ;;  %v2342_v5 = vpop.f32.mrb[10].mxu1 }
 0x152   : > { %v2343_v6 = vpop.f32.mrb[11].mxu1 }
 0x153   : > { %v1711_v7 = vadd.f32 %v2341_v4, %v1671_v3 }
 0x16d   : > { %v2361_v8 = vpop.f32.mrb[12].mxu0 }
 0x16e   : > { %v2362_v9 = vpop.f32.mrb[13].mxu0 }
 0x16f   : > { %v2383_v10 = vpop.f32.mrb[12].mxu1  ;;  %v2363_v11 = vadd.f32 %v2362_v9, %v2361_v8  ;;  %v2364_v12 = vpop.f32.mrb[14].mxu0 }
 0x170   : > { %v2384_v13 = vpop.f32.mrb[13].mxu1  ;;  %v2365_v14 = vpop.f32.mrb[15].mxu0 }
 0x171   : > { %v1751_v15 = vadd.f32 %v2363_v11, %v1711_v7  ;;  %v2385_v16 = vadd.f32 %v2384_v13, %v2383_v10  ;;  %v2386_v17 = vpop.f32.mrb[14].mxu1  ;;  %1802 = sbr.rel (%p2204_p7) target bundleno = 823 (0x337), region = 56 }
 0x172   : > { %v2387_v19 = vpop.f32.mrb[15].mxu1 }
 0x173   : > { %v1791_v20 = vadd.f32 %v2385_v16, %v1751_v15 }
 0x175   : > { %v1796_v21 = vadd.f32 %v1791_v20, %v333_v18 }
 0x177   : > { %1798 = vst.msk [vmem:[#allocation2] sm:$0x3] %vm1797_vm1, %v1796_v21 }
 0x17e   : > { %v1803_v32 = vld [vmem:[#allocation2] sm:$0x3] }
 0x17f   : > { %v1811_v35 = vadd.f32 %v2205_v33, %v1803_v32 }
 0x181   : > { %v1813_v39 = vmul.f32 0.01, %v1811_v35  ;;  %vm1812_vm3 = vcmp.ge.f32.partialorder %v1811_v35, 0.0 }
 0x183   : > { %v1814_v40 = vsel %vm1812_vm3, %v1811_v35, %v1813_v39 }
 0x184   : > { %2417 = vmatmul.mubr.msk.f32.vlgmr.msra.gmra.mrb[0].mxu0 %vm1830_vm4, %v1814_v40 }
 0x257   : > { %v1900_v44 = vpop.f32.mrb[0].mxu0 }
 0x258   : > { %v1901_v45 = vadd.f32 %v2206_v42, %v1900_v44  ;;  %v2418_v46 = vpop.f32.mrb[1].mxu0 }
 0x25a   : > { %vm1904_vm5 = vcmp.ge.f32.partialorder %v1901_v45, 0.0  ;;  %v1905_v47 = vmul.f32 0.01, %v1901_v45 }
 0x25c   : > { %v1906_v48 = vsel %vm1904_vm5, %v1901_v45, %v1905_v47 }
 0x25d   : > { %2422 = vmatmul.mubr.msk.f32.vlgmr.msra.gmra.mrb[0].mxu1 %vm1915_vm6, %v1906_v48 }
 0x330   : > { %v1985_v49 = vpop.f32.mrb[0].mxu1 }
 0x331   : > { %v1986_v50 = vadd.f32 %v2208_v43, %v1985_v49  ;;  %v2423_v51 = vpop.f32.mrb[1].mxu1 }
 0x333   : > { %vm1989_vm7 = vcmp.ge.f32.partialorder %v1986_v50, 0.0  ;;  %v1990_v52 = vmul.f32 0.01, %v1986_v50 }
 0x335   : > { %v1991_v53 = vsel %vm1989_vm7, %v1986_v50, %v1990_v52 }
 0x336   : > { %1993 = vst.msk [vmem:[%s2907_s7] sm:$0x3] %vm1992_vm8, %v1991_v53 }
 0x337 PF: > { %s19_s28 = sadd.s32 1, %s2617_s28   ;;  %s2908_s26 = smov %s2613_s27 }
 0x338   : > { %p16_p8 = scmp.ge.s32.totalorder %s19_s28, 4   ;;  %s2909_s27 = smov %s2911_s6 }
 0x33a   :  { %18 = sbr.rel (!%p16_p8) target bundleno = 3 (0x3), region = 89 }

</bundles_post_ra>
